<compile_context>
chip_gen: v7x
topology: tpu7x:2x2x1
jax: 0.10.0
libtpu: 0.0.40
codegen_flags: <defaults>
</compile_context>

<pallas_src>
import jax
import jax.numpy as jnp
from jax.experimental import pallas as pl
from jax.experimental.pallas import tpu as pltpu

EPS = 1e-3     # BatchNorm2d eps used by the torch module
LANE = 128     # TPU lane width
TM_MAX = 512   # max rows per M-tile

_VMEM_CAP = None


def _round_up(x, m):
    return (x + m - 1) // m * m


def _vmem_cap_bytes():
    """Per-core VMEM capacity (v5e/v6e: 128 MiB, v7x: 64 MiB)."""
    global _VMEM_CAP
    if _VMEM_CAP is None:
        try:
            cap = int(pltpu.get_tpu_info().vmem_capacity_bytes)
        except Exception:
            cap = 64 << 20            # conservative v7x per-core floor
        _VMEM_CAP = max(32 << 20, min(cap, 128 << 20))
    return _VMEM_CAP


# ----------------------------------------------------------------------------
# Kernel 1: tiled matmul (bf16 operands, f32 accumulation) + per-channel stats
# ----------------------------------------------------------------------------
def _matmul_stats_kernel(x_ref, w_ref, y_ref, stats_ref):
    # x_ref: (TM, Kp) bf16 patch tile.   w_ref: (Kp, Cp) bf16 weights.
    # y_ref: (TM, Cp) bf16 pre-BN conv output tile (streamed per grid step).
    # stats_ref: (8, Cp) f32 per-core resident accumulator; row0=sum, row1=sum^2.
    @pl.when(pl.program_id(1) == 0)
    def _init():
        stats_ref[...] = jnp.zeros_like(stats_ref)

    y = jnp.dot(x_ref[...], w_ref[...], preferred_element_type=jnp.float32)  # MXU
    y_ref[...] = y.astype(y_ref.dtype)
    stats_ref[0:1, :] += jnp.sum(y, axis=0, keepdims=True)
    stats_ref[1:2, :] += jnp.sum(y * y, axis=0, keepdims=True)


# ----------------------------------------------------------------------------
# Kernel 2: folded BatchNorm affine + SiLU (+ optional fused residual add)
# ----------------------------------------------------------------------------
def _bn_silu_kernel(y_ref, scale_ref, bias_ref, o_ref):
    z = y_ref[...].astype(jnp.float32) * scale_ref[...] + bias_ref[...]
    o_ref[...] = (z * jax.nn.sigmoid(z)).astype(o_ref.dtype)


def _bn_silu_add_kernel(y_ref, res_ref, scale_ref, bias_ref, o_ref):
    z = y_ref[...].astype(jnp.float32) * scale_ref[...] + bias_ref[...]
    o_ref[...] = (z * jax.nn.sigmoid(z)
                  + res_ref[...].astype(jnp.float32)).astype(o_ref.dtype)


def conv_bn_silu(cols, w2d, gamma, beta, residual=None):
    """Fused conv-as-matmul + train-mode BN + SiLU (+ residual add).

    cols: (M, K) patches/activation, w2d: (K, C).  Returns (M, C) bf16.
    """
    M, K = cols.shape
    C = w2d.shape[1]
    Cp = _round_up(C, LANE)                 # lane-dense output (unmasked stores)

    # Contraction-dim alignment: pad K to 128 lanes when the extra zero compute
    # is modest (<25%); otherwise keep K (it is already a sublane multiple of 8).
    Kp = _round_up(K, LANE)
    if Kp - K > K // 4:
        Kp = _round_up(K, 8)

    # Balanced M tiling (no ragged tail tile), then split across 2 TensorCores
    # when there is enough work (no-op / sequential on 1-TC chips).
    n_tiles = -(-M // TM_MAX)
    TM = _round_up(-(-M // n_tiles), 8)
    n_tiles = -(-M // TM)
    num_cores = 2 if n_tiles >= 2 else 1
    gm = -(-n_tiles // num_cores)
    total_tiles = num_cores * gm
    Mp = total_tiles * TM

    # Zero padding: zero patch rows -> zero conv rows -> no effect on the stats
    # because we divide by the true M below; zero K-columns add nothing.
    cols = cols.astype(jnp.bfloat16)
    if Mp != M or Kp != K:
        cols = jnp.pad(cols, ((0, Mp - M), (0, Kp - K)))
    if Kp != K or Cp != C:
        w2d = jnp.pad(w2d, ((0, Kp - K), (0, Cp - C)))
    if Cp != C:
        gamma = jnp.pad(gamma, (0, Cp - C), constant_values=1.0)
        beta = jnp.pad(beta, (0, Cp - C))
    w_bf = w2d.astype(jnp.bfloat16)

    need = 2 * (TM * Kp * 2 + Kp * Cp * 2 + TM * Cp * 2 + 8 * Cp * 4)
    vmem_limit = int(min(_vmem_cap_bytes() - (8 << 20),
                         max(4 * need, 16 << 20)))

    y, stats = pl.pallas_call(
        _matmul_stats_kernel,
        out_shape=(
            jax.ShapeDtypeStruct((Mp, Cp), jnp.bfloat16),
            jax.ShapeDtypeStruct((num_cores * 8, Cp), jnp.float32),
        ),
        grid=(num_cores, gm),
        in_specs=[
            pl.BlockSpec((TM, Kp), lambda p, i, gm=gm: (p * gm + i, 0)),
            pl.BlockSpec((Kp, Cp), lambda p, i: (0, 0)),
        ],
        out_specs=(
            pl.BlockSpec((TM, Cp), lambda p, i, gm=gm: (p * gm + i, 0)),
            pl.BlockSpec((8, Cp), lambda p, i: (p, 0)),     # per-core resident acc
        ),
        compiler_params=pltpu.CompilerParams(
            dimension_semantics=("parallel", "arbitrary"),
            vmem_limit_bytes=vmem_limit,
        ),
        cost_estimate=pl.CostEstimate(
            flops=2 * Mp * Kp * Cp,
            transcendentals=0,
            bytes_accessed=Mp * Kp * 2 + Kp * Cp * 2 + Mp * Cp * 2
                           + num_cores * 8 * Cp * 4,
        ),
    )(cols, w_bf)

    # Fold global batch statistics into one scale/bias per channel (tiny vectors).
    # TODO(synk): shifted (per-tile-mean) accumulation would remove the residual
    # E[y^2]-E[y]^2 cancellation risk when |mean| >> std.
    s = stats.reshape(num_cores, 8, Cp).sum(axis=0)
    m = jnp.float32(M)
    mean = s[0] / m
    var = jnp.maximum(s[1] / m - mean * mean, 0.0)
    scale = gamma * jax.lax.rsqrt(var + EPS)
    bias = beta - mean * scale

    if residual is not None:
        residual = residual.astype(jnp.bfloat16)
        if Mp != M or Cp != C:
            residual = jnp.pad(residual, ((0, Mp - M), (0, Cp - C)))
        kernel = _bn_silu_add_kernel
        extra_in = [residual]
        extra_specs = [pl.BlockSpec((TM, Cp), lambda i: (i, 0))]
    else:
        kernel = _bn_silu_kernel
        extra_in = []
        extra_specs = []

    out = pl.pallas_call(
        kernel,
        out_shape=jax.ShapeDtypeStruct((Mp, Cp), jnp.bfloat16),
        grid=(total_tiles,),
        in_specs=[pl.BlockSpec((TM, Cp), lambda i: (i, 0))]
                 + extra_specs
                 + [pl.BlockSpec((1, Cp), lambda i: (0, 0)),
                    pl.BlockSpec((1, Cp), lambda i: (0, 0))],
        out_specs=pl.BlockSpec((TM, Cp), lambda i: (i, 0)),
        compiler_params=pltpu.CompilerParams(
            dimension_semantics=("parallel",),          # megacore on v7x
            vmem_limit_bytes=vmem_limit,
        ),
        cost_estimate=pl.CostEstimate(
            flops=4 * Mp * Cp,
            transcendentals=Mp * Cp,
            bytes_accessed=(2 + len(extra_in)) * Mp * Cp * 2 + 2 * Cp * 4,
        ),
    )(y, *extra_in, scale.reshape(1, Cp), bias.reshape(1, Cp))

    return out[:M, :C]


# ----------------------------------------------------------------------------
# JAX glue: patches, Conv/Residual/CSP/DarkFPN composition
# ----------------------------------------------------------------------------
def _im2col(x, k, s):
    """k x k / stride-s patches (pad=k//2), bf16, as (M, k*k*Cin)."""
    # TODO(synk): replace the HBM-materialized patches with in-kernel shifted
    # matmuls over the k*k taps (halo via manual DMA / a tap grid axis) to remove
    # the k^2 HBM read amplification of 3x3 convs.
    pd = k // 2
    N, H, W, Cin = x.shape
    xp = jnp.pad(x.astype(jnp.bfloat16), ((0, 0), (pd, pd), (pd, pd), (0, 0)))
    Ho = (H + 2 * pd - k) // s + 1
    Wo = (W + 2 * pd - k) // s + 1
    cols = []
    for kh in range(k):
        for kw in range(k):
            cols.append(
                jax.lax.slice(
                    xp,
                    (0, kh, kw, 0),
                    (N, kh + (Ho - 1) * s + 1, kw + (Wo - 1) * s + 1, Cin),
                    (1, s, s, 1),
                )
            )
    cols = jnp.concatenate(cols, axis=-1).reshape(N * Ho * Wo, k * k * Cin)
    return cols, Ho, Wo


def conv_fwd(p, x, s=1, residual=None):
    """Conv(k, s, pad=k//2) + BN(batch stats) + SiLU (+ fused residual), NHWC."""
    k = p["k"]
    N, H, W, Cin = x.shape
    if k == 1 and s == 1:
        Ho, Wo = H, W
        cols = x.reshape(N * H * W, Cin)    # 1x1 conv: pure reshape, no im2col
    else:
        cols, Ho, Wo = _im2col(x, k, s)
    w2d = p["w"].reshape(k * k * Cin, -1)
    C = w2d.shape[1]
    res2d = None if residual is None else residual.reshape(N * Ho * Wo, C)
    out = conv_bn_silu(cols, w2d, p["gamma"], p["beta"], residual=res2d)
    return out.reshape(N, Ho, Wo, C)


def residual_fwd(p, x, add):
    y = conv_fwd(p[0], x)
    if add:
        # residual add fused into the second conv's BN+SiLU epilogue
        return conv_fwd(p[1], y, residual=x)
    return conv_fwd(p[1], y)


def csp_fwd(p, x, add=False):
    N, H, W, Cin = x.shape
    c1, c2 = p["conv1"], p["conv2"]
    half = c1["w"].shape[-1]
    # conv1 & conv2 are 1x1 convs on the same input: fuse into one lane-dense matmul.
    w12 = jnp.concatenate([c1["w"], c2["w"]], axis=-1).reshape(Cin, 2 * half)
    g12 = jnp.concatenate([c1["gamma"], c2["gamma"]])
    b12 = jnp.concatenate([c1["beta"], c2["beta"]])
    y12 = conv_bn_silu(x.reshape(N * H * W, Cin), w12, g12, b12)
    y12 = y12.reshape(N, H, W, 2 * half)
    y = [y12[..., :half], y12[..., half:]]
    for r in p["res"]:
        y.append(residual_fwd(r, y[-1], add))
    return conv_fwd(p["conv3"], jnp.concatenate(y, axis=-1))


def upsample2(x):  # nearest-neighbor x2 (torch.nn.Upsample(None, 2))
    # TODO(synk): fold upsample + channel-concat into the downstream 1x1 conv's
    # kernel (split weights along K + in-kernel row gather) to avoid the 4x HBM
    # intermediate and the concat copy.
    return jnp.repeat(jnp.repeat(x, 2, axis=1), 2, axis=2)


def darkfpn_fwd(params, p3, p4, p5):
    h1 = csp_fwd(params["h1"], jnp.concatenate([upsample2(p5), p4], axis=-1))
    h2 = csp_fwd(params["h2"], jnp.concatenate([upsample2(h1), p3], axis=-1))
    h4 = csp_fwd(params["h4"], jnp.concatenate([conv_fwd(params["h3"], h2, s=2), h1], axis=-1))
    h6 = csp_fwd(params["h6"], jnp.concatenate([conv_fwd(params["h5"], h4, s=2), p5], axis=-1))
    return h2, h4, h6


# ----------------------------------------------------------------------------
# Deterministic parameter construction (matches torch module shapes)
# ----------------------------------------------------------------------------
class KeyGen:
    def __init__(self, key):
        self.key = key

    def __call__(self):
        self.key, sub = jax.random.split(self.key)
        return sub


def make_conv(kg, cin, cout, k=1):
    return {
        "k": k,
        "w": jax.random.normal(kg(), (k, k, cin, cout), jnp.float32) * 0.05,
        "gamma": jnp.ones((cout,), jnp.float32),   # torch BN default init
        "beta": jnp.zeros((cout,), jnp.float32),
    }


def make_csp(kg, cin, cout, n):
    return {
        "conv1": make_conv(kg, cin, cout // 2, 1),
        "conv2": make_conv(kg, cin, cout // 2, 1),
        "conv3": make_conv(kg, (2 + n) * cout // 2, cout, 1),
        "res": [
            (make_conv(kg, cout // 2, cout // 2, 3), make_conv(kg, cout // 2, cout // 2, 3))
            for _ in range(n)
        ],
    }


def make_darkfpn(kg, width, depth):
    return {
        "h1": make_csp(kg, width[4] + width[5], width[4], depth[0]),
        "h2": make_csp(kg, width[3] + width[4], width[3], depth[0]),
        "h3": make_conv(kg, width[3], width[3], 3),
        "h4": make_csp(kg, width[3] + width[4], width[4], depth[0]),
        "h5": make_conv(kg, width[4], width[4], 3),
        "h6": make_csp(kg, width[4] + width[5], width[5], depth[0]),
    }


# ----------------------------------------------------------------------------
if __name__ == "__main__":
    key = jax.random.PRNGKey(0)
    k_param, k3, k4, k5 = jax.random.split(key, 4)

    width = [3, 8, 16, 16, 32, 64]  # only width[3], width[4], width[5] are used
    depth = [1]
    N, H = 2, 16

    params = make_darkfpn(KeyGen(k_param), width, depth)

    # Inputs in NCHW (torch convention), small multi-scale pyramid.
    p3_nchw = jax.random.normal(k3, (N, width[3], H, H), jnp.float32)
    p4_nchw = jax.random.normal(k4, (N, width[4], H // 2, H // 2), jnp.float32)
    p5_nchw = jax.random.normal(k5, (N, width[5], H // 4, H // 4), jnp.float32)

    to_nhwc = lambda t: jnp.transpose(t, (0, 2, 3, 1))
    to_nchw = lambda t: jnp.transpose(t, (0, 3, 1, 2))

    @jax.jit
    def run(a, b, c):
        h2, h4, h6 = darkfpn_fwd(
            params,
            to_nhwc(a).astype(jnp.bfloat16),
            to_nhwc(b).astype(jnp.bfloat16),
            to_nhwc(c).astype(jnp.bfloat16),
        )
        f32 = lambda t: to_nchw(t).astype(jnp.float32)
        return f32(h2), f32(h4), f32(h6)

    h2, h4, h6 = run(p3_nchw, p4_nchw, p5_nchw)
    jax.block_until_ready((h2, h4, h6))

    assert h2.shape == (N, width[3], H, H)
    assert h4.shape == (N, width[4], H // 2, H // 2)
    assert h6.shape == (N, width[5], H // 4, H // 4)
    assert bool(jnp.all(jnp.isfinite(h2)) & jnp.all(jnp.isfinite(h4)) & jnp.all(jnp.isfinite(h6)))
    print("KERNEL_OK")
</pallas_src>

<mosaic_0001>
module attributes {stable_mosaic.version = 11 : i64} {
  func.func @_bn_silu_kernel(%arg0: i32, %arg1: memref<128x128xbf16, #tpu.memory_space<vmem>>, %arg2: memref<1x128xf32, #tpu.memory_space<vmem>>, %arg3: memref<1x128xf32, #tpu.memory_space<vmem>>, %arg4: memref<128x128xbf16, #tpu.memory_space<vmem>>) attributes {dimension_semantics = [#tpu.dimension_semantics<parallel>], iteration_bounds = array<i64: 1>, scalar_prefetch = 0 : i64, scratch_operands = 0 : i64, tpu.core_type = #tpu.core_type<tc>, window_params = [{transform_indices = @transform_0, window_bounds = array<i64: 128, 128>}, {pipeline_mode = #tpu.pipeline_mode<synchronous>, transform_indices = @transform_1, window_bounds = array<i64: 1, 128>}, {pipeline_mode = #tpu.pipeline_mode<synchronous>, transform_indices = @transform_2, window_bounds = array<i64: 1, 128>}, {transform_indices = @transform_3, window_bounds = array<i64: 128, 128>}]} {
    %c0 = arith.constant 0 : index
    %c0_0 = arith.constant 0 : index
    %0 = vector.load %arg1[%c0, %c0_0] : memref<128x128xbf16, #tpu.memory_space<vmem>>, vector<128x128xbf16>
    %1 = arith.extf %0 : vector<128x128xbf16> to vector<128x128xf32>
    %c0_1 = arith.constant 0 : index
    %c0_2 = arith.constant 0 : index
    %2 = vector.load %arg2[%c0_1, %c0_2] : memref<1x128xf32, #tpu.memory_space<vmem>>, vector<1x128xf32>
    %3 = vector.broadcast %2 : vector<1x128xf32> to vector<128x128xf32>
    %4 = arith.mulf %1, %3 : vector<128x128xf32>
    %c0_3 = arith.constant 0 : index
    %c0_4 = arith.constant 0 : index
    %5 = vector.load %arg3[%c0_3, %c0_4] : memref<1x128xf32, #tpu.memory_space<vmem>>, vector<1x128xf32>
    %6 = vector.broadcast %5 : vector<1x128xf32> to vector<128x128xf32>
    %7 = arith.addf %4, %6 : vector<128x128xf32>
    %8 = arith.negf %7 : vector<128x128xf32>
    %9 = math.exp %8 : vector<128x128xf32>
    %cst = arith.constant 1.000000e+00 : f32
    %10 = vector.broadcast %cst : f32 to vector<128x128xf32>
    %11 = arith.addf %10, %9 : vector<128x128xf32>
    %12 = arith.divf %10, %11 : vector<128x128xf32>
    %13 = arith.mulf %7, %12 : vector<128x128xf32>
    %14 = arith.truncf %13 : vector<128x128xf32> to vector<128x128xbf16>
    %c0_5 = arith.constant 0 : index
    %c0_6 = arith.constant 0 : index
    %15 = vector.load %arg4[%c0_5, %c0_6] : memref<128x128xbf16, #tpu.memory_space<vmem>>, vector<128x128xbf16>
    tpu.vector_store %arg4[%c0_5, %c0_6], %14 {strides = array<i32>} : memref<128x128xbf16, #tpu.memory_space<vmem>>, vector<128x128xbf16>,
    return
  }
  func.func @transform_0(%arg0: i32) -> (i32, i32) {
    %c0_i32 = arith.constant 0 : i32
    %c0_i32_0 = arith.constant 0 : i32
    return %arg0, %c0_i32 : i32, i32
  }
  func.func @transform_1(%arg0: i32) -> (i32, i32) {
    %c0_i32 = arith.constant 0 : i32
    %c0_i32_0 = arith.constant 0 : i32
    %c0_i32_1 = arith.constant 0 : i32
    return %c0_i32, %c0_i32_0 : i32, i32
  }
  func.func @transform_2(%arg0: i32) -> (i32, i32) {
    %c0_i32 = arith.constant 0 : i32
    %c0_i32_0 = arith.constant 0 : i32
    %c0_i32_1 = arith.constant 0 : i32
    return %c0_i32, %c0_i32_0 : i32, i32
  }
  func.func @transform_3(%arg0: i32) -> (i32, i32) {
    %c0_i32 = arith.constant 0 : i32
    %c0_i32_0 = arith.constant 0 : i32
    return %arg0, %c0_i32 : i32, i32
  }
}

module attributes {stable_mosaic.version = 11 : i64} {
  func.func @_matmul_stats_kernel(%arg0: i32, %arg1: i32, %arg2: memref<128x96xbf16, #tpu.memory_space<vmem>>, %arg3: memref<96x128xbf16, #tpu.memory_space<vmem>>, %arg4: memref<128x128xbf16, #tpu.memory_space<vmem>>, %arg5: memref<8x128xf32, #tpu.memory_space<vmem>>) attributes {dimension_semantics = [#tpu.dimension_semantics<parallel>, #tpu.dimension_semantics<arbitrary>], iteration_bounds = array<i64: 1, 1>, scalar_prefetch = 0 : i64, scratch_operands = 0 : i64, tpu.core_type = #tpu.core_type<tc>, window_params = [{transform_indices = @transform_0, window_bounds = array<i64: 128, 96>}, {pipeline_mode = #tpu.pipeline_mode<synchronous>, transform_indices = @transform_1, window_bounds = array<i64: 96, 128>}, {transform_indices = @transform_2, window_bounds = array<i64: 128, 128>}, {transform_indices = @transform_3, window_bounds = array<i64: 8, 128>}]} {
    %c0_i32 = arith.constant 0 : i32
    %0 = arith.cmpi eq, %arg1, %c0_i32 : i32
    %1 = arith.extui %0 : i1 to i32
    %c0_i32_0 = arith.constant 0 : i32
    %2 = arith.cmpi ne, %1, %c0_i32_0 : i32
    scf.if %2 {
      %cst_15 = arith.constant 0.000000e+00 : f32
      %19 = vector.broadcast %cst_15 : f32 to vector<8x128xf32>
      %c0_16 = arith.constant 0 : index
      %c0_17 = arith.constant 0 : index
      %20 = vector.load %arg5[%c0_16, %c0_17] : memref<8x128xf32, #tpu.memory_space<vmem>>, vector<8x128xf32>
      tpu.vector_store %arg5[%c0_16, %c0_17], %19 {strides = array<i32>} : memref<8x128xf32, #tpu.memory_space<vmem>>, vector<8x128xf32>,
    } else {
    }
    %c0 = arith.constant 0 : index
    %c0_1 = arith.constant 0 : index
    %3 = vector.load %arg2[%c0, %c0_1] : memref<128x96xbf16, #tpu.memory_space<vmem>>, vector<128x96xbf16>
    %c0_2 = arith.constant 0 : index
    %c0_3 = arith.constant 0 : index
    %4 = vector.load %arg3[%c0_2, %c0_3] : memref<96x128xbf16, #tpu.memory_space<vmem>>, vector<96x128xbf16>
    %cst = arith.constant dense<0.000000e+00> : vector<128x128xf32>
    %5 = tpu.matmul %3, %4, %cst {dimension_numbers = #tpu.dot_dimension_numbers<[1], [0], [0], [1], [0, 0, 1, 1], [], []>} : vector<128x96xbf16>, vector<96x128xbf16>, vector<128x128xf32> -> vector<128x128xf32>
    %6 = arith.truncf %5 : vector<128x128xf32> to vector<128x128xbf16>
    %c0_4 = arith.constant 0 : index
    %c0_5 = arith.constant 0 : index
    %7 = vector.load %arg4[%c0_4, %c0_5] : memref<128x128xbf16, #tpu.memory_space<vmem>>, vector<128x128xbf16>
    tpu.vector_store %arg4[%c0_4, %c0_5], %6 {strides = array<i32>} : memref<128x128xbf16, #tpu.memory_space<vmem>>, vector<128x128xbf16>,
    %c0_6 = arith.constant 0 : index
    %c0_7 = arith.constant 0 : index
    %8 = vector.load %arg5[%c0_6, %c0_7] : memref<8x128xf32, #tpu.memory_space<vmem>>, vector<1x128xf32>
    %cst_8 = arith.constant dense<0.000000e+00> : vector<128xf32>
    %9 = vector.multi_reduction <add>, %5, %cst_8 [0] : vector<128x128xf32> to vector<128xf32>
    %10 = vector.shape_cast %9 : vector<128xf32> to vector<1x128xf32>
    %11 = arith.addf %8, %10 : vector<1x128xf32>
    %c0_9 = arith.constant 0 : index
    %c0_10 = arith.constant 0 : index
    %12 = vector.load %arg5[%c0_9, %c0_10] : memref<8x128xf32, #tpu.memory_space<vmem>>, vector<1x128xf32>
    tpu.vector_store %arg5[%c0_9, %c0_10], %11 {strides = array<i32>} : memref<8x128xf32, #tpu.memory_space<vmem>>, vector<1x128xf32>,
    %c1 = arith.constant 1 : index
    %c0_11 = arith.constant 0 : index
    %13 = vector.load %arg5[%c1, %c0_11] : memref<8x128xf32, #tpu.memory_space<vmem>>, vector<1x128xf32>
    %14 = arith.mulf %5, %5 : vector<128x128xf32>
    %cst_12 = arith.constant dense<0.000000e+00> : vector<128xf32>
    %15 = vector.multi_reduction <add>, %14, %cst_12 [0] : vector<128x128xf32> to vector<128xf32>
    %16 = vector.shape_cast %15 : vector<128xf32> to vector<1x128xf32>
    %17 = arith.addf %13, %16 : vector<1x128xf32>
    %c1_13 = arith.constant 1 : index
    %c0_14 = arith.constant 0 : index
    %18 = vector.load %arg5[%c1_13, %c0_14] : memref<8x128xf32, #tpu.memory_space<vmem>>, vector<1x128xf32>
    tpu.vector_store %arg5[%c1_13, %c0_14], %17 {strides = array<i32>} : memref<8x128xf32, #tpu.memory_space<vmem>>, vector<1x128xf32>,
    return
  }
  func.func @transform_0(%arg0: i32, %arg1: i32) -> (i32, i32) {
    %c1_i32 = arith.constant 1 : i32
    %0 = arith.muli %arg0, %c1_i32 : i32
    %1 = arith.addi %0, %arg1 : i32
    %c0_i32 = arith.constant 0 : i32
    %c0_i32_0 = arith.constant 0 : i32
    return %1, %c0_i32 : i32, i32
  }
  func.func @transform_1(%arg0: i32, %arg1: i32) -> (i32, i32) {
    %c0_i32 = arith.constant 0 : i32
    %c0_i32_0 = arith.constant 0 : i32
    %c0_i32_1 = arith.constant 0 : i32
    return %c0_i32, %c0_i32_0 : i32, i32
  }
  func.func @transform_2(%arg0: i32, %arg1: i32) -> (i32, i32) {
    %c1_i32 = arith.constant 1 : i32
    %0 = arith.muli %arg0, %c1_i32 : i32
    %1 = arith.addi %0, %arg1 : i32
    %c0_i32 = arith.constant 0 : i32
    %c0_i32_0 = arith.constant 0 : i32
    return %1, %c0_i32 : i32, i32
  }
  func.func @transform_3(%arg0: i32, %arg1: i32) -> (i32, i32) {
    %c0_i32 = arith.constant 0 : i32
    %c0_i32_0 = arith.constant 0 : i32
    return %arg0, %c0_i32 : i32, i32
  }
}

module attributes {stable_mosaic.version = 11 : i64} {
  func.func @_matmul_stats_kernel(%arg0: i32, %arg1: i32, %arg2: memref<128x144xbf16, #tpu.memory_space<vmem>>, %arg3: memref<144x128xbf16, #tpu.memory_space<vmem>>, %arg4: memref<128x128xbf16, #tpu.memory_space<vmem>>, %arg5: memref<8x128xf32, #tpu.memory_space<vmem>>) attributes {dimension_semantics = [#tpu.dimension_semantics<parallel>, #tpu.dimension_semantics<arbitrary>], iteration_bounds = array<i64: 1, 1>, scalar_prefetch = 0 : i64, scratch_operands = 0 : i64, tpu.core_type = #tpu.core_type<tc>, window_params = [{transform_indices = @transform_0, window_bounds = array<i64: 128, 144>}, {pipeline_mode = #tpu.pipeline_mode<synchronous>, transform_indices = @transform_1, window_bounds = array<i64: 144, 128>}, {transform_indices = @transform_2, window_bounds = array<i64: 128, 128>}, {transform_indices = @transform_3, window_bounds = array<i64: 8, 128>}]} {
    %c0_i32 = arith.constant 0 : i32
    %0 = arith.cmpi eq, %arg1, %c0_i32 : i32
    %1 = arith.extui %0 : i1 to i32
    %c0_i32_0 = arith.constant 0 : i32
    %2 = arith.cmpi ne, %1, %c0_i32_0 : i32
    scf.if %2 {
      %cst_15 = arith.constant 0.000000e+00 : f32
      %19 = vector.broadcast %cst_15 : f32 to vector<8x128xf32>
      %c0_16 = arith.constant 0 : index
      %c0_17 = arith.constant 0 : index
      %20 = vector.load %arg5[%c0_16, %c0_17] : memref<8x128xf32, #tpu.memory_space<vmem>>, vector<8x128xf32>
      tpu.vector_store %arg5[%c0_16, %c0_17], %19 {strides = array<i32>} : memref<8x128xf32, #tpu.memory_space<vmem>>, vector<8x128xf32>,
    } else {
    }
    %c0 = arith.constant 0 : index
    %c0_1 = arith.constant 0 : index
    %3 = vector.load %arg2[%c0, %c0_1] : memref<128x144xbf16, #tpu.memory_space<vmem>>, vector<128x144xbf16>
    %c0_2 = arith.constant 0 : index
    %c0_3 = arith.constant 0 : index
    %4 = vector.load %arg3[%c0_2, %c0_3] : memref<144x128xbf16, #tpu.memory_space<vmem>>, vector<144x128xbf16>
    %cst = arith.constant dense<0.000000e+00> : vector<128x128xf32>
    %5 = tpu.matmul %3, %4, %cst {dimension_numbers = #tpu.dot_dimension_numbers<[1], [0], [0], [1], [0, 0, 1, 1], [], []>} : vector<128x144xbf16>, vector<144x128xbf16>, vector<128x128xf32> -> vector<128x128xf32>
    %6 = arith.truncf %5 : vector<128x128xf32> to vector<128x128xbf16>
    %c0_4 = arith.constant 0 : index
    %c0_5 = arith.constant 0 : index
    %7 = vector.load %arg4[%c0_4, %c0_5] : memref<128x128xbf16, #tpu.memory_space<vmem>>, vector<128x128xbf16>
    tpu.vector_store %arg4[%c0_4, %c0_5], %6 {strides = array<i32>} : memref<128x128xbf16, #tpu.memory_space<vmem>>, vector<128x128xbf16>,
    %c0_6 = arith.constant 0 : index
    %c0_7 = arith.constant 0 : index
    %8 = vector.load %arg5[%c0_6, %c0_7] : memref<8x128xf32, #tpu.memory_space<vmem>>, vector<1x128xf32>
    %cst_8 = arith.constant dense<0.000000e+00> : vector<128xf32>
    %9 = vector.multi_reduction <add>, %5, %cst_8 [0] : vector<128x128xf32> to vector<128xf32>
    %10 = vector.shape_cast %9 : vector<128xf32> to vector<1x128xf32>
    %11 = arith.addf %8, %10 : vector<1x128xf32>
    %c0_9 = arith.constant 0 : index
    %c0_10 = arith.constant 0 : index
    %12 = vector.load %arg5[%c0_9, %c0_10] : memref<8x128xf32, #tpu.memory_space<vmem>>, vector<1x128xf32>
    tpu.vector_store %arg5[%c0_9, %c0_10], %11 {strides = array<i32>} : memref<8x128xf32, #tpu.memory_space<vmem>>, vector<1x128xf32>,
    %c1 = arith.constant 1 : index
    %c0_11 = arith.constant 0 : index
    %13 = vector.load %arg5[%c1, %c0_11] : memref<8x128xf32, #tpu.memory_space<vmem>>, vector<1x128xf32>
    %14 = arith.mulf %5, %5 : vector<128x128xf32>
    %cst_12 = arith.constant dense<0.000000e+00> : vector<128xf32>
    %15 = vector.multi_reduction <add>, %14, %cst_12 [0] : vector<128x128xf32> to vector<128xf32>
    %16 = vector.shape_cast %15 : vector<128xf32> to vector<1x128xf32>
    %17 = arith.addf %13, %16 : vector<1x128xf32>
    %c1_13 = arith.constant 1 : index
    %c0_14 = arith.constant 0 : index
    %18 = vector.load %arg5[%c1_13, %c0_14] : memref<8x128xf32, #tpu.memory_space<vmem>>, vector<1x128xf32>
    tpu.vector_store %arg5[%c1_13, %c0_14], %17 {strides = array<i32>} : memref<8x128xf32, #tpu.memory_space<vmem>>, vector<1x128xf32>,
    return
  }
  func.func @transform_0(%arg0: i32, %arg1: i32) -> (i32, i32) {
    %c1_i32 = arith.constant 1 : i32
    %0 = arith.muli %arg0, %c1_i32 : i32
    %1 = arith.addi %0, %arg1 : i32
    %c0_i32 = arith.constant 0 : i32
    %c0_i32_0 = arith.constant 0 : i32
    return %1, %c0_i32 : i32, i32
  }
  func.func @transform_1(%arg0: i32, %arg1: i32) -> (i32, i32) {
    %c0_i32 = arith.constant 0 : i32
    %c0_i32_0 = arith.constant 0 : i32
    %c0_i32_1 = arith.constant 0 : i32
    return %c0_i32, %c0_i32_0 : i32, i32
  }
  func.func @transform_2(%arg0: i32, %arg1: i32) -> (i32, i32) {
    %c1_i32 = arith.constant 1 : i32
    %0 = arith.muli %arg0, %c1_i32 : i32
    %1 = arith.addi %0, %arg1 : i32
    %c0_i32 = arith.constant 0 : i32
    %c0_i32_0 = arith.constant 0 : i32
    return %1, %c0_i32 : i32, i32
  }
  func.func @transform_3(%arg0: i32, %arg1: i32) -> (i32, i32) {
    %c0_i32 = arith.constant 0 : i32
    %c0_i32_0 = arith.constant 0 : i32
    return %arg0, %c0_i32 : i32, i32
  }
}

module attributes {stable_mosaic.version = 11 : i64} {
  func.func @_matmul_stats_kernel(%arg0: i32, %arg1: i32, %arg2: memref<128x48xbf16, #tpu.memory_space<vmem>>, %arg3: memref<48x128xbf16, #tpu.memory_space<vmem>>, %arg4: memref<128x128xbf16, #tpu.memory_space<vmem>>, %arg5: memref<8x128xf32, #tpu.memory_space<vmem>>) attributes {dimension_semantics = [#tpu.dimension_semantics<parallel>, #tpu.dimension_semantics<arbitrary>], iteration_bounds = array<i64: 1, 1>, scalar_prefetch = 0 : i64, scratch_operands = 0 : i64, tpu.core_type = #tpu.core_type<tc>, window_params = [{transform_indices = @transform_0, window_bounds = array<i64: 128, 48>}, {pipeline_mode = #tpu.pipeline_mode<synchronous>, transform_indices = @transform_1, window_bounds = array<i64: 48, 128>}, {transform_indices = @transform_2, window_bounds = array<i64: 128, 128>}, {transform_indices = @transform_3, window_bounds = array<i64: 8, 128>}]} {
    %c0_i32 = arith.constant 0 : i32
    %0 = arith.cmpi eq, %arg1, %c0_i32 : i32
    %1 = arith.extui %0 : i1 to i32
    %c0_i32_0 = arith.constant 0 : i32
    %2 = arith.cmpi ne, %1, %c0_i32_0 : i32
    scf.if %2 {
      %cst_15 = arith.constant 0.000000e+00 : f32
      %19 = vector.broadcast %cst_15 : f32 to vector<8x128xf32>
      %c0_16 = arith.constant 0 : index
      %c0_17 = arith.constant 0 : index
      %20 = vector.load %arg5[%c0_16, %c0_17] : memref<8x128xf32, #tpu.memory_space<vmem>>, vector<8x128xf32>
      tpu.vector_store %arg5[%c0_16, %c0_17], %19 {strides = array<i32>} : memref<8x128xf32, #tpu.memory_space<vmem>>, vector<8x128xf32>,
    } else {
    }
    %c0 = arith.constant 0 : index
    %c0_1 = arith.constant 0 : index
    %3 = vector.load %arg2[%c0, %c0_1] : memref<128x48xbf16, #tpu.memory_space<vmem>>, vector<128x48xbf16>
    %c0_2 = arith.constant 0 : index
    %c0_3 = arith.constant 0 : index
    %4 = vector.load %arg3[%c0_2, %c0_3] : memref<48x128xbf16, #tpu.memory_space<vmem>>, vector<48x128xbf16>
    %cst = arith.constant dense<0.000000e+00> : vector<128x128xf32>
    %5 = tpu.matmul %3, %4, %cst {dimension_numbers = #tpu.dot_dimension_numbers<[1], [0], [0], [1], [0, 0, 1, 1], [], []>} : vector<128x48xbf16>, vector<48x128xbf16>, vector<128x128xf32> -> vector<128x128xf32>
    %6 = arith.truncf %5 : vector<128x128xf32> to vector<128x128xbf16>
    %c0_4 = arith.constant 0 : index
    %c0_5 = arith.constant 0 : index
    %7 = vector.load %arg4[%c0_4, %c0_5] : memref<128x128xbf16, #tpu.memory_space<vmem>>, vector<128x128xbf16>
    tpu.vector_store %arg4[%c0_4, %c0_5], %6 {strides = array<i32>} : memref<128x128xbf16, #tpu.memory_space<vmem>>, vector<128x128xbf16>,
    %c0_6 = arith.constant 0 : index
    %c0_7 = arith.constant 0 : index
    %8 = vector.load %arg5[%c0_6, %c0_7] : memref<8x128xf32, #tpu.memory_space<vmem>>, vector<1x128xf32>
    %cst_8 = arith.constant dense<0.000000e+00> : vector<128xf32>
    %9 = vector.multi_reduction <add>, %5, %cst_8 [0] : vector<128x128xf32> to vector<128xf32>
    %10 = vector.shape_cast %9 : vector<128xf32> to vector<1x128xf32>
    %11 = arith.addf %8, %10 : vector<1x128xf32>
    %c0_9 = arith.constant 0 : index
    %c0_10 = arith.constant 0 : index
    %12 = vector.load %arg5[%c0_9, %c0_10] : memref<8x128xf32, #tpu.memory_space<vmem>>, vector<1x128xf32>
    tpu.vector_store %arg5[%c0_9, %c0_10], %11 {strides = array<i32>} : memref<8x128xf32, #tpu.memory_space<vmem>>, vector<1x128xf32>,
    %c1 = arith.constant 1 : index
    %c0_11 = arith.constant 0 : index
    %13 = vector.load %arg5[%c1, %c0_11] : memref<8x128xf32, #tpu.memory_space<vmem>>, vector<1x128xf32>
    %14 = arith.mulf %5, %5 : vector<128x128xf32>
    %cst_12 = arith.constant dense<0.000000e+00> : vector<128xf32>
    %15 = vector.multi_reduction <add>, %14, %cst_12 [0] : vector<128x128xf32> to vector<128xf32>
    %16 = vector.shape_cast %15 : vector<128xf32> to vector<1x128xf32>
    %17 = arith.addf %13, %16 : vector<1x128xf32>
    %c1_13 = arith.constant 1 : index
    %c0_14 = arith.constant 0 : index
    %18 = vector.load %arg5[%c1_13, %c0_14] : memref<8x128xf32, #tpu.memory_space<vmem>>, vector<1x128xf32>
    tpu.vector_store %arg5[%c1_13, %c0_14], %17 {strides = array<i32>} : memref<8x128xf32, #tpu.memory_space<vmem>>, vector<1x128xf32>,
    return
  }
  func.func @transform_0(%arg0: i32, %arg1: i32) -> (i32, i32) {
    %c1_i32 = arith.constant 1 : i32
    %0 = arith.muli %arg0, %c1_i32 : i32
    %1 = arith.addi %0, %arg1 : i32
    %c0_i32 = arith.constant 0 : i32
    %c0_i32_0 = arith.constant 0 : i32
    return %1, %c0_i32 : i32, i32
  }
  func.func @transform_1(%arg0: i32, %arg1: i32) -> (i32, i32) {
    %c0_i32 = arith.constant 0 : i32
    %c0_i32_0 = arith.constant 0 : i32
    %c0_i32_1 = arith.constant 0 : i32
    return %c0_i32, %c0_i32_0 : i32, i32
  }
  func.func @transform_2(%arg0: i32, %arg1: i32) -> (i32, i32) {
    %c1_i32 = arith.constant 1 : i32
    %0 = arith.muli %arg0, %c1_i32 : i32
    %1 = arith.addi %0, %arg1 : i32
    %c0_i32 = arith.constant 0 : i32
    %c0_i32_0 = arith.constant 0 : i32
    return %1, %c0_i32 : i32, i32
  }
  func.func @transform_3(%arg0: i32, %arg1: i32) -> (i32, i32) {
    %c0_i32 = arith.constant 0 : i32
    %c0_i32_0 = arith.constant 0 : i32
    return %arg0, %c0_i32 : i32, i32
  }
}

module attributes {stable_mosaic.version = 11 : i64} {
  func.func @_matmul_stats_kernel(%arg0: i32, %arg1: i32, %arg2: memref<512x48xbf16, #tpu.memory_space<vmem>>, %arg3: memref<48x128xbf16, #tpu.memory_space<vmem>>, %arg4: memref<512x128xbf16, #tpu.memory_space<vmem>>, %arg5: memref<8x128xf32, #tpu.memory_space<vmem>>) attributes {dimension_semantics = [#tpu.dimension_semantics<parallel>, #tpu.dimension_semantics<arbitrary>], iteration_bounds = array<i64: 1, 1>, scalar_prefetch = 0 : i64, scratch_operands = 0 : i64, tpu.core_type = #tpu.core_type<tc>, window_params = [{transform_indices = @transform_0, window_bounds = array<i64: 512, 48>}, {pipeline_mode = #tpu.pipeline_mode<synchronous>, transform_indices = @transform_1, window_bounds = array<i64: 48, 128>}, {transform_indices = @transform_2, window_bounds = array<i64: 512, 128>}, {transform_indices = @transform_3, window_bounds = array<i64: 8, 128>}]} {
    %c0_i32 = arith.constant 0 : i32
    %0 = arith.cmpi eq, %arg1, %c0_i32 : i32
    %1 = arith.extui %0 : i1 to i32
    %c0_i32_0 = arith.constant 0 : i32
    %2 = arith.cmpi ne, %1, %c0_i32_0 : i32
    scf.if %2 {
      %cst_15 = arith.constant 0.000000e+00 : f32
      %19 = vector.broadcast %cst_15 : f32 to vector<8x128xf32>
      %c0_16 = arith.constant 0 : index
      %c0_17 = arith.constant 0 : index
      %20 = vector.load %arg5[%c0_16, %c0_17] : memref<8x128xf32, #tpu.memory_space<vmem>>, vector<8x128xf32>
      tpu.vector_store %arg5[%c0_16, %c0_17], %19 {strides = array<i32>} : memref<8x128xf32, #tpu.memory_space<vmem>>, vector<8x128xf32>,
    } else {
    }
    %c0 = arith.constant 0 : index
    %c0_1 = arith.constant 0 : index
    %3 = vector.load %arg2[%c0, %c0_1] : memref<512x48xbf16, #tpu.memory_space<vmem>>, vector<512x48xbf16>
    %c0_2 = arith.constant 0 : index
    %c0_3 = arith.constant 0 : index
    %4 = vector.load %arg3[%c0_2, %c0_3] : memref<48x128xbf16, #tpu.memory_space<vmem>>, vector<48x128xbf16>
    %cst = arith.constant dense<0.000000e+00> : vector<512x128xf32>
    %5 = tpu.matmul %3, %4, %cst {dimension_numbers = #tpu.dot_dimension_numbers<[1], [0], [0], [1], [0, 0, 1, 1], [], []>} : vector<512x48xbf16>, vector<48x128xbf16>, vector<512x128xf32> -> vector<512x128xf32>
    %6 = arith.truncf %5 : vector<512x128xf32> to vector<512x128xbf16>
    %c0_4 = arith.constant 0 : index
    %c0_5 = arith.constant 0 : index
    %7 = vector.load %arg4[%c0_4, %c0_5] : memref<512x128xbf16, #tpu.memory_space<vmem>>, vector<512x128xbf16>
    tpu.vector_store %arg4[%c0_4, %c0_5], %6 {strides = array<i32>} : memref<512x128xbf16, #tpu.memory_space<vmem>>, vector<512x128xbf16>,
    %c0_6 = arith.constant 0 : index
    %c0_7 = arith.constant 0 : index
    %8 = vector.load %arg5[%c0_6, %c0_7] : memref<8x128xf32, #tpu.memory_space<vmem>>, vector<1x128xf32>
    %cst_8 = arith.constant dense<0.000000e+00> : vector<128xf32>
    %9 = vector.multi_reduction <add>, %5, %cst_8 [0] : vector<512x128xf32> to vector<128xf32>
    %10 = vector.shape_cast %9 : vector<128xf32> to vector<1x128xf32>
    %11 = arith.addf %8, %10 : vector<1x128xf32>
    %c0_9 = arith.constant 0 : index
    %c0_10 = arith.constant 0 : index
    %12 = vector.load %arg5[%c0_9, %c0_10] : memref<8x128xf32, #tpu.memory_space<vmem>>, vector<1x128xf32>
    tpu.vector_store %arg5[%c0_9, %c0_10], %11 {strides = array<i32>} : memref<8x128xf32, #tpu.memory_space<vmem>>, vector<1x128xf32>,
    %c1 = arith.constant 1 : index
    %c0_11 = arith.constant 0 : index
    %13 = vector.load %arg5[%c1, %c0_11] : memref<8x128xf32, #tpu.memory_space<vmem>>, vector<1x128xf32>
    %14 = arith.mulf %5, %5 : vector<512x128xf32>
    %cst_12 = arith.constant dense<0.000000e+00> : vector<128xf32>
    %15 = vector.multi_reduction <add>, %14, %cst_12 [0] : vector<512x128xf32> to vector<128xf32>
    %16 = vector.shape_cast %15 : vector<128xf32> to vector<1x128xf32>
    %17 = arith.addf %13, %16 : vector<1x128xf32>
    %c1_13 = arith.constant 1 : index
    %c0_14 = arith.constant 0 : index
    %18 = vector.load %arg5[%c1_13, %c0_14] : memref<8x128xf32, #tpu.memory_space<vmem>>, vector<1x128xf32>
    tpu.vector_store %arg5[%c1_13, %c0_14], %17 {strides = array<i32>} : memref<8x128xf32, #tpu.memory_space<vmem>>, vector<1x128xf32>,
    return
  }
  func.func @transform_0(%arg0: i32, %arg1: i32) -> (i32, i32) {
    %c1_i32 = arith.constant 1 : i32
    %0 = arith.muli %arg0, %c1_i32 : i32
    %1 = arith.addi %0, %arg1 : i32
    %c0_i32 = arith.constant 0 : i32
    %c0_i32_0 = arith.constant 0 : i32
    return %1, %c0_i32 : i32, i32
  }
  func.func @transform_1(%arg0: i32, %arg1: i32) -> (i32, i32) {
    %c0_i32 = arith.constant 0 : i32
    %c0_i32_0 = arith.constant 0 : i32
    %c0_i32_1 = arith.constant 0 : i32
    return %c0_i32, %c0_i32_0 : i32, i32
  }
  func.func @transform_2(%arg0: i32, %arg1: i32) -> (i32, i32) {
    %c1_i32 = arith.constant 1 : i32
    %0 = arith.muli %arg0, %c1_i32 : i32
    %1 = arith.addi %0, %arg1 : i32
    %c0_i32 = arith.constant 0 : i32
    %c0_i32_0 = arith.constant 0 : i32
    return %1, %c0_i32 : i32, i32
  }
  func.func @transform_3(%arg0: i32, %arg1: i32) -> (i32, i32) {
    %c0_i32 = arith.constant 0 : i32
    %c0_i32_0 = arith.constant 0 : i32
    return %arg0, %c0_i32 : i32, i32
  }
}

module attributes {stable_mosaic.version = 11 : i64} {
  func.func @_bn_silu_kernel(%arg0: i32, %arg1: memref<512x128xbf16, #tpu.memory_space<vmem>>, %arg2: memref<1x128xf32, #tpu.memory_space<vmem>>, %arg3: memref<1x128xf32, #tpu.memory_space<vmem>>, %arg4: memref<512x128xbf16, #tpu.memory_space<vmem>>) attributes {dimension_semantics = [#tpu.dimension_semantics<parallel>], iteration_bounds = array<i64: 1>, scalar_prefetch = 0 : i64, scratch_operands = 0 : i64, tpu.core_type = #tpu.core_type<tc>, window_params = [{transform_indices = @transform_0, window_bounds = array<i64: 512, 128>}, {pipeline_mode = #tpu.pipeline_mode<synchronous>, transform_indices = @transform_1, window_bounds = array<i64: 1, 128>}, {pipeline_mode = #tpu.pipeline_mode<synchronous>, transform_indices = @transform_2, window_bounds = array<i64: 1, 128>}, {transform_indices = @transform_3, window_bounds = array<i64: 512, 128>}]} {
    %c0 = arith.constant 0 : index
    %c0_0 = arith.constant 0 : index
    %0 = vector.load %arg1[%c0, %c0_0] : memref<512x128xbf16, #tpu.memory_space<vmem>>, vector<512x128xbf16>
    %1 = arith.extf %0 : vector<512x128xbf16> to vector<512x128xf32>
    %c0_1 = arith.constant 0 : index
    %c0_2 = arith.constant 0 : index
    %2 = vector.load %arg2[%c0_1, %c0_2] : memref<1x128xf32, #tpu.memory_space<vmem>>, vector<1x128xf32>
    %3 = vector.broadcast %2 : vector<1x128xf32> to vector<512x128xf32>
    %4 = arith.mulf %1, %3 : vector<512x128xf32>
    %c0_3 = arith.constant 0 : index
    %c0_4 = arith.constant 0 : index
    %5 = vector.load %arg3[%c0_3, %c0_4] : memref<1x128xf32, #tpu.memory_space<vmem>>, vector<1x128xf32>
    %6 = vector.broadcast %5 : vector<1x128xf32> to vector<512x128xf32>
    %7 = arith.addf %4, %6 : vector<512x128xf32>
    %8 = arith.negf %7 : vector<512x128xf32>
    %9 = math.exp %8 : vector<512x128xf32>
    %cst = arith.constant 1.000000e+00 : f32
    %10 = vector.broadcast %cst : f32 to vector<512x128xf32>
    %11 = arith.addf %10, %9 : vector<512x128xf32>
    %12 = arith.divf %10, %11 : vector<512x128xf32>
    %13 = arith.mulf %7, %12 : vector<512x128xf32>
    %14 = arith.truncf %13 : vector<512x128xf32> to vector<512x128xbf16>
    %c0_5 = arith.constant 0 : index
    %c0_6 = arith.constant 0 : index
    %15 = vector.load %arg4[%c0_5, %c0_6] : memref<512x128xbf16, #tpu.memory_space<vmem>>, vector<512x128xbf16>
    tpu.vector_store %arg4[%c0_5, %c0_6], %14 {strides = array<i32>} : memref<512x128xbf16, #tpu.memory_space<vmem>>, vector<512x128xbf16>,
    return
  }
  func.func @transform_0(%arg0: i32) -> (i32, i32) {
    %c0_i32 = arith.constant 0 : i32
    %c0_i32_0 = arith.constant 0 : i32
    return %arg0, %c0_i32 : i32, i32
  }
  func.func @transform_1(%arg0: i32) -> (i32, i32) {
    %c0_i32 = arith.constant 0 : i32
    %c0_i32_0 = arith.constant 0 : i32
    %c0_i32_1 = arith.constant 0 : i32
    return %c0_i32, %c0_i32_0 : i32, i32
  }
  func.func @transform_2(%arg0: i32) -> (i32, i32) {
    %c0_i32 = arith.constant 0 : i32
    %c0_i32_0 = arith.constant 0 : i32
    %c0_i32_1 = arith.constant 0 : i32
    return %c0_i32, %c0_i32_0 : i32, i32
  }
  func.func @transform_3(%arg0: i32) -> (i32, i32) {
    %c0_i32 = arith.constant 0 : i32
    %c0_i32_0 = arith.constant 0 : i32
    return %arg0, %c0_i32 : i32, i32
  }
}

module attributes {stable_mosaic.version = 11 : i64} {
  func.func @_matmul_stats_kernel(%arg0: i32, %arg1: i32, %arg2: memref<512x72xbf16, #tpu.memory_space<vmem>>, %arg3: memref<72x128xbf16, #tpu.memory_space<vmem>>, %arg4: memref<512x128xbf16, #tpu.memory_space<vmem>>, %arg5: memref<8x128xf32, #tpu.memory_space<vmem>>) attributes {dimension_semantics = [#tpu.dimension_semantics<parallel>, #tpu.dimension_semantics<arbitrary>], iteration_bounds = array<i64: 1, 1>, scalar_prefetch = 0 : i64, scratch_operands = 0 : i64, tpu.core_type = #tpu.core_type<tc>, window_params = [{transform_indices = @transform_0, window_bounds = array<i64: 512, 72>}, {pipeline_mode = #tpu.pipeline_mode<synchronous>, transform_indices = @transform_1, window_bounds = array<i64: 72, 128>}, {transform_indices = @transform_2, window_bounds = array<i64: 512, 128>}, {transform_indices = @transform_3, window_bounds = array<i64: 8, 128>}]} {
    %c0_i32 = arith.constant 0 : i32
    %0 = arith.cmpi eq, %arg1, %c0_i32 : i32
    %1 = arith.extui %0 : i1 to i32
    %c0_i32_0 = arith.constant 0 : i32
    %2 = arith.cmpi ne, %1, %c0_i32_0 : i32
    scf.if %2 {
      %cst_15 = arith.constant 0.000000e+00 : f32
      %19 = vector.broadcast %cst_15 : f32 to vector<8x128xf32>
      %c0_16 = arith.constant 0 : index
      %c0_17 = arith.constant 0 : index
      %20 = vector.load %arg5[%c0_16, %c0_17] : memref<8x128xf32, #tpu.memory_space<vmem>>, vector<8x128xf32>
      tpu.vector_store %arg5[%c0_16, %c0_17], %19 {strides = array<i32>} : memref<8x128xf32, #tpu.memory_space<vmem>>, vector<8x128xf32>,
    } else {
    }
    %c0 = arith.constant 0 : index
    %c0_1 = arith.constant 0 : index
    %3 = vector.load %arg2[%c0, %c0_1] : memref<512x72xbf16, #tpu.memory_space<vmem>>, vector<512x72xbf16>
    %c0_2 = arith.constant 0 : index
    %c0_3 = arith.constant 0 : index
    %4 = vector.load %arg3[%c0_2, %c0_3] : memref<72x128xbf16, #tpu.memory_space<vmem>>, vector<72x128xbf16>
    %cst = arith.constant dense<0.000000e+00> : vector<512x128xf32>
    %5 = tpu.matmul %3, %4, %cst {dimension_numbers = #tpu.dot_dimension_numbers<[1], [0], [0], [1], [0, 0, 1, 1], [], []>} : vector<512x72xbf16>, vector<72x128xbf16>, vector<512x128xf32> -> vector<512x128xf32>
    %6 = arith.truncf %5 : vector<512x128xf32> to vector<512x128xbf16>
    %c0_4 = arith.constant 0 : index
    %c0_5 = arith.constant 0 : index
    %7 = vector.load %arg4[%c0_4, %c0_5] : memref<512x128xbf16, #tpu.memory_space<vmem>>, vector<512x128xbf16>
    tpu.vector_store %arg4[%c0_4, %c0_5], %6 {strides = array<i32>} : memref<512x128xbf16, #tpu.memory_space<vmem>>, vector<512x128xbf16>,
    %c0_6 = arith.constant 0 : index
    %c0_7 = arith.constant 0 : index
    %8 = vector.load %arg5[%c0_6, %c0_7] : memref<8x128xf32, #tpu.memory_space<vmem>>, vector<1x128xf32>
    %cst_8 = arith.constant dense<0.000000e+00> : vector<128xf32>
    %9 = vector.multi_reduction <add>, %5, %cst_8 [0] : vector<512x128xf32> to vector<128xf32>
    %10 = vector.shape_cast %9 : vector<128xf32> to vector<1x128xf32>
    %11 = arith.addf %8, %10 : vector<1x128xf32>
    %c0_9 = arith.constant 0 : index
    %c0_10 = arith.constant 0 : index
    %12 = vector.load %arg5[%c0_9, %c0_10] : memref<8x128xf32, #tpu.memory_space<vmem>>, vector<1x128xf32>
    tpu.vector_store %arg5[%c0_9, %c0_10], %11 {strides = array<i32>} : memref<8x128xf32, #tpu.memory_space<vmem>>, vector<1x128xf32>,
    %c1 = arith.constant 1 : index
    %c0_11 = arith.constant 0 : index
    %13 = vector.load %arg5[%c1, %c0_11] : memref<8x128xf32, #tpu.memory_space<vmem>>, vector<1x128xf32>
    %14 = arith.mulf %5, %5 : vector<512x128xf32>
    %cst_12 = arith.constant dense<0.000000e+00> : vector<128xf32>
    %15 = vector.multi_reduction <add>, %14, %cst_12 [0] : vector<512x128xf32> to vector<128xf32>
    %16 = vector.shape_cast %15 : vector<128xf32> to vector<1x128xf32>
    %17 = arith.addf %13, %16 : vector<1x128xf32>
    %c1_13 = arith.constant 1 : index
    %c0_14 = arith.constant 0 : index
    %18 = vector.load %arg5[%c1_13, %c0_14] : memref<8x128xf32, #tpu.memory_space<vmem>>, vector<1x128xf32>
    tpu.vector_store %arg5[%c1_13, %c0_14], %17 {strides = array<i32>} : memref<8x128xf32, #tpu.memory_space<vmem>>, vector<1x128xf32>,
    return
  }
  func.func @transform_0(%arg0: i32, %arg1: i32) -> (i32, i32) {
    %c1_i32 = arith.constant 1 : i32
    %0 = arith.muli %arg0, %c1_i32 : i32
    %1 = arith.addi %0, %arg1 : i32
    %c0_i32 = arith.constant 0 : i32
    %c0_i32_0 = arith.constant 0 : i32
    return %1, %c0_i32 : i32, i32
  }
  func.func @transform_1(%arg0: i32, %arg1: i32) -> (i32, i32) {
    %c0_i32 = arith.constant 0 : i32
    %c0_i32_0 = arith.constant 0 : i32
    %c0_i32_1 = arith.constant 0 : i32
    return %c0_i32, %c0_i32_0 : i32, i32
  }
  func.func @transform_2(%arg0: i32, %arg1: i32) -> (i32, i32) {
    %c1_i32 = arith.constant 1 : i32
    %0 = arith.muli %arg0, %c1_i32 : i32
    %1 = arith.addi %0, %arg1 : i32
    %c0_i32 = arith.constant 0 : i32
    %c0_i32_0 = arith.constant 0 : i32
    return %1, %c0_i32 : i32, i32
  }
  func.func @transform_3(%arg0: i32, %arg1: i32) -> (i32, i32) {
    %c0_i32 = arith.constant 0 : i32
    %c0_i32_0 = arith.constant 0 : i32
    return %arg0, %c0_i32 : i32, i32
  }
}

module attributes {stable_mosaic.version = 11 : i64} {
  func.func @_matmul_stats_kernel(%arg0: i32, %arg1: i32, %arg2: memref<512x24xbf16, #tpu.memory_space<vmem>>, %arg3: memref<24x128xbf16, #tpu.memory_space<vmem>>, %arg4: memref<512x128xbf16, #tpu.memory_space<vmem>>, %arg5: memref<8x128xf32, #tpu.memory_space<vmem>>) attributes {dimension_semantics = [#tpu.dimension_semantics<parallel>, #tpu.dimension_semantics<arbitrary>], iteration_bounds = array<i64: 1, 1>, scalar_prefetch = 0 : i64, scratch_operands = 0 : i64, tpu.core_type = #tpu.core_type<tc>, window_params = [{transform_indices = @transform_0, window_bounds = array<i64: 512, 24>}, {pipeline_mode = #tpu.pipeline_mode<synchronous>, transform_indices = @transform_1, window_bounds = array<i64: 24, 128>}, {transform_indices = @transform_2, window_bounds = array<i64: 512, 128>}, {transform_indices = @transform_3, window_bounds = array<i64: 8, 128>}]} {
    %c0_i32 = arith.constant 0 : i32
    %0 = arith.cmpi eq, %arg1, %c0_i32 : i32
    %1 = arith.extui %0 : i1 to i32
    %c0_i32_0 = arith.constant 0 : i32
    %2 = arith.cmpi ne, %1, %c0_i32_0 : i32
    scf.if %2 {
      %cst_15 = arith.constant 0.000000e+00 : f32
      %19 = vector.broadcast %cst_15 : f32 to vector<8x128xf32>
      %c0_16 = arith.constant 0 : index
      %c0_17 = arith.constant 0 : index
      %20 = vector.load %arg5[%c0_16, %c0_17] : memref<8x128xf32, #tpu.memory_space<vmem>>, vector<8x128xf32>
      tpu.vector_store %arg5[%c0_16, %c0_17], %19 {strides = array<i32>} : memref<8x128xf32, #tpu.memory_space<vmem>>, vector<8x128xf32>,
    } else {
    }
    %c0 = arith.constant 0 : index
    %c0_1 = arith.constant 0 : index
    %3 = vector.load %arg2[%c0, %c0_1] : memref<512x24xbf16, #tpu.memory_space<vmem>>, vector<512x24xbf16>
    %c0_2 = arith.constant 0 : index
    %c0_3 = arith.constant 0 : index
    %4 = vector.load %arg3[%c0_2, %c0_3] : memref<24x128xbf16, #tpu.memory_space<vmem>>, vector<24x128xbf16>
    %cst = arith.constant dense<0.000000e+00> : vector<512x128xf32>
    %5 = tpu.matmul %3, %4, %cst {dimension_numbers = #tpu.dot_dimension_numbers<[1], [0], [0], [1], [0, 0, 1, 1], [], []>} : vector<512x24xbf16>, vector<24x128xbf16>, vector<512x128xf32> -> vector<512x128xf32>
    %6 = arith.truncf %5 : vector<512x128xf32> to vector<512x128xbf16>
    %c0_4 = arith.constant 0 : index
    %c0_5 = arith.constant 0 : index
    %7 = vector.load %arg4[%c0_4, %c0_5] : memref<512x128xbf16, #tpu.memory_space<vmem>>, vector<512x128xbf16>
    tpu.vector_store %arg4[%c0_4, %c0_5], %6 {strides = array<i32>} : memref<512x128xbf16, #tpu.memory_space<vmem>>, vector<512x128xbf16>,
    %c0_6 = arith.constant 0 : index
    %c0_7 = arith.constant 0 : index
    %8 = vector.load %arg5[%c0_6, %c0_7] : memref<8x128xf32, #tpu.memory_space<vmem>>, vector<1x128xf32>
    %cst_8 = arith.constant dense<0.000000e+00> : vector<128xf32>
    %9 = vector.multi_reduction <add>, %5, %cst_8 [0] : vector<512x128xf32> to vector<128xf32>
    %10 = vector.shape_cast %9 : vector<128xf32> to vector<1x128xf32>
    %11 = arith.addf %8, %10 : vector<1x128xf32>
    %c0_9 = arith.constant 0 : index
    %c0_10 = arith.constant 0 : index
    %12 = vector.load %arg5[%c0_9, %c0_10] : memref<8x128xf32, #tpu.memory_space<vmem>>, vector<1x128xf32>
    tpu.vector_store %arg5[%c0_9, %c0_10], %11 {strides = array<i32>} : memref<8x128xf32, #tpu.memory_space<vmem>>, vector<1x128xf32>,
    %c1 = arith.constant 1 : index
    %c0_11 = arith.constant 0 : index
    %13 = vector.load %arg5[%c1, %c0_11] : memref<8x128xf32, #tpu.memory_space<vmem>>, vector<1x128xf32>
    %14 = arith.mulf %5, %5 : vector<512x128xf32>
    %cst_12 = arith.constant dense<0.000000e+00> : vector<128xf32>
    %15 = vector.multi_reduction <add>, %14, %cst_12 [0] : vector<512x128xf32> to vector<128xf32>
    %16 = vector.shape_cast %15 : vector<128xf32> to vector<1x128xf32>
    %17 = arith.addf %13, %16 : vector<1x128xf32>
    %c1_13 = arith.constant 1 : index
    %c0_14 = arith.constant 0 : index
    %18 = vector.load %arg5[%c1_13, %c0_14] : memref<8x128xf32, #tpu.memory_space<vmem>>, vector<1x128xf32>
    tpu.vector_store %arg5[%c1_13, %c0_14], %17 {strides = array<i32>} : memref<8x128xf32, #tpu.memory_space<vmem>>, vector<1x128xf32>,
    return
  }
  func.func @transform_0(%arg0: i32, %arg1: i32) -> (i32, i32) {
    %c1_i32 = arith.constant 1 : i32
    %0 = arith.muli %arg0, %c1_i32 : i32
    %1 = arith.addi %0, %arg1 : i32
    %c0_i32 = arith.constant 0 : i32
    %c0_i32_0 = arith.constant 0 : i32
    return %1, %c0_i32 : i32, i32
  }
  func.func @transform_1(%arg0: i32, %arg1: i32) -> (i32, i32) {
    %c0_i32 = arith.constant 0 : i32
    %c0_i32_0 = arith.constant 0 : i32
    %c0_i32_1 = arith.constant 0 : i32
    return %c0_i32, %c0_i32_0 : i32, i32
  }
  func.func @transform_2(%arg0: i32, %arg1: i32) -> (i32, i32) {
    %c1_i32 = arith.constant 1 : i32
    %0 = arith.muli %arg0, %c1_i32 : i32
    %1 = arith.addi %0, %arg1 : i32
    %c0_i32 = arith.constant 0 : i32
    %c0_i32_0 = arith.constant 0 : i32
    return %1, %c0_i32 : i32, i32
  }
  func.func @transform_3(%arg0: i32, %arg1: i32) -> (i32, i32) {
    %c0_i32 = arith.constant 0 : i32
    %c0_i32_0 = arith.constant 0 : i32
    return %arg0, %c0_i32 : i32, i32
  }
}

module attributes {stable_mosaic.version = 11 : i64} {
  func.func @_matmul_stats_kernel(%arg0: i32, %arg1: i32, %arg2: memref<32x288xbf16, #tpu.memory_space<vmem>>, %arg3: memref<288x128xbf16, #tpu.memory_space<vmem>>, %arg4: memref<32x128xbf16, #tpu.memory_space<vmem>>, %arg5: memref<8x128xf32, #tpu.memory_space<vmem>>) attributes {dimension_semantics = [#tpu.dimension_semantics<parallel>, #tpu.dimension_semantics<arbitrary>], iteration_bounds = array<i64: 1, 1>, scalar_prefetch = 0 : i64, scratch_operands = 0 : i64, tpu.core_type = #tpu.core_type<tc>, window_params = [{transform_indices = @transform_0, window_bounds = array<i64: 32, 288>}, {pipeline_mode = #tpu.pipeline_mode<synchronous>, transform_indices = @transform_1, window_bounds = array<i64: 288, 128>}, {transform_indices = @transform_2, window_bounds = array<i64: 32, 128>}, {transform_indices = @transform_3, window_bounds = array<i64: 8, 128>}]} {
    %c0_i32 = arith.constant 0 : i32
    %0 = arith.cmpi eq, %arg1, %c0_i32 : i32
    %1 = arith.extui %0 : i1 to i32
    %c0_i32_0 = arith.constant 0 : i32
    %2 = arith.cmpi ne, %1, %c0_i32_0 : i32
    scf.if %2 {
      %cst_15 = arith.constant 0.000000e+00 : f32
      %19 = vector.broadcast %cst_15 : f32 to vector<8x128xf32>
      %c0_16 = arith.constant 0 : index
      %c0_17 = arith.constant 0 : index
      %20 = vector.load %arg5[%c0_16, %c0_17] : memref<8x128xf32, #tpu.memory_space<vmem>>, vector<8x128xf32>
      tpu.vector_store %arg5[%c0_16, %c0_17], %19 {strides = array<i32>} : memref<8x128xf32, #tpu.memory_space<vmem>>, vector<8x128xf32>,
    } else {
    }
    %c0 = arith.constant 0 : index
    %c0_1 = arith.constant 0 : index
    %3 = vector.load %arg2[%c0, %c0_1] : memref<32x288xbf16, #tpu.memory_space<vmem>>, vector<32x288xbf16>
    %c0_2 = arith.constant 0 : index
    %c0_3 = arith.constant 0 : index
    %4 = vector.load %arg3[%c0_2, %c0_3] : memref<288x128xbf16, #tpu.memory_space<vmem>>, vector<288x128xbf16>
    %cst = arith.constant dense<0.000000e+00> : vector<32x128xf32>
    %5 = tpu.matmul %3, %4, %cst {dimension_numbers = #tpu.dot_dimension_numbers<[1], [0], [0], [1], [0, 0, 1, 1], [], []>} : vector<32x288xbf16>, vector<288x128xbf16>, vector<32x128xf32> -> vector<32x128xf32>
    %6 = arith.truncf %5 : vector<32x128xf32> to vector<32x128xbf16>
    %c0_4 = arith.constant 0 : index
    %c0_5 = arith.constant 0 : index
    %7 = vector.load %arg4[%c0_4, %c0_5] : memref<32x128xbf16, #tpu.memory_space<vmem>>, vector<32x128xbf16>
    tpu.vector_store %arg4[%c0_4, %c0_5], %6 {strides = array<i32>} : memref<32x128xbf16, #tpu.memory_space<vmem>>, vector<32x128xbf16>,
    %c0_6 = arith.constant 0 : index
    %c0_7 = arith.constant 0 : index
    %8 = vector.load %arg5[%c0_6, %c0_7] : memref<8x128xf32, #tpu.memory_space<vmem>>, vector<1x128xf32>
    %cst_8 = arith.constant dense<0.000000e+00> : vector<128xf32>
    %9 = vector.multi_reduction <add>, %5, %cst_8 [0] : vector<32x128xf32> to vector<128xf32>
    %10 = vector.shape_cast %9 : vector<128xf32> to vector<1x128xf32>
    %11 = arith.addf %8, %10 : vector<1x128xf32>
    %c0_9 = arith.constant 0 : index
    %c0_10 = arith.constant 0 : index
    %12 = vector.load %arg5[%c0_9, %c0_10] : memref<8x128xf32, #tpu.memory_space<vmem>>, vector<1x128xf32>
    tpu.vector_store %arg5[%c0_9, %c0_10], %11 {strides = array<i32>} : memref<8x128xf32, #tpu.memory_space<vmem>>, vector<1x128xf32>,
    %c1 = arith.constant 1 : index
    %c0_11 = arith.constant 0 : index
    %13 = vector.load %arg5[%c1, %c0_11] : memref<8x128xf32, #tpu.memory_space<vmem>>, vector<1x128xf32>
    %14 = arith.mulf %5, %5 : vector<32x128xf32>
    %cst_12 = arith.constant dense<0.000000e+00> : vector<128xf32>
    %15 = vector.multi_reduction <add>, %14, %cst_12 [0] : vector<32x128xf32> to vector<128xf32>
    %16 = vector.shape_cast %15 : vector<128xf32> to vector<1x128xf32>
    %17 = arith.addf %13, %16 : vector<1x128xf32>
    %c1_13 = arith.constant 1 : index
    %c0_14 = arith.constant 0 : index
    %18 = vector.load %arg5[%c1_13, %c0_14] : memref<8x128xf32, #tpu.memory_space<vmem>>, vector<1x128xf32>
    tpu.vector_store %arg5[%c1_13, %c0_14], %17 {strides = array<i32>} : memref<8x128xf32, #tpu.memory_space<vmem>>, vector<1x128xf32>,
    return
  }
  func.func @transform_0(%arg0: i32, %arg1: i32) -> (i32, i32) {
    %c1_i32 = arith.constant 1 : i32
    %0 = arith.muli %arg0, %c1_i32 : i32
    %1 = arith.addi %0, %arg1 : i32
    %c0_i32 = arith.constant 0 : i32
    %c0_i32_0 = arith.constant 0 : i32
    return %1, %c0_i32 : i32, i32
  }
  func.func @transform_1(%arg0: i32, %arg1: i32) -> (i32, i32) {
    %c0_i32 = arith.constant 0 : i32
    %c0_i32_0 = arith.constant 0 : i32
    %c0_i32_1 = arith.constant 0 : i32
    return %c0_i32, %c0_i32_0 : i32, i32
  }
  func.func @transform_2(%arg0: i32, %arg1: i32) -> (i32, i32) {
    %c1_i32 = arith.constant 1 : i32
    %0 = arith.muli %arg0, %c1_i32 : i32
    %1 = arith.addi %0, %arg1 : i32
    %c0_i32 = arith.constant 0 : i32
    %c0_i32_0 = arith.constant 0 : i32
    return %1, %c0_i32 : i32, i32
  }
  func.func @transform_3(%arg0: i32, %arg1: i32) -> (i32, i32) {
    %c0_i32 = arith.constant 0 : i32
    %c0_i32_0 = arith.constant 0 : i32
    return %arg0, %c0_i32 : i32, i32
  }
}

module attributes {stable_mosaic.version = 11 : i64} {
  func.func @_bn_silu_kernel(%arg0: i32, %arg1: memref<32x128xbf16, #tpu.memory_space<vmem>>, %arg2: memref<1x128xf32, #tpu.memory_space<vmem>>, %arg3: memref<1x128xf32, #tpu.memory_space<vmem>>, %arg4: memref<32x128xbf16, #tpu.memory_space<vmem>>) attributes {dimension_semantics = [#tpu.dimension_semantics<parallel>], iteration_bounds = array<i64: 1>, scalar_prefetch = 0 : i64, scratch_operands = 0 : i64, tpu.core_type = #tpu.core_type<tc>, window_params = [{transform_indices = @transform_0, window_bounds = array<i64: 32, 128>}, {pipeline_mode = #tpu.pipeline_mode<synchronous>, transform_indices = @transform_1, window_bounds = array<i64: 1, 128>}, {pipeline_mode = #tpu.pipeline_mode<synchronous>, transform_indices = @transform_2, window_bounds = array<i64: 1, 128>}, {transform_indices = @transform_3, window_bounds = array<i64: 32, 128>}]} {
    %c0 = arith.constant 0 : index
    %c0_0 = arith.constant 0 : index
    %0 = vector.load %arg1[%c0, %c0_0] : memref<32x128xbf16, #tpu.memory_space<vmem>>, vector<32x128xbf16>
    %1 = arith.extf %0 : vector<32x128xbf16> to vector<32x128xf32>
    %c0_1 = arith.constant 0 : index
    %c0_2 = arith.constant 0 : index
    %2 = vector.load %arg2[%c0_1, %c0_2] : memref<1x128xf32, #tpu.memory_space<vmem>>, vector<1x128xf32>
    %3 = vector.broadcast %2 : vector<1x128xf32> to vector<32x128xf32>
    %4 = arith.mulf %1, %3 : vector<32x128xf32>
    %c0_3 = arith.constant 0 : index
    %c0_4 = arith.constant 0 : index
    %5 = vector.load %arg3[%c0_3, %c0_4] : memref<1x128xf32, #tpu.memory_space<vmem>>, vector<1x128xf32>
    %6 = vector.broadcast %5 : vector<1x128xf32> to vector<32x128xf32>
    %7 = arith.addf %4, %6 : vector<32x128xf32>
    %8 = arith.negf %7 : vector<32x128xf32>
    %9 = math.exp %8 : vector<32x128xf32>
    %cst = arith.constant 1.000000e+00 : f32
    %10 = vector.broadcast %cst : f32 to vector<32x128xf32>
    %11 = arith.addf %10, %9 : vector<32x128xf32>
    %12 = arith.divf %10, %11 : vector<32x128xf32>
    %13 = arith.mulf %7, %12 : vector<32x128xf32>
    %14 = arith.truncf %13 : vector<32x128xf32> to vector<32x128xbf16>
    %c0_5 = arith.constant 0 : index
    %c0_6 = arith.constant 0 : index
    %15 = vector.load %arg4[%c0_5, %c0_6] : memref<32x128xbf16, #tpu.memory_space<vmem>>, vector<32x128xbf16>
    tpu.vector_store %arg4[%c0_5, %c0_6], %14 {strides = array<i32>} : memref<32x128xbf16, #tpu.memory_space<vmem>>, vector<32x128xbf16>,
    return
  }
  func.func @transform_0(%arg0: i32) -> (i32, i32) {
    %c0_i32 = arith.constant 0 : i32
    %c0_i32_0 = arith.constant 0 : i32
    return %arg0, %c0_i32 : i32, i32
  }
  func.func @transform_1(%arg0: i32) -> (i32, i32) {
    %c0_i32 = arith.constant 0 : i32
    %c0_i32_0 = arith.constant 0 : i32
    %c0_i32_1 = arith.constant 0 : i32
    return %c0_i32, %c0_i32_0 : i32, i32
  }
  func.func @transform_2(%arg0: i32) -> (i32, i32) {
    %c0_i32 = arith.constant 0 : i32
    %c0_i32_0 = arith.constant 0 : i32
    %c0_i32_1 = arith.constant 0 : i32
    return %c0_i32, %c0_i32_0 : i32, i32
  }
  func.func @transform_3(%arg0: i32) -> (i32, i32) {
    %c0_i32 = arith.constant 0 : i32
    %c0_i32_0 = arith.constant 0 : i32
    return %arg0, %c0_i32 : i32, i32
  }
}

module attributes {stable_mosaic.version = 11 : i64} {
  func.func @_matmul_stats_kernel(%arg0: i32, %arg1: i32, %arg2: memref<32x96xbf16, #tpu.memory_space<vmem>>, %arg3: memref<96x128xbf16, #tpu.memory_space<vmem>>, %arg4: memref<32x128xbf16, #tpu.memory_space<vmem>>, %arg5: memref<8x128xf32, #tpu.memory_space<vmem>>) attributes {dimension_semantics = [#tpu.dimension_semantics<parallel>, #tpu.dimension_semantics<arbitrary>], iteration_bounds = array<i64: 1, 1>, scalar_prefetch = 0 : i64, scratch_operands = 0 : i64, tpu.core_type = #tpu.core_type<tc>, window_params = [{transform_indices = @transform_0, window_bounds = array<i64: 32, 96>}, {pipeline_mode = #tpu.pipeline_mode<synchronous>, transform_indices = @transform_1, window_bounds = array<i64: 96, 128>}, {transform_indices = @transform_2, window_bounds = array<i64: 32, 128>}, {transform_indices = @transform_3, window_bounds = array<i64: 8, 128>}]} {
    %c0_i32 = arith.constant 0 : i32
    %0 = arith.cmpi eq, %arg1, %c0_i32 : i32
    %1 = arith.extui %0 : i1 to i32
    %c0_i32_0 = arith.constant 0 : i32
    %2 = arith.cmpi ne, %1, %c0_i32_0 : i32
    scf.if %2 {
      %cst_15 = arith.constant 0.000000e+00 : f32
      %19 = vector.broadcast %cst_15 : f32 to vector<8x128xf32>
      %c0_16 = arith.constant 0 : index
      %c0_17 = arith.constant 0 : index
      %20 = vector.load %arg5[%c0_16, %c0_17] : memref<8x128xf32, #tpu.memory_space<vmem>>, vector<8x128xf32>
      tpu.vector_store %arg5[%c0_16, %c0_17], %19 {strides = array<i32>} : memref<8x128xf32, #tpu.memory_space<vmem>>, vector<8x128xf32>,
    } else {
    }
    %c0 = arith.constant 0 : index
    %c0_1 = arith.constant 0 : index
    %3 = vector.load %arg2[%c0, %c0_1] : memref<32x96xbf16, #tpu.memory_space<vmem>>, vector<32x96xbf16>
    %c0_2 = arith.constant 0 : index
    %c0_3 = arith.constant 0 : index
    %4 = vector.load %arg3[%c0_2, %c0_3] : memref<96x128xbf16, #tpu.memory_space<vmem>>, vector<96x128xbf16>
    %cst = arith.constant dense<0.000000e+00> : vector<32x128xf32>
    %5 = tpu.matmul %3, %4, %cst {dimension_numbers = #tpu.dot_dimension_numbers<[1], [0], [0], [1], [0, 0, 1, 1], [], []>} : vector<32x96xbf16>, vector<96x128xbf16>, vector<32x128xf32> -> vector<32x128xf32>
    %6 = arith.truncf %5 : vector<32x128xf32> to vector<32x128xbf16>
    %c0_4 = arith.constant 0 : index
    %c0_5 = arith.constant 0 : index
    %7 = vector.load %arg4[%c0_4, %c0_5] : memref<32x128xbf16, #tpu.memory_space<vmem>>, vector<32x128xbf16>
    tpu.vector_store %arg4[%c0_4, %c0_5], %6 {strides = array<i32>} : memref<32x128xbf16, #tpu.memory_space<vmem>>, vector<32x128xbf16>,
    %c0_6 = arith.constant 0 : index
    %c0_7 = arith.constant 0 : index
    %8 = vector.load %arg5[%c0_6, %c0_7] : memref<8x128xf32, #tpu.memory_space<vmem>>, vector<1x128xf32>
    %cst_8 = arith.constant dense<0.000000e+00> : vector<128xf32>
    %9 = vector.multi_reduction <add>, %5, %cst_8 [0] : vector<32x128xf32> to vector<128xf32>
    %10 = vector.shape_cast %9 : vector<128xf32> to vector<1x128xf32>
    %11 = arith.addf %8, %10 : vector<1x128xf32>
    %c0_9 = arith.constant 0 : index
    %c0_10 = arith.constant 0 : index
    %12 = vector.load %arg5[%c0_9, %c0_10] : memref<8x128xf32, #tpu.memory_space<vmem>>, vector<1x128xf32>
    tpu.vector_store %arg5[%c0_9, %c0_10], %11 {strides = array<i32>} : memref<8x128xf32, #tpu.memory_space<vmem>>, vector<1x128xf32>,
    %c1 = arith.constant 1 : index
    %c0_11 = arith.constant 0 : index
    %13 = vector.load %arg5[%c1, %c0_11] : memref<8x128xf32, #tpu.memory_space<vmem>>, vector<1x128xf32>
    %14 = arith.mulf %5, %5 : vector<32x128xf32>
    %cst_12 = arith.constant dense<0.000000e+00> : vector<128xf32>
    %15 = vector.multi_reduction <add>, %14, %cst_12 [0] : vector<32x128xf32> to vector<128xf32>
    %16 = vector.shape_cast %15 : vector<128xf32> to vector<1x128xf32>
    %17 = arith.addf %13, %16 : vector<1x128xf32>
    %c1_13 = arith.constant 1 : index
    %c0_14 = arith.constant 0 : index
    %18 = vector.load %arg5[%c1_13, %c0_14] : memref<8x128xf32, #tpu.memory_space<vmem>>, vector<1x128xf32>
    tpu.vector_store %arg5[%c1_13, %c0_14], %17 {strides = array<i32>} : memref<8x128xf32, #tpu.memory_space<vmem>>, vector<1x128xf32>,
    return
  }
  func.func @transform_0(%arg0: i32, %arg1: i32) -> (i32, i32) {
    %c1_i32 = arith.constant 1 : i32
    %0 = arith.muli %arg0, %c1_i32 : i32
    %1 = arith.addi %0, %arg1 : i32
    %c0_i32 = arith.constant 0 : i32
    %c0_i32_0 = arith.constant 0 : i32
    return %1, %c0_i32 : i32, i32
  }
  func.func @transform_1(%arg0: i32, %arg1: i32) -> (i32, i32) {
    %c0_i32 = arith.constant 0 : i32
    %c0_i32_0 = arith.constant 0 : i32
    %c0_i32_1 = arith.constant 0 : i32
    return %c0_i32, %c0_i32_0 : i32, i32
  }
  func.func @transform_2(%arg0: i32, %arg1: i32) -> (i32, i32) {
    %c1_i32 = arith.constant 1 : i32
    %0 = arith.muli %arg0, %c1_i32 : i32
    %1 = arith.addi %0, %arg1 : i32
    %c0_i32 = arith.constant 0 : i32
    %c0_i32_0 = arith.constant 0 : i32
    return %1, %c0_i32 : i32, i32
  }
  func.func @transform_3(%arg0: i32, %arg1: i32) -> (i32, i32) {
    %c0_i32 = arith.constant 0 : i32
    %c0_i32_0 = arith.constant 0 : i32
    return %arg0, %c0_i32 : i32, i32
  }
}

</mosaic_0001>

<bundles_post_ra>
// kernel: run.37
= control target key start
LH: loop header
LB: loop body
LE: loop exit
PB: predicated region body
PF: predicated region fallthrough
CT: control target
= control target key end

     0   :  { %s662_s0 = inlined_call_operand.vmem [shape: bf16[128,128], index: 0, kind: input, shape index: {}]   ;;  %s663_s1 = inlined_call_operand.vmem [shape: f32[1,128], index: 1, kind: input, shape index: {}]   ;;  %s664_s2 = inlined_call_operand.vmem [shape: f32[1,128], index: 2, kind: input, shape index: {}]   ;;  %s665_s3 = inlined_call_operand.vmem [shape: bf16[128,128], index: 3, kind: output, shape index: {}]  }
   0x1   :  { %v339_v0 = vld [vmem:[%s662_s0] sm:$0xff]   ;;  %v410_v4 = vld [vmem:[%s662_s0 + $0x8] sm:$0xff]   ;;  %v411_v5 = vld [vmem:[%s662_s0 + $0x10] sm:$0xff]  }
   0x2   :  { %v514_v1 = vld [vmem:[%s663_s1] ss:$0 sm:$0xff]  ;;  %v340_v2 = vunpack.c.l.bf16 %v339_v0  ;;  %v341_v3 = vunpack.c.h.bf16 %v339_v0  ;;  %v412_v6 = vld [vmem:[%s662_s0 + $0x18] sm:$0xff]   ;;  %v344_v8 = vunpack.c.l.bf16 %v410_v4  ;;  %v345_v9 = vunpack.c.h.bf16 %v410_v4  ;;  %v414_v33 = vld [vmem:[%s662_s0 + $0x28] sm:$0xff]  }
   0x3   :  { %v528_v7 = vld [vmem:[%s664_s2] ss:$0 sm:$0xff]  ;;  %v348_v10 = vunpack.c.l.bf16 %v411_v5  ;;  %v349_v11 = vunpack.c.h.bf16 %v411_v5  ;;  %v352_v14 = vunpack.c.l.bf16 %v412_v6  ;;  %v353_v15 = vunpack.c.h.bf16 %v412_v6  ;;  %v415_v37 = vld [vmem:[%s662_s0 + $0x30] sm:$0xff]   ;;  %v416_v61 = vld [vmem:[%s662_s0 + $0x38] sm:$0xff]  }
   0x4   :  { %v53_v12 = vmul.f32 %v340_v2, %v514_v1  ;;  %v54_v13 = vmul.f32 %v341_v3, %v514_v1  ;;  %v55_v16 = vmul.f32 %v344_v8, %v514_v1  ;;  %v56_v17 = vmul.f32 %v345_v9, %v514_v1  ;;  %v413_v24 = vld [vmem:[%s662_s0 + $0x20] sm:$0xff]  }
   0x5   :  { %v57_v18 = vmul.f32 %v348_v10, %v514_v1  ;;  %v58_v19 = vmul.f32 %v349_v11, %v514_v1  ;;  %v59_v22 = vmul.f32 %v352_v14, %v514_v1  ;;  %v60_v23 = vmul.f32 %v353_v15, %v514_v1 }
   0x6   :  { %v537_v20 = vadd.f32 %v528_v7, %v53_v12  ;;  %v540_v21 = vadd.f32 %v528_v7, %v54_v13  ;;  %v548_v25 = vadd.f32 %v528_v7, %v55_v16  ;;  %v551_v26 = vadd.f32 %v528_v7, %v56_v17 }
   0x7   :  { %v554_v27 = vadd.f32 %v528_v7, %v57_v18  ;;  %v557_v28 = vadd.f32 %v528_v7, %v58_v19  ;;  %v562_v31 = vadd.f32 %v528_v7, %v59_v22  ;;  %v565_v32 = vadd.f32 %v528_v7, %v60_v23 }
   0x8   :  { %v290_v29 = vmul.f32 -1.442695, %v537_v20  ;;  %v291_v30 = vmul.f32 -1.442695, %v540_v21  ;;  %v292_v34 = vmul.f32 -1.442695, %v548_v25  ;;  %v356_v36 = vunpack.c.l.bf16 %v413_v24 }
   0x9   :  { %v293_v35 = vmul.f32 -1.442695, %v551_v26  ;;  %v294_v38 = vmul.f32 -1.442695, %v554_v27  ;;  %v295_v39 = vmul.f32 -1.442695, %v557_v28  ;;  %v357_v41 = vunpack.c.h.bf16 %v413_v24 }
   0xa   :  { %424 = vpow2.f32 %v290_v29  ;;  %v296_v40 = vmul.f32 -1.442695, %v562_v31  ;;  %v61_v42 = vmul.f32 %v356_v36, %v514_v1  ;;  %v360_v43 = vunpack.c.l.bf16 %v414_v33 }
   0xb   :  { %426 = vpow2.f32 %v291_v30  ;;  %v297_v44 = vmul.f32 -1.442695, %v565_v32  ;;  %v361_v45 = vunpack.c.h.bf16 %v414_v33  ;;  %v364_v46 = vunpack.c.l.bf16 %v415_v37 }
   0xc   :  { %428 = vpow2.f32 %v292_v34  ;;  %v62_v47 = vmul.f32 %v357_v41, %v514_v1  ;;  %v582_v48 = vadd.f32 %v528_v7, %v61_v42  ;;  %v63_v49 = vmul.f32 %v360_v43, %v514_v1 }
   0xd   :  { %430 = vpow2.f32 %v293_v35  ;;  %v64_v50 = vmul.f32 %v361_v45, %v514_v1  ;;  %v65_v51 = vmul.f32 %v364_v46, %v514_v1  ;;  %v365_v62 = vunpack.c.h.bf16 %v415_v37 }
   0xe   :  { %432 = vpow2.f32 %v294_v38  ;;  %v588_v52 = vadd.f32 %v528_v7, %v62_v47  ;;  %v298_v53 = vmul.f32 -1.442695, %v582_v48  ;;  %v592_v54 = vadd.f32 %v528_v7, %v63_v49 }
   0xf   :  { %434 = vpow2.f32 %v295_v39  ;;  %v595_v55 = vadd.f32 %v528_v7, %v64_v50  ;;  %v598_v56 = vadd.f32 %v528_v7, %v65_v51  ;;  %v368_v3 = vunpack.c.l.bf16 %v416_v61 }
  0x10   :  { %436 = vpow2.f32 %v296_v40  ;;  %v299_v57 = vmul.f32 -1.442695, %v588_v52  ;;  %v300_v58 = vmul.f32 -1.442695, %v592_v54  ;;  %v369_v6 = vunpack.c.h.bf16 %v416_v61 }
  0x11   :  { %438 = vpow2.f32 %v297_v44  ;;  %v301_v59 = vmul.f32 -1.442695, %v595_v55  ;;  %v302_v60 = vmul.f32 -1.442695, %v598_v56  ;;  %v66_v10 = vmul.f32 %v365_v62, %v514_v1 }
  0x12   :  { %440 = vpow2.f32 %v298_v53  ;;  %v67_v15 = vmul.f32 %v368_v3, %v514_v1  ;;  %v68_v18 = vmul.f32 %v369_v6, %v514_v1 }
  0x13   :  { %442 = vpow2.f32 %v299_v57  ;;  %v611_v23 = vadd.f32 %v528_v7, %v66_v10 }
  0x14   :  { %v425_v63 = vpop.eup %424  ;;  %444 = vpow2.f32 %v300_v58  ;;  %v614_v34 = vadd.f32 %v528_v7, %v67_v15  ;;  %v617_v1 = vadd.f32 %v528_v7, %v68_v18 }
  0x15   :  { %v427_v0 = vpop.eup %426  ;;  %v140_v2 = vadd.f32 1.0, %v425_v63  ;;  %446 = vpow2.f32 %v301_v59  ;;  %v303_v39 = vmul.f32 -1.442695, %v611_v23 }
  0x16   :  { %v429_v4 = vpop.eup %428  ;;  %v141_v5 = vadd.f32 1.0, %v427_v0  ;;  %448 = vpow2.f32 %v302_v60  ;;  %v304_v43 = vmul.f32 -1.442695, %v614_v34  ;;  %v305_v46 = vmul.f32 -1.442695, %v617_v1 }
  0x17   :  { %v431_v8 = vpop.eup %430  ;;  %450 = vrcp.f32 %v140_v2  ;;  %v142_v9 = vadd.f32 1.0, %v429_v4 }
  0x18   :  { %v433_v11 = vpop.eup %432  ;;  %452 = vrcp.f32 %v141_v5  ;;  %v143_v12 = vadd.f32 1.0, %v431_v8 }
  0x19   :  { %v435_v13 = vpop.eup %434  ;;  %454 = vrcp.f32 %v142_v9  ;;  %v144_v14 = vadd.f32 1.0, %v433_v11 }
  0x1a   :  { %v437_v16 = vpop.eup %436  ;;  %456 = vrcp.f32 %v143_v12  ;;  %v145_v17 = vadd.f32 1.0, %v435_v13 }
  0x1b   :  { %v439_v19 = vpop.eup %438  ;;  %458 = vrcp.f32 %v144_v14  ;;  %v146_v22 = vadd.f32 1.0, %v437_v16 }
  0x1c   :  { %v441_v24 = vpop.eup %440  ;;  %460 = vrcp.f32 %v145_v17  ;;  %v147_v29 = vadd.f32 1.0, %v439_v19 }
  0x1d   :  { %v443_v30 = vpop.eup %442  ;;  %462 = vrcp.f32 %v146_v22  ;;  %v148_v33 = vadd.f32 1.0, %v441_v24 }
  0x1e   :  { %v445_v35 = vpop.eup %444  ;;  %464 = vrcp.f32 %v147_v29  ;;  %v149_v36 = vadd.f32 1.0, %v443_v30 }
  0x1f   :  { %v447_v37 = vpop.eup %446  ;;  %466 = vrcp.f32 %v148_v33  ;;  %v150_v38 = vadd.f32 1.0, %v445_v35 }
  0x20   :  { %v449_v40 = vpop.eup %448  ;;  %468 = vrcp.f32 %v149_v36  ;;  %v151_v41 = vadd.f32 1.0, %v447_v37 }
  0x21   :  { %v451_v42 = vpop.eup %450  ;;  %470 = vrcp.f32 %v150_v38  ;;  %v152_v62 = vadd.f32 1.0, %v449_v40 }
  0x22   :  { %v453_v44 = vpop.eup %452  ;;  %v188_v45 = vmul.f32 %v451_v42, %v537_v20  ;;  %472 = vrcp.f32 %v151_v41 }
  0x23   :  { %v455_v7 = vpop.eup %454  ;;  %v189_v47 = vmul.f32 %v453_v44, %v540_v21  ;;  %474 = vpow2.f32 %v303_v39 }
  0x24   :  { %v457_v49 = vpop.eup %456  ;;  %v190_v50 = vmul.f32 %v455_v7, %v548_v25  ;;  %476 = vpow2.f32 %v304_v43 }
  0x25   :  { %v459_v51 = vpop.eup %458  ;;  %v373_v53 = vpack.c.bf16 %v189_v47, %v188_v45  ;;  %v191_v57 = vmul.f32 %v457_v49, %v551_v26  ;;  %478 = vpow2.f32 %v305_v46 }
  0x26   :  { %v461_v58 = vpop.eup %460  ;;  %v192_v59 = vmul.f32 %v459_v51, %v554_v27  ;;  %480 = vrcp.f32 %v152_v62 }
  0x27   :  { %v463_v20 = vpop.eup %462  ;;  %374 = vst [vmem:[%s665_s3] sm:$0xff] %v373_v53   ;;  %v378_v60 = vpack.c.bf16 %v191_v57, %v190_v50  ;;  %v193_v21 = vmul.f32 %v461_v58, %v557_v28 }
  0x28   :  { %v465_v61 = vpop.eup %464  ;;  %v194_v25 = vmul.f32 %v463_v20, %v562_v31 }
  0x29   :  { %v467_v63 = vpop.eup %466  ;;  %417 = vst [vmem:[%s665_s3 + $0x8] sm:$0xff] %v378_v60   ;;  %v383_v26 = vpack.c.bf16 %v193_v21, %v192_v59  ;;  %v195_v27 = vmul.f32 %v465_v61, %v565_v32 }
  0x2a   :  { %v469_v0 = vpop.eup %468  ;;  %v196_v2 = vmul.f32 %v467_v63, %v582_v48 }
  0x2b   :  { %v471_v3 = vpop.eup %470  ;;  %418 = vst [vmem:[%s665_s3 + $0x10] sm:$0xff] %v383_v26   ;;  %v388_v28 = vpack.c.bf16 %v195_v27, %v194_v25  ;;  %v197_v31 = vmul.f32 %v469_v0, %v588_v52 }
  0x2c   :  { %v473_v4 = vpop.eup %472  ;;  %v198_v5 = vmul.f32 %v471_v3, %v592_v54 }
  0x2d   :  { %v475_v6 = vpop.eup %474  ;;  %419 = vst [vmem:[%s665_s3 + $0x18] sm:$0xff] %v388_v28   ;;  %v393_v32 = vpack.c.bf16 %v197_v31, %v196_v2  ;;  %v199_v48 = vmul.f32 %v473_v4, %v595_v55 }
  0x2e   :  { %v153_v8 = vadd.f32 1.0, %v475_v6  ;;  %v477_v9 = vpop.eup %476 }
  0x2f   :  { %420 = vst [vmem:[%s665_s3 + $0x20] sm:$0xff] %v393_v32   ;;  %v398_v10 = vpack.c.bf16 %v199_v48, %v198_v5  ;;  %v479_v52 = vpop.eup %478  ;;  %v154_v11 = vadd.f32 1.0, %v477_v9 }
  0x30   :  { %482 = vrcp.f32 %v153_v8  ;;  %v155_v54 = vadd.f32 1.0, %v479_v52  ;;  %v481_v12 = vpop.eup %480 }
  0x31   :  { %421 = vst [vmem:[%s665_s3 + $0x28] sm:$0xff] %v398_v10   ;;  %484 = vrcp.f32 %v154_v11  ;;  %v200_v55 = vmul.f32 %v481_v12, %v598_v56 }
  0x32   :  { %486 = vrcp.f32 %v155_v54 }
  0x3a   :  { %v483_v13 = vpop.eup %482 }
  0x3b   :  { %v201_v14 = vmul.f32 %v483_v13, %v611_v23  ;;  %v485_v15 = vpop.eup %484 }
  0x3c   :  { %v487_v16 = vpop.eup %486  ;;  %v202_v18 = vmul.f32 %v485_v15, %v614_v34 }
  0x3d   :  { %v403_v17 = vpack.c.bf16 %v201_v14, %v200_v55  ;;  %v203_v19 = vmul.f32 %v487_v16, %v617_v1 }
  0x3f   :  { %422 = vst [vmem:[%s665_s3 + $0x30] sm:$0xff] %v403_v17   ;;  %v408_v22 = vpack.c.bf16 %v203_v19, %v202_v18 }
  0x41   :  { %423 = vst [vmem:[%s665_s3 + $0x38] sm:$0xff] %v408_v22  }

// kernel: run.36
= control target key start
LH: loop header
LB: loop body
LE: loop exit
PB: predicated region body
PF: predicated region fallthrough
CT: control target
= control target key end

     0   :  { %vm159_vm0 = vcmask 785408   ;;  %v631_v14 = vmov 0.0   ;;  %s741_s1 = inlined_call_operand.vmem [shape: bf16[96,128], index: 1, kind: input, shape index: {}]   ;;  %s742_s0 = inlined_call_operand.vmem [shape: bf16[128,96], index: 0, kind: input, shape index: {}]   ;;  %s743_s3 = inlined_call_operand.vmem [shape: f32[8,128], index: 3, kind: output, shape index: {1}]   ;;  %s744_s2 = inlined_call_operand.vmem [shape: bf16[128,128], index: 2, kind: output, shape index: {0}]  }
   0x1   :  { %v617_v0 = vld [vmem:[%s741_s1] sm:$0xff]   ;;  %v618_v1 = vld [vmem:[%s741_s1 + $0x8] sm:$0xff]   ;;  %v619_v2 = vld [vmem:[%s741_s1 + $0x10] sm:$0xff]   ;;  %54 = vst [vmem:[%s743_s3] sm:$0xff] %v631_v14 }
   0x2   :  { %576 = vmatprep.subr.bf16.mxu0 %v617_v0  ;;  %604 = vmatprep.subr.bf16.mxu1 %v617_v0  ;;  %v623_v3 = vld [vmem:[%s742_s0] sm:$0xff]   ;;  %v620_v4 = vld [vmem:[%s741_s1 + $0x18] sm:$0xff]   ;;  %v622_v7 = vld [vmem:[%s741_s1 + $0x28] sm:$0xff]  }
   0x3   :  { %577 = vmatpush3.bf16.msra.mxu0 %v617_v0  ;;  %610 = vmatpush3.bf16.msra.mxu1 %v617_v0  ;;  %v627_v5 = vld [vmem:[%s742_s0 + $0x20] sm:$0xff]   ;;  %v624_v8 = vld [vmem:[%s742_s0 + $0x8] sm:$0xff]   ;;  %v625_v10 = vld [vmem:[%s742_s0 + $0x10] sm:$0xff]  }
   0x4   :  { %578 = vmatprep.subr.bf16.mxu0 %v618_v1  ;;  %605 = vmatprep.subr.bf16.mxu1 %v618_v1  ;;  %v621_v6 = vld [vmem:[%s741_s1 + $0x20] sm:$0xff]   ;;  %v628_v9 = vld [vmem:[%s742_s0 + $0x28] sm:$0xff]   ;;  %v629_v11 = vld [vmem:[%s742_s0 + $0x30] sm:$0xff]  }
   0x5   :  { %588 = vmatprep.mubr.msk.bf16.mxu0 %vm159_vm0, %v623_v3  ;;  %596 = vmatprep.mubr.msk.bf16.mxu1 %vm159_vm0, %v627_v5  ;;  %v626_v12 = vld [vmem:[%s742_s0 + $0x18] sm:$0xff]  }
   0x6   :  { %v630_v13 = vld [vmem:[%s742_s0 + $0x38] sm:$0xff]  }
   0x7   :  { %579 = vmatpush3.bf16.msra.mxu0 %v618_v1  ;;  %611 = vmatpush3.bf16.msra.mxu1 %v618_v1 }
   0x8   :  { %580 = vmatprep.subr.bf16.mxu0 %v619_v2  ;;  %606 = vmatprep.subr.bf16.mxu1 %v619_v2 }
   0xb   :  { %581 = vmatpush3.bf16.msra.mxu0 %v619_v2  ;;  %612 = vmatpush3.bf16.msra.mxu1 %v619_v2 }
   0xc   :  { %582 = vmatprep.subr.bf16.mxu0 %v620_v4  ;;  %607 = vmatprep.subr.bf16.mxu1 %v620_v4 }
   0xf   :  { %583 = vmatpush3.bf16.msra.mxu0 %v620_v4  ;;  %613 = vmatpush3.bf16.msra.mxu1 %v620_v4 }
  0x10   :  { %584 = vmatprep.subr.bf16.mxu0 %v621_v6  ;;  %608 = vmatprep.subr.bf16.mxu1 %v621_v6 }
  0x13   :  { %585 = vmatpush3.bf16.msra.mxu0 %v621_v6  ;;  %614 = vmatpush3.bf16.msra.mxu1 %v621_v6 }
  0x14   :  { %586 = vmatprep.subr.bf16.mxu0 %v622_v7  ;;  %609 = vmatprep.subr.bf16.mxu1 %v622_v7 }
  0x17   :  { %587 = vmatpush3.bf16.msra.mxu0 %v622_v7  ;;  %615 = vmatpush3.bf16.msra.mxu1 %v622_v7 }
  0x1a   :  { %589 = vmatmul.mubr.msk.bf16.vlgmr.msra.gmra.mrb[0].mxu0 %vm159_vm0, %v624_v8  ;;  %597 = vmatmul.mubr.msk.bf16.vlgmr.msra.gmra.mrb[0].mxu1 %vm159_vm0, %v628_v9 }
  0x1b   :  { %592 = vmatprep.mubr.msk.bf16.mxu0 %vm159_vm0, %v625_v10  ;;  %600 = vmatprep.mubr.msk.bf16.mxu1 %vm159_vm0, %v629_v11 }
  0x22   :  { %593 = vmatmul.mubr.msk.bf16.gmra.mrb[4].mxu0 %vm159_vm0, %v626_v12  ;;  %601 = vmatmul.mubr.msk.bf16.gmra.mrb[4].mxu1 %vm159_vm0, %v630_v13 }
  0xed   :  { %v590_v15 = vpop.f32.mrb[0].mxu0  ;;  %v598_v16 = vpop.f32.mrb[0].mxu1 }
  0xee   :  { %v218_v17 = vpop.f32.mrb[1].mxu0  ;;  %v250_v18 = vpop.f32.mrb[1].mxu1  ;;  %v388_v30 = vmul.f32 %v590_v15, %v590_v15  ;;  %v396_v2 = vmul.f32 %v598_v16, %v598_v16 }
  0xef   :  { %v591_v19 = vpop.f32.mrb[2].mxu0  ;;  %v599_v20 = vpop.f32.mrb[2].mxu1  ;;  %v386_v21 = vmul.f32 %v218_v17, %v218_v17  ;;  %v394_v60 = vmul.f32 %v250_v18, %v250_v18 }
  0xf0   :  { %v523_v22 = vpack.c.bf16 %v591_v19, %v590_v15  ;;  %v221_v23 = vpop.f32.mrb[3].mxu0  ;;  %v543_v24 = vpack.c.bf16 %v599_v20, %v598_v16  ;;  %v253_v25 = vpop.f32.mrb[3].mxu1  ;;  %v389_v33 = vmul.f32 %v591_v19, %v591_v19  ;;  %v397_v5 = vmul.f32 %v599_v20, %v599_v20 }
  0xf1   :  { %v518_v26 = vpack.c.bf16 %v221_v23, %v218_v17  ;;  %v362_v27 = vadd.f32 %v221_v23, %v218_v17  ;;  %v387_v28 = vmul.f32 %v221_v23, %v221_v23  ;;  %v538_v29 = vpack.c.bf16 %v253_v25, %v250_v18 }
  0xf2   :  { %555 = vst [vmem:[%s744_s2 + $0x8] sm:$0xff] %v523_v22   ;;  %559 = vst [vmem:[%s744_s2 + $0x28] sm:$0xff] %v543_v24   ;;  %v395_v1 = vmul.f32 %v253_v25, %v253_v25 }
  0xf3   :  { %519 = vst [vmem:[%s744_s2] sm:$0xff] %v518_v26   ;;  %v363_v31 = vadd.f32 %v590_v15, %v362_v27  ;;  %v402_v32 = vadd.f32 %v387_v28, %v386_v21  ;;  %558 = vst [vmem:[%s744_s2 + $0x20] sm:$0xff] %v538_v29  }
  0xf5   :  { %v403_v34 = vadd.f32 %v402_v32, %v388_v30  ;;  %v594_v35 = vpop.f32.mrb[4].mxu0  ;;  %v364_v36 = vadd.f32 %v591_v19, %v363_v31  ;;  %v602_v37 = vpop.f32.mrb[4].mxu1  ;;  %v361_v30 = vld [vmem:[%s743_s3] sm:$0x1] }
  0xf6   :  { %v234_v38 = vpop.f32.mrb[5].mxu0  ;;  %v266_v39 = vpop.f32.mrb[5].mxu1  ;;  %v392_v54 = vmul.f32 %v594_v35, %v594_v35  ;;  %v400_v14 = vmul.f32 %v602_v37, %v602_v37 }
  0xf7   :  { %v365_v40 = vadd.f32 %v364_v36, %v234_v38  ;;  %v390_v41 = vmul.f32 %v234_v38, %v234_v38  ;;  %v404_v42 = vadd.f32 %v403_v34, %v389_v33  ;;  %v595_v43 = vpop.f32.mrb[6].mxu0  ;;  %v603_v44 = vpop.f32.mrb[6].mxu1  ;;  %v398_v8 = vmul.f32 %v266_v39, %v266_v39  ;;  %v385_v33 = vld [vmem:[%s743_s3 + $0x1] sm:$0x1] }
  0xf8   :  { %v533_v45 = vpack.c.bf16 %v595_v43, %v594_v35  ;;  %v237_v46 = vpop.f32.mrb[7].mxu0  ;;  %v553_v47 = vpack.c.bf16 %v603_v44, %v602_v37  ;;  %v269_v48 = vpop.f32.mrb[7].mxu1  ;;  %v393_v57 = vmul.f32 %v595_v43, %v595_v43 }
  0xf9   :  { %v405_v49 = vadd.f32 %v404_v42, %v390_v41  ;;  %v528_v50 = vpack.c.bf16 %v237_v46, %v234_v38  ;;  %v366_v51 = vadd.f32 %v365_v40, %v237_v46  ;;  %v391_v52 = vmul.f32 %v237_v46, %v237_v46 }
  0xfa   :  { %557 = vst [vmem:[%s744_s2 + $0x18] sm:$0xff] %v533_v45   ;;  %561 = vst [vmem:[%s744_s2 + $0x38] sm:$0xff] %v553_v47   ;;  %v548_v53 = vpack.c.bf16 %v269_v48, %v266_v39  ;;  %v399_v13 = vmul.f32 %v269_v48, %v269_v48 }
  0xfb   :  { %556 = vst [vmem:[%s744_s2 + $0x10] sm:$0xff] %v528_v50   ;;  %v367_v55 = vadd.f32 %v594_v35, %v366_v51  ;;  %v406_v56 = vadd.f32 %v405_v49, %v391_v52 }
  0xfc   :  { %560 = vst [vmem:[%s744_s2 + $0x30] sm:$0xff] %v548_v53  }
  0xfd   :  { %v407_v58 = vadd.f32 %v406_v56, %v392_v54  ;;  %v368_v59 = vadd.f32 %v595_v43, %v367_v55 }
  0xff   :  { %v369_v61 = vadd.f32 %v368_v59, %v250_v18  ;;  %v408_v62 = vadd.f32 %v407_v58, %v393_v57  ;;  %v401_v18 = vmul.f32 %v603_v44, %v603_v44 }
 0x101   :  { %v409_v63 = vadd.f32 %v408_v62, %v394_v60  ;;  %v370_v0 = vadd.f32 %v369_v61, %v253_v25 }
 0x103   :  { %v371_v3 = vadd.f32 %v598_v16, %v370_v0  ;;  %v410_v4 = vadd.f32 %v409_v63, %v395_v1 }
 0x105   :  { %v411_v6 = vadd.f32 %v410_v4, %v396_v2  ;;  %v372_v7 = vadd.f32 %v599_v20, %v371_v3 }
 0x107   :  { %v373_v9 = vadd.f32 %v372_v7, %v266_v39  ;;  %v412_v10 = vadd.f32 %v411_v6, %v397_v5 }
 0x109   :  { %v413_v11 = vadd.f32 %v412_v10, %v398_v8  ;;  %v374_v12 = vadd.f32 %v373_v9, %v269_v48 }
 0x10b   :  { %v375_v15 = vadd.f32 %v602_v37, %v374_v12  ;;  %v414_v17 = vadd.f32 %v413_v11, %v399_v13 }
 0x10d   :  { %v376_v19 = vadd.f32 %v603_v44, %v375_v15  ;;  %v415_v21 = vadd.f32 %v414_v17, %v400_v14 }
 0x10f   :  { %v377_v22 = vrot.slane %v376_v19, 4  ;;  %v416_v23 = vadd.f32 %v415_v21, %v401_v18 }
 0x111   :  { %v378_v24 = vadd.f32 %v377_v22, %v376_v19  ;;  %v417_v16 = vrot.slane %v416_v23, 4 }
 0x113   :  { %v379_v25 = vrot.slane %v378_v24, 2  ;;  %v418_v26 = vadd.f32 %v417_v16, %v416_v23 }
 0x115   :  { %v380_v27 = vadd.f32 %v379_v25, %v378_v24  ;;  %v419_v20 = vrot.slane %v418_v26, 2 }
 0x117   :  { %v381_v28 = vrot.slane %v380_v27, 1  ;;  %v420_v29 = vadd.f32 %v419_v20, %v418_v26 }
 0x119   :  { %v382_v31 = vadd.f32 %v381_v28, %v380_v27  ;;  %v421_v32 = vrot.slane %v420_v29, 1 }
 0x11b   :  { %v383_v34 = vadd.f32 %v382_v31, %v361_v30  ;;  %v422_v35 = vadd.f32 %v421_v32, %v420_v29 }
 0x11d   :  { %384 = vst [vmem:[%s743_s3] sm:$0x1] %v383_v34  ;;  %v423_v36 = vadd.f32 %v422_v35, %v385_v33 }
 0x11f   :  { %424 = vst [vmem:[%s743_s3 + $0x1] sm:$0x1] %v423_v36 }

// kernel: run.38
= control target key start
LH: loop header
LB: loop body
LE: loop exit
PB: predicated region body
PF: predicated region fallthrough
CT: control target
= control target key end

     0   :  { %v685_v0 = vmov 0   ;;  %vm218_vm0 = vcmask 130048   ;;  %v686_v26 = vmov 0.0   ;;  %s841_s1 = inlined_call_operand.vmem [shape: bf16[144,128], index: 1, kind: input, shape index: {}]   ;;  %s842_s0 = inlined_call_operand.vmem [shape: bf16[128,144], index: 0, kind: input, shape index: {}]   ;;  %s843_s3 = inlined_call_operand.vmem [shape: f32[8,128], index: 3, kind: output, shape index: {1}]   ;;  %s844_s2 = inlined_call_operand.vmem [shape: bf16[128,128], index: 2, kind: output, shape index: {0}]  }
   0x1   :  { %243 = vmatprep.subr.bf16.mxu0 %v685_v0  ;;  %v652_v1 = vld [vmem:[%s841_s1] sm:$0xff]   ;;  %632 = vmatprep.subr.bf16.mxu1 %v685_v0  ;;  %v653_v2 = vld [vmem:[%s841_s1 + $0x8] sm:$0xff]   ;;  %v654_v3 = vld [vmem:[%s841_s1 + $0x10] sm:$0xff]   ;;  %57 = vst [vmem:[%s843_s3] sm:$0xff] %v686_v26 }
   0x2   :  { %244 = vmatpush1.bf16.msra.mxu0 %v652_v1  ;;  %641 = vmatpush1.bf16.msra.mxu1 %v652_v1  ;;  %v655_v4 = vld [vmem:[%s841_s1 + $0x18] sm:$0xff]   ;;  %v663_v5 = vld [vmem:[%s842_s0 + $0x4] ss:$8 sps:$4 sm:$0xff]   ;;  %v658_v9 = vld [vmem:[%s841_s1 + $0x30] sm:$0xff]  }
   0x3   :  { %245 = vmatprep.subr.bf16.mxu0 %v685_v0  ;;  %633 = vmatprep.subr.bf16.mxu1 %v685_v0  ;;  %v669_v6 = vld [vmem:[%s842_s0 + $0x44] ss:$8 sps:$4 sm:$0xff]   ;;  %v659_v10 = vld [vmem:[%s841_s1 + $0x38] sm:$0xff]   ;;  %v661_v12 = vld [vmem:[%s842_s0] ss:$8 sps:$4 sm:$0xff]  }
   0x4   :  { %545 = vmatprep.mubr.msk.bf16.mxu0 %vm218_vm0, %v663_v5  ;;  %v656_v7 = vld [vmem:[%s841_s1 + $0x20] sm:$0xff]   ;;  %549 = vmatprep.mubr.msk.bf16.mxu1 %vm218_vm0, %v669_v6  ;;  %v657_v8 = vld [vmem:[%s841_s1 + $0x28] sm:$0xff]   ;;  %v664_v14 = vld [vmem:[%s842_s0 + $0x14] ss:$8 sps:$4 sm:$0xff]  }
   0x5   :  { %v660_v11 = vld [vmem:[%s841_s1 + $0x40] sm:$0xff]   ;;  %v673_v15 = vld [vmem:[%s842_s0 + $0x54] ss:$8 sps:$4 sm:$0xff]   ;;  %v666_v16 = vld [vmem:[%s842_s0 + $0x10] ss:$8 sps:$4 sm:$0xff]  }
   0x6   :  { %246 = vmatpush1.bf16.msra.mxu0 %v653_v2  ;;  %642 = vmatpush1.bf16.msra.mxu1 %v653_v2  ;;  %v667_v13 = vld [vmem:[%s842_s0 + $0x40] ss:$8 sps:$4 sm:$0xff]   ;;  %v675_v17 = vld [vmem:[%s842_s0 + $0x50] ss:$8 sps:$4 sm:$0xff]   ;;  %v670_v18 = vld [vmem:[%s842_s0 + $0x24] ss:$8 sps:$4 sm:$0xff]  }
   0x7   :  { %247 = vmatprep.subr.bf16.mxu0 %v685_v0  ;;  %634 = vmatprep.subr.bf16.mxu1 %v685_v0  ;;  %v679_v19 = vld [vmem:[%s842_s0 + $0x64] ss:$8 sps:$4 sm:$0xff]   ;;  %v672_v20 = vld [vmem:[%s842_s0 + $0x20] ss:$8 sps:$4 sm:$0xff]   ;;  %v676_v22 = vld [vmem:[%s842_s0 + $0x34] ss:$8 sps:$4 sm:$0xff]  }
   0x8   :  { %v681_v21 = vld [vmem:[%s842_s0 + $0x60] ss:$8 sps:$4 sm:$0xff]   ;;  %v682_v23 = vld [vmem:[%s842_s0 + $0x74] ss:$8 sps:$4 sm:$0xff]   ;;  %v678_v24 = vld [vmem:[%s842_s0 + $0x30] ss:$8 sps:$4 sm:$0xff]  }
   0x9   :  { %v684_v25 = vld [vmem:[%s842_s0 + $0x70] ss:$8 sps:$4 sm:$0xff]  }
   0xa   :  { %248 = vmatpush1.bf16.msra.mxu0 %v654_v3  ;;  %643 = vmatpush1.bf16.msra.mxu1 %v654_v3 }
   0xb   :  { %249 = vmatprep.subr.bf16.mxu0 %v685_v0  ;;  %635 = vmatprep.subr.bf16.mxu1 %v685_v0 }
   0xe   :  { %250 = vmatpush1.bf16.msra.mxu0 %v655_v4  ;;  %644 = vmatpush1.bf16.msra.mxu1 %v655_v4 }
   0xf   :  { %251 = vmatprep.subr.bf16.mxu0 %v685_v0  ;;  %636 = vmatprep.subr.bf16.mxu1 %v685_v0 }
  0x12   :  { %252 = vmatpush1.bf16.msra.mxu0 %v656_v7  ;;  %645 = vmatpush1.bf16.msra.mxu1 %v656_v7 }
  0x13   :  { %253 = vmatprep.subr.bf16.mxu0 %v685_v0  ;;  %637 = vmatprep.subr.bf16.mxu1 %v685_v0 }
  0x16   :  { %254 = vmatpush1.bf16.msra.mxu0 %v657_v8  ;;  %646 = vmatpush1.bf16.msra.mxu1 %v657_v8 }
  0x17   :  { %255 = vmatprep.subr.bf16.mxu0 %v685_v0  ;;  %638 = vmatprep.subr.bf16.mxu1 %v685_v0 }
  0x1a   :  { %256 = vmatpush1.bf16.msra.mxu0 %v658_v9  ;;  %647 = vmatpush1.bf16.msra.mxu1 %v658_v9 }
  0x1b   :  { %257 = vmatprep.subr.bf16.mxu0 %v685_v0  ;;  %639 = vmatprep.subr.bf16.mxu1 %v685_v0 }
  0x1e   :  { %258 = vmatpush1.bf16.msra.mxu0 %v659_v10  ;;  %648 = vmatpush1.bf16.msra.mxu1 %v659_v10 }
  0x1f   :  { %259 = vmatprep.subr.bf16.mxu0 %v685_v0  ;;  %640 = vmatprep.subr.bf16.mxu1 %v685_v0 }
  0x22   :  { %260 = vmatpush1.bf16.msra.mxu0 %v660_v11  ;;  %649 = vmatpush1.bf16.msra.mxu1 %v660_v11 }
  0x25   :  { %276 = vmatmul.mubr.bf16.vlgmr.msra.gmra.mrb[0].mxu0 %v661_v12  ;;  %308 = vmatmul.mubr.bf16.vlgmr.msra.gmra.mrb[0].mxu1 %v667_v13 }
  0x26   :  { %546 = vmatprep.mubr.msk.bf16.mxu0 %vm218_vm0, %v664_v14  ;;  %550 = vmatprep.mubr.msk.bf16.mxu1 %vm218_vm0, %v673_v15 }
  0x2d   :  { %284 = vmatmul.mubr.bf16.gmra.mrb[4].mxu0 %v666_v16  ;;  %316 = vmatmul.mubr.bf16.gmra.mrb[4].mxu1 %v675_v17 }
  0x2e   :  { %547 = vmatprep.mubr.msk.bf16.mxu0 %vm218_vm0, %v670_v18  ;;  %551 = vmatprep.mubr.msk.bf16.mxu1 %vm218_vm0, %v679_v19 }
  0x35   :  { %292 = vmatmul.mubr.bf16.gmra.mrb[8].mxu0 %v672_v20  ;;  %324 = vmatmul.mubr.bf16.gmra.mrb[8].mxu1 %v681_v21 }
  0x36   :  { %548 = vmatprep.mubr.msk.bf16.mxu0 %vm218_vm0, %v676_v22  ;;  %552 = vmatprep.mubr.msk.bf16.mxu1 %vm218_vm0, %v682_v23 }
  0x3d   :  { %300 = vmatmul.mubr.bf16.gmra.mrb[12].mxu0 %v678_v24  ;;  %332 = vmatmul.mubr.bf16.gmra.mrb[12].mxu1 %v684_v25 }
  0xf8   :  { %v277_v27 = vpop.f32.mrb[0].mxu0  ;;  %v793_v28 = vpop.f32.mrb[0].mxu1 }
  0xf9   :  { %v279_v29 = vpop.f32.mrb[1].mxu0  ;;  %v311_v30 = vpop.f32.mrb[1].mxu1  ;;  %v445_v31 = vmul.f32 %v277_v27, %v277_v27  ;;  %v453_v24 = vmul.f32 %v793_v28, %v793_v28 }
  0xfa   :  { %v280_v32 = vpop.f32.mrb[2].mxu0  ;;  %v795_v33 = vpop.f32.mrb[2].mxu1 }
  0xfb   :  { %v588_v34 = vpack.c.bf16 %v280_v32, %v277_v27  ;;  %v421_v35 = vadd.f32 %v280_v32, %v277_v27  ;;  %v446_v36 = vmul.f32 %v280_v32, %v280_v32  ;;  %v282_v37 = vpop.f32.mrb[3].mxu0  ;;  %v608_v38 = vpack.c.bf16 %v795_v33, %v793_v28  ;;  %v314_v39 = vpop.f32.mrb[3].mxu1 }
  0xfc   :  { %v454_v27 = vmul.f32 %v795_v33, %v795_v33 }
  0xfd   :  { %589 = vst [vmem:[%s844_s2] sm:$0xff] %v588_v34   ;;  %v461_v40 = vadd.f32 %v446_v36, %v445_v31  ;;  %628 = vst [vmem:[%s844_s2 + $0x20] sm:$0xff] %v608_v38  }
 0x100   :  { %v285_v41 = vpop.f32.mrb[4].mxu0  ;;  %v317_v42 = vpop.f32.mrb[4].mxu1 }
 0x101   :  { %v422_v43 = vadd.f32 %v421_v35, %v285_v41  ;;  %v447_v44 = vmul.f32 %v285_v41, %v285_v41  ;;  %v287_v45 = vpop.f32.mrb[5].mxu0  ;;  %v319_v46 = vpop.f32.mrb[5].mxu1  ;;  %v455_v31 = vmul.f32 %v317_v42, %v317_v42 }
 0x102   :  { %v288_v47 = vpop.f32.mrb[6].mxu0  ;;  %v320_v48 = vpop.f32.mrb[6].mxu1 }
 0x103   :  { %v462_v49 = vadd.f32 %v461_v40, %v447_v44  ;;  %v593_v50 = vpack.c.bf16 %v288_v47, %v285_v41  ;;  %v423_v51 = vadd.f32 %v422_v43, %v288_v47  ;;  %v448_v52 = vmul.f32 %v288_v47, %v288_v47  ;;  %v290_v53 = vpop.f32.mrb[7].mxu0  ;;  %v322_v54 = vpop.f32.mrb[7].mxu1 }
 0x104   :  { %v613_v55 = vpack.c.bf16 %v320_v48, %v317_v42  ;;  %v456_v35 = vmul.f32 %v320_v48, %v320_v48 }
 0x105   :  { %625 = vst [vmem:[%s844_s2 + $0x8] sm:$0xff] %v593_v50   ;;  %v463_v56 = vadd.f32 %v462_v49, %v448_v52 }
 0x106   :  { %629 = vst [vmem:[%s844_s2 + $0x28] sm:$0xff] %v613_v55  }
 0x108   :  { %v293_v57 = vpop.f32.mrb[8].mxu0  ;;  %v325_v58 = vpop.f32.mrb[8].mxu1 }
 0x109   :  { %v424_v59 = vadd.f32 %v423_v51, %v293_v57  ;;  %v449_v60 = vmul.f32 %v293_v57, %v293_v57  ;;  %v295_v61 = vpop.f32.mrb[9].mxu0  ;;  %v327_v62 = vpop.f32.mrb[9].mxu1  ;;  %v457_v39 = vmul.f32 %v325_v58, %v325_v58 }
 0x10a   :  { %v296_v63 = vpop.f32.mrb[10].mxu0  ;;  %v328_v0 = vpop.f32.mrb[10].mxu1  ;;  %v444_v61 = vld [vmem:[%s843_s3 + $0x1] sm:$0x1] }
 0x10b   :  { %v464_v1 = vadd.f32 %v463_v56, %v449_v60  ;;  %v598_v2 = vpack.c.bf16 %v296_v63, %v293_v57  ;;  %v425_v3 = vadd.f32 %v424_v59, %v296_v63  ;;  %v450_v4 = vmul.f32 %v296_v63, %v296_v63  ;;  %v298_v5 = vpop.f32.mrb[11].mxu0  ;;  %v330_v6 = vpop.f32.mrb[11].mxu1 }
 0x10c   :  { %v618_v7 = vpack.c.bf16 %v328_v0, %v325_v58  ;;  %v458_v43 = vmul.f32 %v328_v0, %v328_v0 }
 0x10d   :  { %626 = vst [vmem:[%s844_s2 + $0x10] sm:$0xff] %v598_v2   ;;  %v465_v8 = vadd.f32 %v464_v1, %v450_v4 }
 0x10e   :  { %630 = vst [vmem:[%s844_s2 + $0x30] sm:$0xff] %v618_v7  }
 0x110   :  { %v301_v9 = vpop.f32.mrb[12].mxu0  ;;  %v333_v10 = vpop.f32.mrb[12].mxu1 }
 0x111   :  { %v426_v11 = vadd.f32 %v425_v3, %v301_v9  ;;  %v451_v12 = vmul.f32 %v301_v9, %v301_v9  ;;  %v303_v13 = vpop.f32.mrb[13].mxu0  ;;  %v335_v14 = vpop.f32.mrb[13].mxu1  ;;  %v459_v44 = vmul.f32 %v333_v10, %v333_v10 }
 0x112   :  { %v304_v15 = vpop.f32.mrb[14].mxu0  ;;  %v336_v16 = vpop.f32.mrb[14].mxu1 }
 0x113   :  { %v466_v17 = vadd.f32 %v465_v8, %v451_v12  ;;  %v603_v18 = vpack.c.bf16 %v304_v15, %v301_v9  ;;  %v427_v19 = vadd.f32 %v426_v11, %v304_v15  ;;  %v452_v20 = vmul.f32 %v304_v15, %v304_v15  ;;  %v306_v21 = vpop.f32.mrb[15].mxu0  ;;  %v338_v22 = vpop.f32.mrb[15].mxu1 }
 0x114   :  { %v623_v23 = vpack.c.bf16 %v336_v16, %v333_v10  ;;  %v460_v50 = vmul.f32 %v336_v16, %v336_v16 }
 0x115   :  { %627 = vst [vmem:[%s844_s2 + $0x18] sm:$0xff] %v603_v18   ;;  %v428_v25 = vadd.f32 %v427_v19, %v793_v28  ;;  %v467_v26 = vadd.f32 %v466_v17, %v452_v20 }
 0x116   :  { %631 = vst [vmem:[%s844_s2 + $0x38] sm:$0xff] %v623_v23  }
 0x117   :  { %v429_v29 = vadd.f32 %v428_v25, %v795_v33  ;;  %v468_v30 = vadd.f32 %v467_v26, %v453_v24 }
 0x119   :  { %v469_v32 = vadd.f32 %v468_v30, %v454_v27  ;;  %v430_v34 = vadd.f32 %v429_v29, %v317_v42 }
 0x11b   :  { %v431_v36 = vadd.f32 %v430_v34, %v320_v48  ;;  %v470_v37 = vadd.f32 %v469_v32, %v455_v31 }
 0x11d   :  { %v432_v38 = vadd.f32 %v431_v36, %v325_v58  ;;  %v471_v28 = vadd.f32 %v470_v37, %v456_v35  ;;  %v420_v58 = vld [vmem:[%s843_s3] sm:$0x1] }
 0x11f   :  { %v472_v40 = vadd.f32 %v471_v28, %v457_v39  ;;  %v433_v41 = vadd.f32 %v432_v38, %v328_v0 }
 0x121   :  { %v473_v45 = vadd.f32 %v472_v40, %v458_v43  ;;  %v434_v46 = vadd.f32 %v433_v41, %v333_v10 }
 0x123   :  { %v474_v47 = vadd.f32 %v473_v45, %v459_v44  ;;  %v435_v49 = vadd.f32 %v434_v46, %v336_v16 }
 0x125   :  { %v436_v33 = vrot.slane %v435_v49, 4  ;;  %v475_v51 = vadd.f32 %v474_v47, %v460_v50 }
 0x127   :  { %v437_v52 = vadd.f32 %v436_v33, %v435_v49  ;;  %v476_v53 = vrot.slane %v475_v51, 4 }
 0x129   :  { %v438_v42 = vrot.slane %v437_v52, 2  ;;  %v477_v54 = vadd.f32 %v476_v53, %v475_v51 }
 0x12b   :  { %v439_v48 = vadd.f32 %v438_v42, %v437_v52  ;;  %v478_v55 = vrot.slane %v477_v54, 2 }
 0x12d   :  { %v440_v56 = vrot.slane %v439_v48, 1  ;;  %v479_v57 = vadd.f32 %v478_v55, %v477_v54 }
 0x12f   :  { %v441_v59 = vadd.f32 %v440_v56, %v439_v48  ;;  %v480_v60 = vrot.slane %v479_v57, 1 }
 0x131   :  { %v442_v62 = vadd.f32 %v441_v59, %v420_v58  ;;  %v481_v63 = vadd.f32 %v480_v60, %v479_v57 }
 0x133   :  { %443 = vst [vmem:[%s843_s3] sm:$0x1] %v442_v62  ;;  %v482_v0 = vadd.f32 %v481_v63, %v444_v61 }
 0x135   :  { %483 = vst [vmem:[%s843_s3 + $0x1] sm:$0x1] %v482_v0 }

// kernel: run.42
= control target key start
LH: loop header
LB: loop body
LE: loop exit
PB: predicated region body
PF: predicated region fallthrough
CT: control target
= control target key end

     0   :  { %vm135_vm0 = vcmask 392192   ;;  %v586_v11 = vmov 0.0   ;;  %s687_s1 = inlined_call_operand.vmem [shape: bf16[48,128], index: 1, kind: input, shape index: {}]   ;;  %s688_s0 = inlined_call_operand.vmem [shape: bf16[128,48], index: 0, kind: input, shape index: {}]   ;;  %s689_s3 = inlined_call_operand.vmem [shape: f32[8,128], index: 3, kind: output, shape index: {1}]   ;;  %s690_s2 = inlined_call_operand.vmem [shape: bf16[128,128], index: 2, kind: output, shape index: {0}]  }
   0x1   :  { %v575_v0 = vld [vmem:[%s687_s1] sm:$0xff]   ;;  %v576_v1 = vld [vmem:[%s687_s1 + $0x8] sm:$0xff]   ;;  %v577_v3 = vld [vmem:[%s687_s1 + $0x10] sm:$0xff]   ;;  %54 = vst [vmem:[%s689_s3] sm:$0xff] %v586_v11 }
   0x2   :  { %546 = vmatprep.subr.bf16.mxu0 %v575_v0  ;;  %568 = vmatprep.subr.bf16.mxu1 %v575_v0  ;;  %v578_v2 = vld [vmem:[%s688_s0] sm:$0xff]   ;;  %v579_v5 = vld [vmem:[%s688_s0 + $0x8] sm:$0xff]   ;;  %v580_v7 = vld [vmem:[%s688_s0 + $0x10] sm:$0xff]  }
   0x3   :  { %547 = vmatpush3.bf16.msra.mxu0 %v575_v0  ;;  %571 = vmatpush3.bf16.msra.mxu1 %v575_v0  ;;  %v582_v4 = vld [vmem:[%s688_s0 + $0x20] sm:$0xff]   ;;  %v583_v6 = vld [vmem:[%s688_s0 + $0x28] sm:$0xff]   ;;  %v584_v8 = vld [vmem:[%s688_s0 + $0x30] sm:$0xff]  }
   0x4   :  { %548 = vmatprep.subr.bf16.mxu0 %v576_v1  ;;  %569 = vmatprep.subr.bf16.mxu1 %v576_v1  ;;  %v581_v9 = vld [vmem:[%s688_s0 + $0x18] sm:$0xff]  }
   0x5   :  { %552 = vmatprep.mubr.msk.bf16.mxu0 %vm135_vm0, %v578_v2  ;;  %560 = vmatprep.mubr.msk.bf16.mxu1 %vm135_vm0, %v582_v4  ;;  %v585_v10 = vld [vmem:[%s688_s0 + $0x38] sm:$0xff]  }
   0x7   :  { %549 = vmatpush3.bf16.msra.mxu0 %v576_v1  ;;  %572 = vmatpush3.bf16.msra.mxu1 %v576_v1 }
   0x8   :  { %550 = vmatprep.subr.bf16.mxu0 %v577_v3  ;;  %570 = vmatprep.subr.bf16.mxu1 %v577_v3 }
   0xb   :  { %551 = vmatpush3.bf16.msra.mxu0 %v577_v3  ;;  %573 = vmatpush3.bf16.msra.mxu1 %v577_v3 }
   0xe   :  { %553 = vmatmul.mubr.msk.bf16.vlgmr.msra.gmra.mrb[0].mxu0 %vm135_vm0, %v579_v5  ;;  %561 = vmatmul.mubr.msk.bf16.vlgmr.msra.gmra.mrb[0].mxu1 %vm135_vm0, %v583_v6 }
   0xf   :  { %556 = vmatprep.mubr.msk.bf16.mxu0 %vm135_vm0, %v580_v7  ;;  %564 = vmatprep.mubr.msk.bf16.mxu1 %vm135_vm0, %v584_v8 }
  0x16   :  { %557 = vmatmul.mubr.msk.bf16.gmra.mrb[4].mxu0 %vm135_vm0, %v581_v9  ;;  %565 = vmatmul.mubr.msk.bf16.gmra.mrb[4].mxu1 %vm135_vm0, %v585_v10 }
  0xe1   :  { %v554_v12 = vpop.f32.mrb[0].mxu0  ;;  %v562_v13 = vpop.f32.mrb[0].mxu1 }
  0xe2   :  { %v194_v14 = vpop.f32.mrb[1].mxu0  ;;  %v226_v15 = vpop.f32.mrb[1].mxu1  ;;  %v364_v27 = vmul.f32 %v554_v12, %v554_v12  ;;  %v372_v63 = vmul.f32 %v562_v13, %v562_v13 }
  0xe3   :  { %v555_v16 = vpop.f32.mrb[2].mxu0  ;;  %v563_v17 = vpop.f32.mrb[2].mxu1  ;;  %v362_v18 = vmul.f32 %v194_v14, %v194_v14  ;;  %v370_v57 = vmul.f32 %v226_v15, %v226_v15 }
  0xe4   :  { %v496_v19 = vpack.c.bf16 %v555_v16, %v554_v12  ;;  %v197_v20 = vpop.f32.mrb[3].mxu0  ;;  %v516_v21 = vpack.c.bf16 %v563_v17, %v562_v13  ;;  %v229_v22 = vpop.f32.mrb[3].mxu1  ;;  %v365_v30 = vmul.f32 %v555_v16, %v555_v16  ;;  %v373_v2 = vmul.f32 %v563_v17, %v563_v17 }
  0xe5   :  { %v491_v23 = vpack.c.bf16 %v197_v20, %v194_v14  ;;  %v338_v24 = vadd.f32 %v197_v20, %v194_v14  ;;  %v363_v25 = vmul.f32 %v197_v20, %v197_v20  ;;  %v511_v26 = vpack.c.bf16 %v229_v22, %v226_v15 }
  0xe6   :  { %528 = vst [vmem:[%s690_s2 + $0x8] sm:$0xff] %v496_v19   ;;  %532 = vst [vmem:[%s690_s2 + $0x28] sm:$0xff] %v516_v21   ;;  %v371_v62 = vmul.f32 %v229_v22, %v229_v22 }
  0xe7   :  { %492 = vst [vmem:[%s690_s2] sm:$0xff] %v491_v23   ;;  %v339_v28 = vadd.f32 %v554_v12, %v338_v24  ;;  %v378_v29 = vadd.f32 %v363_v25, %v362_v18  ;;  %531 = vst [vmem:[%s690_s2 + $0x20] sm:$0xff] %v511_v26  }
  0xe9   :  { %v379_v31 = vadd.f32 %v378_v29, %v364_v27  ;;  %v558_v32 = vpop.f32.mrb[4].mxu0  ;;  %v340_v33 = vadd.f32 %v555_v16, %v339_v28  ;;  %v566_v34 = vpop.f32.mrb[4].mxu1  ;;  %v337_v27 = vld [vmem:[%s689_s3] sm:$0x1] }
  0xea   :  { %v210_v35 = vpop.f32.mrb[5].mxu0  ;;  %v242_v36 = vpop.f32.mrb[5].mxu1  ;;  %v368_v51 = vmul.f32 %v558_v32, %v558_v32  ;;  %v376_v11 = vmul.f32 %v566_v34, %v566_v34 }
  0xeb   :  { %v341_v37 = vadd.f32 %v340_v33, %v210_v35  ;;  %v366_v38 = vmul.f32 %v210_v35, %v210_v35  ;;  %v380_v39 = vadd.f32 %v379_v31, %v365_v30  ;;  %v559_v40 = vpop.f32.mrb[6].mxu0  ;;  %v567_v41 = vpop.f32.mrb[6].mxu1  ;;  %v374_v5 = vmul.f32 %v242_v36, %v242_v36  ;;  %v361_v30 = vld [vmem:[%s689_s3 + $0x1] sm:$0x1] }
  0xec   :  { %v506_v42 = vpack.c.bf16 %v559_v40, %v558_v32  ;;  %v213_v43 = vpop.f32.mrb[7].mxu0  ;;  %v526_v44 = vpack.c.bf16 %v567_v41, %v566_v34  ;;  %v245_v45 = vpop.f32.mrb[7].mxu1  ;;  %v369_v54 = vmul.f32 %v559_v40, %v559_v40 }
  0xed   :  { %v381_v46 = vadd.f32 %v380_v39, %v366_v38  ;;  %v501_v47 = vpack.c.bf16 %v213_v43, %v210_v35  ;;  %v342_v48 = vadd.f32 %v341_v37, %v213_v43  ;;  %v367_v49 = vmul.f32 %v213_v43, %v213_v43 }
  0xee   :  { %530 = vst [vmem:[%s690_s2 + $0x18] sm:$0xff] %v506_v42   ;;  %534 = vst [vmem:[%s690_s2 + $0x38] sm:$0xff] %v526_v44   ;;  %v521_v50 = vpack.c.bf16 %v245_v45, %v242_v36  ;;  %v375_v10 = vmul.f32 %v245_v45, %v245_v45 }
  0xef   :  { %529 = vst [vmem:[%s690_s2 + $0x10] sm:$0xff] %v501_v47   ;;  %v343_v52 = vadd.f32 %v558_v32, %v342_v48  ;;  %v382_v53 = vadd.f32 %v381_v46, %v367_v49 }
  0xf0   :  { %533 = vst [vmem:[%s690_s2 + $0x30] sm:$0xff] %v521_v50  }
  0xf1   :  { %v383_v55 = vadd.f32 %v382_v53, %v368_v51  ;;  %v344_v56 = vadd.f32 %v559_v40, %v343_v52 }
  0xf3   :  { %v345_v58 = vadd.f32 %v344_v56, %v226_v15  ;;  %v384_v59 = vadd.f32 %v383_v55, %v369_v54  ;;  %v377_v15 = vmul.f32 %v567_v41, %v567_v41 }
  0xf5   :  { %v385_v60 = vadd.f32 %v384_v59, %v370_v57  ;;  %v346_v61 = vadd.f32 %v345_v58, %v229_v22 }
  0xf7   :  { %v347_v0 = vadd.f32 %v562_v13, %v346_v61  ;;  %v386_v1 = vadd.f32 %v385_v60, %v371_v62 }
  0xf9   :  { %v387_v3 = vadd.f32 %v386_v1, %v372_v63  ;;  %v348_v4 = vadd.f32 %v563_v17, %v347_v0 }
  0xfb   :  { %v349_v6 = vadd.f32 %v348_v4, %v242_v36  ;;  %v388_v7 = vadd.f32 %v387_v3, %v373_v2 }
  0xfd   :  { %v389_v8 = vadd.f32 %v388_v7, %v374_v5  ;;  %v350_v9 = vadd.f32 %v349_v6, %v245_v45 }
  0xff   :  { %v351_v12 = vadd.f32 %v566_v34, %v350_v9  ;;  %v390_v14 = vadd.f32 %v389_v8, %v375_v10 }
 0x101   :  { %v352_v16 = vadd.f32 %v567_v41, %v351_v12  ;;  %v391_v18 = vadd.f32 %v390_v14, %v376_v11 }
 0x103   :  { %v353_v19 = vrot.slane %v352_v16, 4  ;;  %v392_v20 = vadd.f32 %v391_v18, %v377_v15 }
 0x105   :  { %v354_v21 = vadd.f32 %v353_v19, %v352_v16  ;;  %v393_v13 = vrot.slane %v392_v20, 4 }
 0x107   :  { %v355_v22 = vrot.slane %v354_v21, 2  ;;  %v394_v23 = vadd.f32 %v393_v13, %v392_v20 }
 0x109   :  { %v356_v24 = vadd.f32 %v355_v22, %v354_v21  ;;  %v395_v17 = vrot.slane %v394_v23, 2 }
 0x10b   :  { %v357_v25 = vrot.slane %v356_v24, 1  ;;  %v396_v26 = vadd.f32 %v395_v17, %v394_v23 }
 0x10d   :  { %v358_v28 = vadd.f32 %v357_v25, %v356_v24  ;;  %v397_v29 = vrot.slane %v396_v26, 1 }
 0x10f   :  { %v359_v31 = vadd.f32 %v358_v28, %v337_v27  ;;  %v398_v32 = vadd.f32 %v397_v29, %v396_v26 }
 0x111   :  { %360 = vst [vmem:[%s689_s3] sm:$0x1] %v359_v31  ;;  %v399_v33 = vadd.f32 %v398_v32, %v361_v30 }
 0x113   :  { %400 = vst [vmem:[%s689_s3 + $0x1] sm:$0x1] %v399_v33 }

// kernel: run.45
= control target key start
LH: loop header
LB: loop body
LE: loop exit
PB: predicated region body
PF: predicated region fallthrough
CT: control target
= control target key end

     0   :  { %s2501_s0 = inlined_call_operand.vmem [shape: bf16[512,128], index: 0, kind: input, shape index: {}]   ;;  %s2502_s1 = inlined_call_operand.vmem [shape: f32[1,128], index: 1, kind: input, shape index: {}]   ;;  %s2503_s2 = inlined_call_operand.vmem [shape: f32[1,128], index: 2, kind: input, shape index: {}]   ;;  %s2504_s3 = inlined_call_operand.vmem [shape: bf16[512,128], index: 3, kind: output, shape index: {}]  }
   0x1   :  { %v1251_v0 = vld [vmem:[%s2501_s0] sm:$0xff]   ;;  %v1538_v4 = vld [vmem:[%s2501_s0 + $0x8] sm:$0xff]   ;;  %v1539_v5 = vld [vmem:[%s2501_s0 + $0x10] sm:$0xff]  }
   0x2   :  { %v1884_v1 = vld [vmem:[%s2502_s1] ss:$0 sm:$0xff]  ;;  %v1252_v2 = vunpack.c.l.bf16 %v1251_v0  ;;  %v1253_v3 = vunpack.c.h.bf16 %v1251_v0  ;;  %v1540_v6 = vld [vmem:[%s2501_s0 + $0x18] sm:$0xff]   ;;  %v1256_v8 = vunpack.c.l.bf16 %v1538_v4  ;;  %v1257_v9 = vunpack.c.h.bf16 %v1538_v4  ;;  %v1542_v33 = vld [vmem:[%s2501_s0 + $0x28] sm:$0xff]  }
   0x3   :  { %v1898_v7 = vld [vmem:[%s2503_s2] ss:$0 sm:$0xff]  ;;  %v1260_v10 = vunpack.c.l.bf16 %v1539_v5  ;;  %v1261_v11 = vunpack.c.h.bf16 %v1539_v5  ;;  %v1264_v14 = vunpack.c.l.bf16 %v1540_v6  ;;  %v1265_v15 = vunpack.c.h.bf16 %v1540_v6  ;;  %v1543_v34 = vld [vmem:[%s2501_s0 + $0x30] sm:$0xff]   ;;  %v1544_v54 = vld [vmem:[%s2501_s0 + $0x38] sm:$0xff]  }
   0x4   :  { %v149_v12 = vmul.f32 %v1252_v2, %v1884_v1  ;;  %v150_v13 = vmul.f32 %v1253_v3, %v1884_v1  ;;  %v151_v16 = vmul.f32 %v1256_v8, %v1884_v1  ;;  %v152_v17 = vmul.f32 %v1257_v9, %v1884_v1  ;;  %v1541_v24 = vld [vmem:[%s2501_s0 + $0x20] sm:$0xff]   ;;  %v1546_v2 = vld [vmem:[%s2501_s0 + $0x48] sm:$0xff]  }
   0x5   :  { %v153_v18 = vmul.f32 %v1260_v10, %v1884_v1  ;;  %v154_v19 = vmul.f32 %v1261_v11, %v1884_v1  ;;  %v155_v22 = vmul.f32 %v1264_v14, %v1884_v1  ;;  %v156_v23 = vmul.f32 %v1265_v15, %v1884_v1  ;;  %v1545_v61 = vld [vmem:[%s2501_s0 + $0x40] sm:$0xff]  }
   0x6   :  { %v1907_v20 = vadd.f32 %v1898_v7, %v149_v12  ;;  %v1910_v21 = vadd.f32 %v1898_v7, %v150_v13  ;;  %v1918_v25 = vadd.f32 %v1898_v7, %v151_v16  ;;  %v1921_v26 = vadd.f32 %v1898_v7, %v152_v17 }
   0x7   :  { %v1924_v27 = vadd.f32 %v1898_v7, %v153_v18  ;;  %v1927_v28 = vadd.f32 %v1898_v7, %v154_v19  ;;  %v1932_v31 = vadd.f32 %v1898_v7, %v155_v22  ;;  %v1935_v32 = vadd.f32 %v1898_v7, %v156_v23 }
   0x8   :  { %v1058_v29 = vmul.f32 -1.442695, %v1907_v20  ;;  %v1059_v30 = vmul.f32 -1.442695, %v1910_v21  ;;  %v1060_v35 = vmul.f32 -1.442695, %v1918_v25  ;;  %v1268_v38 = vunpack.c.l.bf16 %v1541_v24 }
   0x9   :  { %v1061_v36 = vmul.f32 -1.442695, %v1921_v26  ;;  %v1062_v37 = vmul.f32 -1.442695, %v1924_v27  ;;  %v1063_v39 = vmul.f32 -1.442695, %v1927_v28  ;;  %v1269_v42 = vunpack.c.h.bf16 %v1541_v24 }
   0xa   :  { %1600 = vpow2.f32 %v1058_v29  ;;  %v1064_v40 = vmul.f32 -1.442695, %v1932_v31  ;;  %v1065_v41 = vmul.f32 -1.442695, %v1935_v32  ;;  %v157_v43 = vmul.f32 %v1268_v38, %v1884_v1 }
   0xb   :  { %1602 = vpow2.f32 %v1059_v30  ;;  %v1272_v44 = vunpack.c.l.bf16 %v1542_v33  ;;  %v1273_v45 = vunpack.c.h.bf16 %v1542_v33  ;;  %v1276_v46 = vunpack.c.l.bf16 %v1543_v34 }
   0xc   :  { %1604 = vpow2.f32 %v1060_v35  ;;  %v1277_v47 = vunpack.c.h.bf16 %v1543_v34  ;;  %v158_v48 = vmul.f32 %v1269_v42, %v1884_v1  ;;  %v1952_v49 = vadd.f32 %v1898_v7, %v157_v43  ;;  %v1547_v42 = vld [vmem:[%s2501_s0 + $0x50] sm:$0xff]  }
   0xd   :  { %1606 = vpow2.f32 %v1061_v36  ;;  %v159_v50 = vmul.f32 %v1272_v44, %v1884_v1  ;;  %v160_v51 = vmul.f32 %v1273_v45, %v1884_v1  ;;  %v161_v52 = vmul.f32 %v1276_v46, %v1884_v1 }
   0xe   :  { %1608 = vpow2.f32 %v1062_v37  ;;  %v162_v53 = vmul.f32 %v1277_v47, %v1884_v1  ;;  %v1962_v55 = vadd.f32 %v1898_v7, %v158_v48  ;;  %v1066_v56 = vmul.f32 -1.442695, %v1952_v49 }
   0xf   :  { %1610 = vpow2.f32 %v1063_v39  ;;  %v1966_v57 = vadd.f32 %v1898_v7, %v159_v50  ;;  %v1969_v58 = vadd.f32 %v1898_v7, %v160_v51  ;;  %v1972_v59 = vadd.f32 %v1898_v7, %v161_v52 }
  0x10   :  { %1612 = vpow2.f32 %v1064_v40  ;;  %v1975_v60 = vadd.f32 %v1898_v7, %v162_v53  ;;  %v1067_v62 = vmul.f32 -1.442695, %v1962_v55  ;;  %v1280_v0 = vunpack.c.l.bf16 %v1544_v54 }
  0x11   :  { %1614 = vpow2.f32 %v1065_v41  ;;  %v1068_v63 = vmul.f32 -1.442695, %v1966_v57  ;;  %v1069_v3 = vmul.f32 -1.442695, %v1969_v58  ;;  %v1070_v4 = vmul.f32 -1.442695, %v1972_v59 }
  0x12   :  { %1616 = vpow2.f32 %v1066_v56  ;;  %v1988_v5 = vmul.f32 -1.442695, %v1975_v60  ;;  %v1281_v6 = vunpack.c.h.bf16 %v1544_v54  ;;  %v163_v8 = vmul.f32 %v1280_v0, %v1884_v1 }
  0x13   :  { %1618 = vpow2.f32 %v1067_v62  ;;  %v1284_v9 = vunpack.c.l.bf16 %v1545_v61  ;;  %v1285_v11 = vunpack.c.h.bf16 %v1545_v61  ;;  %v1288_v12 = vunpack.c.l.bf16 %v1546_v2  ;;  %v1548_v61 = vld [vmem:[%s2501_s0 + $0x58] sm:$0xff]  }
  0x14   :  { %v1601_v10 = vpop.eup %1600  ;;  %1620 = vpow2.f32 %v1068_v63  ;;  %v1289_v13 = vunpack.c.h.bf16 %v1546_v2  ;;  %v164_v16 = vmul.f32 %v1281_v6, %v1884_v1  ;;  %v1993_v17 = vadd.f32 %v1898_v7, %v163_v8 }
  0x15   :  { %v1603_v14 = vpop.eup %1602  ;;  %v476_v15 = vadd.f32 1.0, %v1601_v10  ;;  %1622 = vpow2.f32 %v1069_v3  ;;  %v165_v22 = vmul.f32 %v1284_v9, %v1884_v1  ;;  %v166_v23 = vmul.f32 %v1285_v11, %v1884_v1 }
  0x16   :  { %v1605_v18 = vpop.eup %1604  ;;  %v477_v19 = vadd.f32 1.0, %v1603_v14  ;;  %1624 = vpow2.f32 %v1070_v4  ;;  %v1998_v30 = vadd.f32 %v1898_v7, %v164_v16  ;;  %v2001_v33 = vmul.f32 -1.442695, %v1993_v17 }
  0x17   :  { %v1607_v24 = vpop.eup %1606  ;;  %1626 = vrcp.f32 %v476_v15  ;;  %v478_v29 = vadd.f32 1.0, %v1605_v18  ;;  %v2004_v36 = vadd.f32 %v1898_v7, %v165_v22  ;;  %v2007_v37 = vadd.f32 %v1898_v7, %v166_v23 }
  0x18   :  { %v1609_v34 = vpop.eup %1608  ;;  %1628 = vrcp.f32 %v477_v19  ;;  %v479_v35 = vadd.f32 1.0, %v1607_v24  ;;  %v2010_v40 = vmul.f32 -1.442695, %v1998_v30  ;;  %v167_v41 = vmul.f32 %v1288_v12, %v1884_v1  ;;  %v1549_v24 = vld [vmem:[%s2501_s0 + $0x60] sm:$0xff]  }
  0x19   :  { %v1611_v38 = vpop.eup %1610  ;;  %1630 = vrcp.f32 %v478_v29  ;;  %v480_v39 = vadd.f32 1.0, %v1609_v34  ;;  %v2017_v45 = vmul.f32 -1.442695, %v2004_v36  ;;  %v2020_v46 = vmul.f32 -1.442695, %v2007_v37 }
  0x1a   :  { %v1613_v43 = vpop.eup %1612  ;;  %1632 = vrcp.f32 %v479_v35  ;;  %v481_v44 = vadd.f32 1.0, %v1611_v38  ;;  %v168_v50 = vmul.f32 %v1289_v13, %v1884_v1  ;;  %v2024_v51 = vadd.f32 %v1898_v7, %v167_v41 }
  0x1b   :  { %v1615_v47 = vpop.eup %1614  ;;  %1634 = vrcp.f32 %v480_v39  ;;  %v482_v48 = vadd.f32 1.0, %v1613_v43  ;;  %v1292_v54 = vunpack.c.l.bf16 %v1547_v42  ;;  %v1293_v56 = vunpack.c.h.bf16 %v1547_v42 }
  0x1c   :  { %v1617_v52 = vpop.eup %1616  ;;  %1636 = vrcp.f32 %v481_v44  ;;  %v483_v53 = vadd.f32 1.0, %v1615_v47  ;;  %v2030_v0 = vadd.f32 %v1898_v7, %v168_v50  ;;  %v2033_v2 = vmul.f32 -1.442695, %v2024_v51 }
  0x1d   :  { %v1619_v62 = vpop.eup %1618  ;;  %1638 = vrcp.f32 %v482_v48  ;;  %v484_v63 = vadd.f32 1.0, %v1617_v52  ;;  %v169_v6 = vmul.f32 %v1292_v54, %v1884_v1  ;;  %v170_v8 = vmul.f32 %v1293_v56, %v1884_v1 }
  0x1e   :  { %v1621_v3 = vpop.eup %1620  ;;  %1640 = vrcp.f32 %v483_v53  ;;  %v485_v4 = vadd.f32 1.0, %v1619_v62  ;;  %v1077_v11 = vmul.f32 -1.442695, %v2030_v0  ;;  %v1296_v12 = vunpack.c.l.bf16 %v1548_v61 }
  0x1f   :  { %v1623_v9 = vpop.eup %1622  ;;  %1642 = vrcp.f32 %v484_v63  ;;  %v486_v10 = vadd.f32 1.0, %v1621_v3  ;;  %v2039_v15 = vadd.f32 %v1898_v7, %v169_v6  ;;  %v2042_v16 = vadd.f32 %v1898_v7, %v170_v8 }
  0x20   :  { %v1625_v13 = vpop.eup %1624  ;;  %1644 = vrcp.f32 %v485_v4  ;;  %v487_v14 = vadd.f32 1.0, %v1623_v9  ;;  %v1297_v22 = vunpack.c.h.bf16 %v1548_v61  ;;  %v171_v23 = vmul.f32 %v1296_v12, %v1884_v1  ;;  %v1550_v61 = vld [vmem:[%s2501_s0 + $0x68] sm:$0xff]  }
  0x21   :  { %v1627_v18 = vpop.eup %1626  ;;  %1646 = vrcp.f32 %v486_v10  ;;  %v488_v19 = vadd.f32 1.0, %v1625_v13  ;;  %v1078_v35 = vmul.f32 -1.442695, %v2039_v15  ;;  %v1079_v38 = vmul.f32 -1.442695, %v2042_v16 }
  0x22   :  { %v1629_v29 = vpop.eup %1628  ;;  %v668_v34 = vmul.f32 %v1627_v18, %v1907_v20  ;;  %1648 = vrcp.f32 %v487_v14  ;;  %v172_v42 = vmul.f32 %v1297_v22, %v1884_v1  ;;  %v2055_v43 = vadd.f32 %v1898_v7, %v171_v23 }
  0x23   :  { %v1631_v39 = vpop.eup %1630  ;;  %v669_v41 = vmul.f32 %v1629_v29, %v1910_v21  ;;  %1650 = vpow2.f32 %v1988_v5  ;;  %v1300_v20 = vunpack.c.l.bf16 %v1549_v24  ;;  %v1301_v48 = vunpack.c.h.bf16 %v1549_v24 }
  0x24   :  { %v1633_v44 = vpop.eup %1632  ;;  %v670_v47 = vmul.f32 %v1631_v39, %v1918_v25  ;;  %1652 = vrcp.f32 %v488_v19  ;;  %v2061_v21 = vadd.f32 %v1898_v7, %v172_v42  ;;  %v1080_v56 = vmul.f32 -1.442695, %v2055_v43  ;;  %v1552_v42 = vld [vmem:[%s2501_s0 + $0x78] sm:$0xff]  }
  0x25   :  { %v1635_v50 = vpop.eup %1634  ;;  %v1381_v52 = vpack.c.bf16 %v669_v41, %v668_v34  ;;  %v671_v53 = vmul.f32 %v1633_v44, %v1921_v26  ;;  %1654 = vpow2.f32 %v2001_v33  ;;  %v173_v25 = vmul.f32 %v1300_v20, %v1884_v1 }
  0x26   :  { %v1637_v5 = vpop.eup %1636  ;;  %v672_v54 = vmul.f32 %v1635_v50, %v1924_v27  ;;  %1656 = vpow2.f32 %v2010_v40  ;;  %v1081_v27 = vmul.f32 -1.442695, %v2061_v21  ;;  %v174_v3 = vmul.f32 %v1301_v48, %v1884_v1 }
  0x27   :  { %v1639_v62 = vpop.eup %1638  ;;  %1382 = vst [vmem:[%s2504_s3] sm:$0xff] %v1381_v52   ;;  %v1386_v26 = vpack.c.bf16 %v671_v53, %v670_v47  ;;  %v673_v33 = vmul.f32 %v1637_v5, %v1927_v28  ;;  %1658 = vpow2.f32 %v2017_v45  ;;  %v2080_v4 = vadd.f32 %v1898_v7, %v173_v25 }
  0x28   :  { %v1641_v40 = vpop.eup %1640  ;;  %v674_v63 = vmul.f32 %v1639_v62, %v1932_v31  ;;  %1660 = vpow2.f32 %v2020_v46  ;;  %v1304_v8 = vunpack.c.l.bf16 %v1550_v61  ;;  %v2089_v46 = vadd.f32 %v1898_v7, %v174_v3 }
  0x29   :  { %v1643_v6 = vpop.eup %1642  ;;  %1569 = vst [vmem:[%s2504_s3 + $0x8] sm:$0xff] %v1386_v26   ;;  %v1391_v28 = vpack.c.bf16 %v673_v33, %v672_v54  ;;  %v675_v45 = vmul.f32 %v1641_v40, %v1935_v32  ;;  %1662 = vpow2.f32 %v2033_v2  ;;  %v1082_v10 = vmul.f32 -1.442695, %v2080_v4 }
  0x2a   :  { %v1645_v9 = vpop.eup %1644  ;;  %v676_v31 = vmul.f32 %v1643_v6, %v1952_v49  ;;  %1664 = vpow2.f32 %v1077_v11  ;;  %v1305_v2 = vunpack.c.h.bf16 %v1550_v61  ;;  %v1551_v49 = vld [vmem:[%s2501_s0 + $0x70] sm:$0xff]   ;;  %v1083_v18 = vmul.f32 -1.442695, %v2089_v46  ;;  %v1553_v6 = vld [vmem:[%s2501_s0 + $0x80] sm:$0xff]  }
  0x2b   :  { %v1647_v12 = vpop.eup %1646  ;;  %1570 = vst [vmem:[%s2504_s3 + $0x10] sm:$0xff] %v1391_v28   ;;  %v1396_v13 = vpack.c.bf16 %v675_v45, %v674_v63  ;;  %v677_v32 = vmul.f32 %v1645_v9, %v1962_v55  ;;  %1666 = vpow2.f32 %v1078_v35  ;;  %v175_v19 = vmul.f32 %v1304_v8, %v1884_v1 }
  0x2c   :  { %v1649_v11 = vpop.eup %1648  ;;  %v678_v14 = vmul.f32 %v1647_v12, %v1966_v57  ;;  %1668 = vpow2.f32 %v1079_v38  ;;  %v176_v24 = vmul.f32 %v1305_v2, %v1884_v1  ;;  %v1308_v35 = vunpack.c.l.bf16 %v1551_v49 }
  0x2d   :  { %v1651_v22 = vpop.eup %1650  ;;  %1571 = vst [vmem:[%s2504_s3 + $0x18] sm:$0xff] %v1396_v13   ;;  %v1401_v55 = vpack.c.bf16 %v677_v32, %v676_v31  ;;  %v679_v23 = vmul.f32 %v1649_v11, %v1969_v58  ;;  %1670 = vpow2.f32 %v1080_v56  ;;  %v2108_v57 = vadd.f32 %v1898_v7, %v175_v19 }
  0x2e   :  { %v1653_v29 = vpop.eup %1652  ;;  %v489_v34 = vadd.f32 1.0, %v1651_v22  ;;  %1672 = vpow2.f32 %v1081_v27  ;;  %v2117_v58 = vadd.f32 %v1898_v7, %v176_v24  ;;  %v1309_v48 = vunpack.c.h.bf16 %v1551_v49 }
  0x2f   :  { %v1655_v38 = vpop.eup %1654  ;;  %1572 = vst [vmem:[%s2504_s3 + $0x20] sm:$0xff] %v1401_v55   ;;  %v1406_v39 = vpack.c.bf16 %v679_v23, %v678_v14  ;;  %v2114_v41 = vmul.f32 %v1653_v29, %v1972_v59  ;;  %1674 = vpow2.f32 %v1082_v10  ;;  %v2123_v20 = vmul.f32 -1.442695, %v2108_v57  ;;  %v1554_v14 = vld [vmem:[%s2501_s0 + $0x88] sm:$0xff]  }
  0x30   :  { %v1657_v44 = vpop.eup %1656  ;;  %1676 = vrcp.f32 %v489_v34  ;;  %v490_v47 = vadd.f32 1.0, %v1655_v38  ;;  %v2129_v52 = vmul.f32 -1.442695, %v2117_v58  ;;  %v177_v53 = vmul.f32 %v1308_v35, %v1884_v1 }
  0x31   :  { %v1659_v50 = vpop.eup %1658  ;;  %1573 = vst [vmem:[%s2504_s3 + $0x28] sm:$0xff] %v1406_v39   ;;  %v491_v59 = vadd.f32 1.0, %v1657_v44  ;;  %1678 = vpow2.f32 %v1083_v18  ;;  %v178_v56 = vmul.f32 %v1309_v48, %v1884_v1  ;;  %v1312_v25 = vunpack.c.l.bf16 %v1552_v42 }
  0x32   :  { %v1661_v5 = vpop.eup %1660  ;;  %1680 = vrcp.f32 %v490_v47  ;;  %v492_v54 = vadd.f32 1.0, %v1659_v50  ;;  %v2134_v26 = vadd.f32 %v1898_v7, %v177_v53  ;;  %v1313_v33 = vunpack.c.h.bf16 %v1552_v42 }
  0x33   :  { %v1663_v61 = vpop.eup %1662  ;;  %1682 = vrcp.f32 %v491_v59  ;;  %v493_v62 = vadd.f32 1.0, %v1661_v5  ;;  %v2137_v63 = vadd.f32 %v1898_v7, %v178_v56  ;;  %v179_v3 = vmul.f32 %v1312_v25, %v1884_v1  ;;  %v1555_v56 = vld [vmem:[%s2501_s0 + $0x90] sm:$0xff]  }
  0x34   :  { %v1665_v27 = vpop.eup %1664  ;;  %1684 = vrcp.f32 %v492_v54  ;;  %v494_v40 = vadd.f32 1.0, %v1663_v61  ;;  %v1086_v8 = vmul.f32 -1.442695, %v2134_v26  ;;  %v180_v9 = vmul.f32 %v1313_v33, %v1884_v1 }
  0x35   :  { %v1667_v28 = vpop.eup %1666  ;;  %1686 = vrcp.f32 %v493_v62  ;;  %v495_v45 = vadd.f32 1.0, %v1665_v27  ;;  %v1087_v12 = vmul.f32 -1.442695, %v2137_v63  ;;  %v2147_v13 = vadd.f32 %v1898_v7, %v179_v3 }
  0x36   :  { %v1669_v31 = vpop.eup %1668  ;;  %1688 = vrcp.f32 %v494_v40  ;;  %v496_v10 = vadd.f32 1.0, %v1667_v28  ;;  %v2150_v49 = vadd.f32 %v1898_v7, %v180_v9  ;;  %v1316_v11 = vunpack.c.l.bf16 %v1553_v6 }
  0x37   :  { %v1671_v32 = vpop.eup %1670  ;;  %1690 = vrcp.f32 %v495_v45  ;;  %v497_v2 = vadd.f32 1.0, %v1669_v31  ;;  %v1088_v22 = vmul.f32 -1.442695, %v2147_v13  ;;  %v1317_v55 = vunpack.c.h.bf16 %v1553_v6 }
  0x38   :  { %v1673_v18 = vpop.eup %1672  ;;  %1692 = vrcp.f32 %v496_v10  ;;  %v498_v19 = vadd.f32 1.0, %v1671_v32  ;;  %v1089_v29 = vmul.f32 -1.442695, %v2150_v49  ;;  %v181_v34 = vmul.f32 %v1316_v11, %v1884_v1 }
  0x39   :  { %v1675_v23 = vpop.eup %1674  ;;  %1694 = vrcp.f32 %v497_v2  ;;  %v499_v24 = vadd.f32 1.0, %v1673_v18  ;;  %v182_v39 = vmul.f32 %v1317_v55, %v1884_v1  ;;  %v1320_v42 = vunpack.c.l.bf16 %v1554_v14 }
  0x3a   :  { %v1677_v35 = vpop.eup %1676  ;;  %1696 = vrcp.f32 %v498_v19  ;;  %v500_v38 = vadd.f32 1.0, %v1675_v23  ;;  %v2161_v48 = vadd.f32 %v1898_v7, %v181_v34  ;;  %v1321_v50 = vunpack.c.h.bf16 %v1554_v14 }
  0x3b   :  { %v1679_v44 = vpop.eup %1678  ;;  %v681_v47 = vmul.f32 %v1677_v35, %v1975_v60  ;;  %1698 = vrcp.f32 %v499_v24  ;;  %v2164_v5 = vadd.f32 %v1898_v7, %v182_v39  ;;  %v183_v54 = vmul.f32 %v1320_v42, %v1884_v1 }
  0x3c   :  { %v1681_v59 = vpop.eup %1680  ;;  %v501_v53 = vadd.f32 1.0, %v1679_v44  ;;  %1700 = vrcp.f32 %v500_v38  ;;  %v1090_v62 = vmul.f32 -1.442695, %v2161_v48  ;;  %v184_v3 = vmul.f32 %v1321_v50, %v1884_v1 }
  0x3d   :  { %v1683_v25 = vpop.eup %1682  ;;  %v1411_v60 = vpack.c.bf16 %v681_v47, %v2114_v41  ;;  %v682_v61 = vmul.f32 %v1681_v59, %v1993_v17  ;;  %1702 = vpow2.f32 %v2123_v20  ;;  %v1091_v40 = vmul.f32 -1.442695, %v2164_v5 }
  0x3e   :  { %v1685_v33 = vpop.eup %1684  ;;  %v683_v27 = vmul.f32 %v1683_v25, %v1998_v30  ;;  %1704 = vrcp.f32 %v501_v53  ;;  %v2183_v17 = vadd.f32 %v1898_v7, %v183_v54  ;;  %v1324_v20 = vunpack.c.l.bf16 %v1555_v56 }
  0x3f   :  { %v1687_v6 = vpop.eup %1686  ;;  %1574 = vst [vmem:[%s2504_s3 + $0x30] sm:$0xff] %v1411_v60   ;;  %v684_v41 = vmul.f32 %v1685_v33, %v2004_v36  ;;  %1706 = vpow2.f32 %v2129_v52  ;;  %v2187_v9 = vadd.f32 %v1898_v7, %v184_v3  ;;  %v1325_v32 = vunpack.c.h.bf16 %v1555_v56  ;;  %v1556_v52 = vld [vmem:[%s2501_s0 + $0x98] sm:$0xff]  }
  0x40   :  { %v1689_v28 = vpop.eup %1688  ;;  %v1416_v30 = vpack.c.bf16 %v683_v27, %v682_v61  ;;  %v685_v45 = vmul.f32 %v1687_v6, %v2007_v37  ;;  %1708 = vpow2.f32 %v1086_v8  ;;  %v1092_v36 = vmul.f32 -1.442695, %v2183_v17 }
  0x41   :  { %v1691_v31 = vpop.eup %1690  ;;  %v686_v10 = vmul.f32 %v1689_v28, %v2024_v51  ;;  %1710 = vpow2.f32 %v1087_v12  ;;  %v1093_v11 = vmul.f32 -1.442695, %v2187_v9  ;;  %v185_v14 = vmul.f32 %v1324_v20, %v1884_v1 }
  0x42   :  { %v1693_v2 = vpop.eup %1692  ;;  %1575 = vst [vmem:[%s2504_s3 + $0x38] sm:$0xff] %v1416_v30   ;;  %v1421_v37 = vpack.c.bf16 %v685_v45, %v684_v41  ;;  %v687_v8 = vmul.f32 %v1691_v31, %v2030_v0  ;;  %1712 = vpow2.f32 %v1088_v22  ;;  %v186_v18 = vmul.f32 %v1325_v32, %v1884_v1  ;;  %v1558_v41 = vld [vmem:[%s2501_s0 + $0xa8] sm:$0xff]  }
  0x43   :  { %v1695_v51 = vpop.eup %1694  ;;  %v688_v12 = vmul.f32 %v1693_v2, %v2039_v15  ;;  %1714 = vpow2.f32 %v1089_v29  ;;  %v1328_v0 = vunpack.c.l.bf16 %v1556_v52  ;;  %v2208_v15 = vadd.f32 %v1898_v7, %v185_v14 }
  0x44   :  { %v1697_v19 = vpop.eup %1696  ;;  %1576 = vst [vmem:[%s2504_s3 + $0x40] sm:$0xff] %v1421_v37   ;;  %v1426_v55 = vpack.c.bf16 %v687_v8, %v686_v10  ;;  %v689_v23 = vmul.f32 %v1695_v51, %v2042_v16  ;;  %1716 = vpow2.f32 %v1090_v62  ;;  %v2211_v29 = vadd.f32 %v1898_v7, %v186_v18 }
  0x45   :  { %v1699_v22 = vpop.eup %1698  ;;  %v690_v24 = vmul.f32 %v1697_v19, %v2055_v43  ;;  %1718 = vpow2.f32 %v1091_v40  ;;  %v1329_v38 = vunpack.c.h.bf16 %v1556_v52  ;;  %v1557_v43 = vld [vmem:[%s2501_s0 + $0xa0] sm:$0xff]   ;;  %v1094_v44 = vmul.f32 -1.442695, %v2208_v15 }
  0x46   :  { %v1701_v34 = vpop.eup %1700  ;;  %1577 = vst [vmem:[%s2504_s3 + $0x48] sm:$0xff] %v1426_v55   ;;  %v1431_v35 = vpack.c.bf16 %v689_v23, %v688_v12  ;;  %v691_v16 = vmul.f32 %v1699_v22, %v2061_v21  ;;  %1720 = vpow2.f32 %v1092_v36  ;;  %v1095_v47 = vmul.f32 -1.442695, %v2211_v29  ;;  %v1560_v22 = vld [vmem:[%s2501_s0 + $0xb8] sm:$0xff]  }
  0x47   :  { %v1703_v39 = vpop.eup %1702  ;;  %v692_v42 = vmul.f32 %v1701_v34, %v2080_v4  ;;  %1722 = vpow2.f32 %v1093_v11  ;;  %v187_v53 = vmul.f32 %v1328_v0, %v1884_v1  ;;  %v188_v54 = vmul.f32 %v1329_v38, %v1884_v1  ;;  %v1559_v11 = vld [vmem:[%s2501_s0 + $0xb0] sm:$0xff]  }
  0x48   :  { %v1705_v50 = vpop.eup %1704  ;;  %1578 = vst [vmem:[%s2504_s3 + $0x50] sm:$0xff] %v1431_v35   ;;  %v1436_v21 = vpack.c.bf16 %v691_v16, %v690_v24  ;;  %v502_v59 = vadd.f32 1.0, %v1703_v39  ;;  %1724 = vpow2.f32 %v1094_v44  ;;  %v1332_v4 = vunpack.c.l.bf16 %v1557_v43 }
  0x49   :  { %v1707_v56 = vpop.eup %1706  ;;  %v693_v25 = vmul.f32 %v1705_v50, %v2089_v46  ;;  %v1333_v60 = vunpack.c.h.bf16 %v1557_v43  ;;  %v2233_v33 = vadd.f32 %v1898_v7, %v187_v53  ;;  %v2236_v27 = vadd.f32 %v1898_v7, %v188_v54 }
  0x4a   :  { %v1709_v61 = vpop.eup %1708  ;;  %1579 = vst [vmem:[%s2504_s3 + $0x58] sm:$0xff] %v1436_v21   ;;  %v503_v62 = vadd.f32 1.0, %v1707_v56  ;;  %1726 = vrcp.f32 %v502_v59  ;;  %v189_v46 = vmul.f32 %v1332_v4, %v1884_v1  ;;  %v1336_v37 = vunpack.c.l.bf16 %v1558_v41 }
  0x4b   :  { %v1711_v40 = vpop.eup %1710  ;;  %v1441_v3 = vpack.c.bf16 %v693_v25, %v692_v42  ;;  %v504_v6 = vadd.f32 1.0, %v1709_v61  ;;  %1728 = vpow2.f32 %v1095_v47  ;;  %v1096_v30 = vmul.f32 -1.442695, %v2233_v33 }
  0x4c   :  { %v1713_v20 = vpop.eup %1712  ;;  %1730 = vrcp.f32 %v503_v62  ;;  %v505_v28 = vadd.f32 1.0, %v1711_v40  ;;  %v1097_v45 = vmul.f32 -1.442695, %v2236_v27  ;;  %v190_v36 = vmul.f32 %v1333_v60, %v1884_v1 }
  0x4d   :  { %v1715_v31 = vpop.eup %1714  ;;  %1580 = vst [vmem:[%s2504_s3 + $0x60] sm:$0xff] %v1441_v3   ;;  %1732 = vrcp.f32 %v504_v6  ;;  %v506_v10 = vadd.f32 1.0, %v1713_v20  ;;  %v2249_v32 = vadd.f32 %v1898_v7, %v189_v46  ;;  %v1337_v8 = vunpack.c.h.bf16 %v1558_v41 }
  0x4e   :  { %v1717_v52 = vpop.eup %1716  ;;  %1734 = vrcp.f32 %v505_v28  ;;  %v507_v2 = vadd.f32 1.0, %v1715_v31  ;;  %v2255_v14 = vadd.f32 %v1898_v7, %v190_v36  ;;  %v191_v23 = vmul.f32 %v1336_v37, %v1884_v1 }
  0x4f   :  { %v1719_v51 = vpop.eup %1718  ;;  %1736 = vrcp.f32 %v506_v10  ;;  %v508_v12 = vadd.f32 1.0, %v1717_v52  ;;  %v1098_v18 = vmul.f32 -1.442695, %v2249_v32  ;;  %v192_v0 = vmul.f32 %v1337_v8, %v1884_v1  ;;  %v1561_v10 = vld [vmem:[%s2501_s0 + $0xc0] sm:$0xff]  }
  0x50   :  { %v1721_v19 = vpop.eup %1720  ;;  %1738 = vrcp.f32 %v507_v2  ;;  %v509_v55 = vadd.f32 1.0, %v1719_v51  ;;  %v1099_v35 = vmul.f32 -1.442695, %v2255_v14  ;;  %v1340_v16 = vunpack.c.l.bf16 %v1559_v11 }
  0x51   :  { %v1723_v24 = vpop.eup %1722  ;;  %1740 = vrcp.f32 %v508_v12  ;;  %v510_v34 = vadd.f32 1.0, %v1721_v19  ;;  %v2265_v43 = vadd.f32 %v1898_v7, %v191_v23  ;;  %v2268_v39 = vadd.f32 %v1898_v7, %v192_v0 }
  0x52   :  { %1742 = vrcp.f32 %v509_v55  ;;  %v511_v38 = vadd.f32 1.0, %v1723_v24  ;;  %v1725_v42 = vpop.eup %1724  ;;  %v1341_v44 = vunpack.c.h.bf16 %v1559_v11  ;;  %v193_v47 = vmul.f32 %v1340_v16, %v1884_v1 }
  0x53   :  { %1744 = vrcp.f32 %v510_v34  ;;  %v1344_v50 = vunpack.c.l.bf16 %v1560_v22  ;;  %v512_v59 = vadd.f32 1.0, %v1725_v42  ;;  %v1100_v53 = vmul.f32 -1.442695, %v2265_v43 }
  0x54   :  { %v1727_v21 = vpop.eup %1726  ;;  %1746 = vrcp.f32 %v511_v38  ;;  %v1101_v54 = vmul.f32 -1.442695, %v2268_v39  ;;  %v194_v4 = vmul.f32 %v1341_v44, %v1884_v1  ;;  %v2276_v60 = vadd.f32 %v1898_v7, %v193_v47 }
  0x55   :  { %v1729_v56 = vpop.eup %1728  ;;  %v694_v25 = vmul.f32 %v1727_v21, %v2108_v57  ;;  %1748 = vpow2.f32 %v1096_v30  ;;  %v1345_v40 = vunpack.c.h.bf16 %v1560_v22  ;;  %v195_v3 = vmul.f32 %v1344_v50, %v1884_v1 }
  0x56   :  { %v1731_v61 = vpop.eup %1730  ;;  %v513_v62 = vadd.f32 1.0, %v1729_v56  ;;  %1750 = vrcp.f32 %v512_v59  ;;  %v2281_v41 = vadd.f32 %v1898_v7, %v194_v4  ;;  %v1102_v57 = vmul.f32 -1.442695, %v2276_v60  ;;  %v1563_v59 = vld [vmem:[%s2501_s0 + $0xd0] sm:$0xff]  }
  0x57   :  { %v1733_v6 = vpop.eup %1732  ;;  %v695_v46 = vmul.f32 %v1731_v61, %v2117_v58  ;;  %1752 = vpow2.f32 %v1097_v45  ;;  %v196_v30 = vmul.f32 %v1345_v40, %v1884_v1  ;;  %v2287_v31 = vadd.f32 %v1898_v7, %v195_v3 }
  0x58   :  { %v1735_v20 = vpop.eup %1734  ;;  %v696_v28 = vmul.f32 %v1733_v6, %v2134_v26  ;;  %1754 = vrcp.f32 %v513_v62  ;;  %v1103_v52 = vmul.f32 -1.442695, %v2281_v41  ;;  %v1348_v12 = vunpack.c.l.bf16 %v1561_v10 }
  0x59   :  { %v1737_v58 = vpop.eup %1736  ;;  %v1446_v45 = vpack.c.bf16 %v695_v46, %v694_v25  ;;  %v697_v36 = vmul.f32 %v1735_v20, %v2137_v63  ;;  %1756 = vpow2.f32 %v1098_v18  ;;  %v2296_v37 = vadd.f32 %v1898_v7, %v196_v30 }
  0x5a   :  { %v1739_v2 = vpop.eup %1738  ;;  %v698_v26 = vmul.f32 %v1737_v58, %v2147_v13  ;;  %1758 = vpow2.f32 %v1099_v35  ;;  %v1104_v8 = vmul.f32 -1.442695, %v2287_v31  ;;  %v1562_v13 = vld [vmem:[%s2501_s0 + $0xc8] sm:$0xff]   ;;  %v1349_v23 = vunpack.c.h.bf16 %v1561_v10 }
  0x5b   :  { %v1741_v11 = vpop.eup %1740  ;;  %1581 = vst [vmem:[%s2504_s3 + $0x68] sm:$0xff] %v1446_v45   ;;  %v1451_v51 = vpack.c.bf16 %v697_v36, %v696_v28  ;;  %v699_v63 = vmul.f32 %v1739_v2, %v2150_v49  ;;  %1760 = vpow2.f32 %v1100_v53  ;;  %v1105_v55 = vmul.f32 -1.442695, %v2296_v37  ;;  %v2346_v28 = vld [vmem:[%s2503_s2] ss:$0 sm:$0xff] }
  0x5c   :  { %v1743_v18 = vpop.eup %1742  ;;  %v700_v19 = vmul.f32 %v1741_v11, %v2161_v48  ;;  %1762 = vpow2.f32 %v1101_v54  ;;  %v197_v24 = vmul.f32 %v1348_v12, %v1884_v1  ;;  %v198_v48 = vmul.f32 %v1349_v23, %v1884_v1 }
  0x5d   :  { %v1745_v0 = vpop.eup %1744  ;;  %1582 = vst [vmem:[%s2504_s3 + $0x70] sm:$0xff] %v1451_v51   ;;  %v1456_v22 = vpack.c.bf16 %v699_v63, %v698_v26  ;;  %v701_v49 = vmul.f32 %v1743_v18, %v2164_v5  ;;  %1764 = vpow2.f32 %v1102_v57  ;;  %v1352_v16 = vunpack.c.l.bf16 %v1562_v13  ;;  %v2359_v26 = vld [vmem:[%s2502_s1] ss:$0 sm:$0xff] }
  0x5e   :  { %v1747_v34 = vpop.eup %1746  ;;  %v702_v35 = vmul.f32 %v1745_v0, %v2183_v17  ;;  %1766 = vpow2.f32 %v1103_v52  ;;  %v2320_v5 = vadd.f32 %v1898_v7, %v197_v24  ;;  %v2323_v17 = vadd.f32 %v1898_v7, %v198_v48  ;;  %v1565_v24 = vld [vmem:[%s2501_s0 + $0xe0] sm:$0xff]  }
  0x5f   :  { %v1749_v38 = vpop.eup %1748  ;;  %1583 = vst [vmem:[%s2504_s3 + $0x78] sm:$0xff] %v1456_v22   ;;  %v1461_v42 = vpack.c.bf16 %v701_v49, %v700_v19  ;;  %v703_v44 = vmul.f32 %v1747_v34, %v2187_v9  ;;  %1768 = vpow2.f32 %v1104_v8  ;;  %v1353_v21 = vunpack.c.h.bf16 %v1562_v13 }
  0x60   :  { %v1751_v47 = vpop.eup %1750  ;;  %v514_v50 = vadd.f32 1.0, %v1749_v38  ;;  %1770 = vpow2.f32 %v1105_v55  ;;  %v1106_v56 = vmul.f32 -1.442695, %v2320_v5  ;;  %v199_v25 = vmul.f32 %v1352_v16, %v1884_v1  ;;  %v1566_v38 = vld [vmem:[%s2501_s0 + $0xe8] sm:$0xff]  }
  0x61   :  { %v1753_v53 = vpop.eup %1752  ;;  %1584 = vst [vmem:[%s2504_s3 + $0x80] sm:$0xff] %v1461_v42   ;;  %v1466_v9 = vpack.c.bf16 %v703_v44, %v702_v35  ;;  %v704_v54 = vmul.f32 %v1751_v47, %v2208_v15  ;;  %v1107_v62 = vmul.f32 -1.442695, %v2323_v17  ;;  %v200_v40 = vmul.f32 %v1353_v21, %v1884_v1 }
  0x62   :  { %v1755_v4 = vpop.eup %1754  ;;  %v515_v61 = vadd.f32 1.0, %v1753_v53  ;;  %1772 = vrcp.f32 %v514_v50  ;;  %v2341_v15 = vadd.f32 %v1898_v7, %v199_v25  ;;  %v1356_v46 = vunpack.c.l.bf16 %v1563_v59 }
  0x63   :  { %v1757_v3 = vpop.eup %1756  ;;  %1585 = vst [vmem:[%s2504_s3 + $0x88] sm:$0xff] %v1466_v9   ;;  %v705_v6 = vmul.f32 %v1755_v4, %v2211_v29  ;;  %1774 = vpow2.f32 %v1106_v56  ;;  %v2349_v1 = vadd.f32 %v2346_v28, %v200_v40  ;;  %v1357_v30 = vunpack.c.h.bf16 %v1563_v59  ;;  %v1564_v29 = vld [vmem:[%s2501_s0 + $0xd8] sm:$0xff]  }
  0x64   :  { %v1759_v57 = vpop.eup %1758  ;;  %1776 = vrcp.f32 %v515_v61  ;;  %v516_v20 = vadd.f32 1.0, %v1757_v3  ;;  %v1108_v45 = vmul.f32 -1.442695, %v2341_v15  ;;  %v201_v8 = vmul.f32 %v2359_v26, %v1356_v46 }
  0x65   :  { %v1761_v10 = vpop.eup %1760  ;;  %v1471_v7 = vpack.c.bf16 %v705_v6, %v704_v54  ;;  %v517_v58 = vadd.f32 1.0, %v1759_v57  ;;  %1778 = vpow2.f32 %v1107_v62  ;;  %v1109_v2 = vmul.f32 -1.442695, %v2349_v1 }
  0x66   :  { %v1763_v36 = vpop.eup %1762  ;;  %1780 = vrcp.f32 %v516_v20  ;;  %v518_v52 = vadd.f32 1.0, %v1761_v10  ;;  %v202_v63 = vmul.f32 %v2359_v26, %v1357_v30  ;;  %v1360_v12 = vunpack.c.l.bf16 %v1564_v29 }
  0x67   :  { %v1765_v11 = vpop.eup %1764  ;;  %1586 = vst [vmem:[%s2504_s3 + $0x90] sm:$0xff] %v1471_v7   ;;  %1782 = vrcp.f32 %v517_v58  ;;  %v519_v51 = vadd.f32 1.0, %v1763_v36  ;;  %v2367_v19 = vadd.f32 %v2346_v28, %v201_v8  ;;  %v1361_v55 = vunpack.c.h.bf16 %v1564_v29  ;;  %v1567_v8 = vld [vmem:[%s2501_s0 + $0xf0] sm:$0xff]  }
  0x68   :  { %v1767_v13 = vpop.eup %1766  ;;  %1784 = vrcp.f32 %v518_v52  ;;  %v520_v18 = vadd.f32 1.0, %v1765_v11  ;;  %v2370_v22 = vadd.f32 %v2346_v28, %v202_v63  ;;  %v203_v49 = vmul.f32 %v2359_v26, %v1360_v12 }
  0x69   :  { %v1769_v23 = vpop.eup %1768  ;;  %1786 = vrcp.f32 %v519_v51  ;;  %v521_v0 = vadd.f32 1.0, %v1767_v13  ;;  %v1110_v48 = vmul.f32 -1.442695, %v2367_v19  ;;  %v204_v16 = vmul.f32 %v2359_v26, %v1361_v55 }
  0x6a   :  { %v1771_v34 = vpop.eup %1770  ;;  %1788 = vrcp.f32 %v520_v18  ;;  %v522_v35 = vadd.f32 1.0, %v1769_v23  ;;  %v1111_v44 = vmul.f32 -1.442695, %v2370_v22  ;;  %v2383_v47 = vadd.f32 %v2346_v28, %v203_v49  ;;  %v1568_v49 = vld [vmem:[%s2501_s0 + $0xf8] sm:$0xff]  }
  0x6b   :  { %1790 = vrcp.f32 %v521_v0  ;;  %v523_v42 = vadd.f32 1.0, %v1771_v34  ;;  %v2386_v21 = vadd.f32 %v2346_v28, %v204_v16  ;;  %v1364_v59 = vunpack.c.l.bf16 %v1565_v24 }
  0x6c   :  { %v1773_v50 = vpop.eup %1772  ;;  %1792 = vrcp.f32 %v522_v35  ;;  %v1365_v53 = vunpack.c.h.bf16 %v1565_v24  ;;  %v1112_v56 = vmul.f32 -1.442695, %v2383_v47  ;;  %v1368_v25 = vunpack.c.l.bf16 %v1566_v38 }
  0x6d   :  { %v1775_v9 = vpop.eup %1774  ;;  %v706_v54 = vmul.f32 %v1773_v50, %v2233_v33  ;;  %1794 = vrcp.f32 %v523_v42  ;;  %v1113_v62 = vmul.f32 -1.442695, %v2386_v21  ;;  %v205_v40 = vmul.f32 %v2359_v26, %v1364_v59 }
  0x6e   :  { %v1777_v4 = vpop.eup %1776  ;;  %v524_v61 = vadd.f32 1.0, %v1775_v9  ;;  %1796 = vpow2.f32 %v1108_v45  ;;  %v206_v46 = vmul.f32 %v2359_v26, %v1365_v53  ;;  %v1369_v57 = vunpack.c.h.bf16 %v1566_v38 }
  0x6f   :  { %v1779_v3 = vpop.eup %1778  ;;  %v707_v6 = vmul.f32 %v1777_v4, %v2236_v27  ;;  %1798 = vpow2.f32 %v1109_v2  ;;  %v2395_v30 = vadd.f32 %v2346_v28, %v205_v40  ;;  %v207_v29 = vmul.f32 %v2359_v26, %v1368_v25 }
  0x70   :  { %v1781_v20 = vpop.eup %1780  ;;  %v525_v33 = vadd.f32 1.0, %v1779_v3  ;;  %1800 = vrcp.f32 %v524_v61  ;;  %v2400_v45 = vadd.f32 %v2346_v28, %v206_v46  ;;  %v208_v2 = vmul.f32 %v2359_v26, %v1369_v57 }
  0x71   :  { %v1783_v10 = vpop.eup %1782  ;;  %v1476_v7 = vpack.c.bf16 %v707_v6, %v706_v54  ;;  %v708_v58 = vmul.f32 %v1781_v20, %v2249_v32  ;;  %1802 = vpow2.f32 %v1110_v48  ;;  %v1114_v52 = vmul.f32 -1.442695, %v2395_v30 }
  0x72   :  { %v1785_v27 = vpop.eup %1784  ;;  %v709_v36 = vmul.f32 %v1783_v10, %v2255_v14  ;;  %1804 = vrcp.f32 %v525_v33  ;;  %v1115_v51 = vmul.f32 -1.442695, %v2400_v45  ;;  %v2414_v14 = vadd.f32 %v2346_v28, %v207_v29 }
  0x73   :  { %v1787_v11 = vpop.eup %1786  ;;  %1587 = vst [vmem:[%s2504_s3 + $0x98] sm:$0xff] %v1476_v7   ;;  %v710_v32 = vmul.f32 %v1785_v27, %v2265_v43  ;;  %1806 = vpow2.f32 %v1111_v44  ;;  %v2418_v18 = vadd.f32 %v2346_v28, %v208_v2  ;;  %v1372_v0 = vunpack.c.l.bf16 %v1567_v8 }
  0x74   :  { %v1789_v63 = vpop.eup %1788  ;;  %v1481_v12 = vpack.c.bf16 %v709_v36, %v708_v58  ;;  %v711_v13 = vmul.f32 %v1787_v11, %v2268_v39  ;;  %1808 = vpow2.f32 %v1112_v56  ;;  %v1116_v43 = vmul.f32 -1.442695, %v2414_v14 }
  0x75   :  { %v1791_v55 = vpop.eup %1790  ;;  %v712_v23 = vmul.f32 %v1789_v63, %v2276_v60  ;;  %1810 = vpow2.f32 %v1113_v62  ;;  %v1117_v35 = vmul.f32 -1.442695, %v2418_v18  ;;  %v1373_v16 = vunpack.c.h.bf16 %v1567_v8 }
  0x76   :  { %v1793_v24 = vpop.eup %1792  ;;  %1588 = vst [vmem:[%s2504_s3 + $0xa0] sm:$0xff] %v1481_v12   ;;  %v1486_v39 = vpack.c.bf16 %v711_v13, %v710_v32  ;;  %v713_v34 = vmul.f32 %v1791_v55, %v2281_v41  ;;  %1812 = vpow2.f32 %v1114_v52  ;;  %v209_v38 = vmul.f32 %v2359_v26, %v1372_v0 }
  0x77   :  { %v1795_v60 = vpop.eup %1794  ;;  %v714_v48 = vmul.f32 %v1793_v24, %v2287_v31  ;;  %1814 = vpow2.f32 %v1115_v51  ;;  %v1376_v41 = vunpack.c.l.bf16 %v1568_v49  ;;  %v210_v9 = vmul.f32 %v2359_v26, %v1373_v16 }
  0x78   :  { %v1797_v42 = vpop.eup %1796  ;;  %1589 = vst [vmem:[%s2504_s3 + $0xa8] sm:$0xff] %v1486_v39   ;;  %v1491_v44 = vpack.c.bf16 %v713_v34, %v712_v23  ;;  %v715_v50 = vmul.f32 %v1795_v60, %v2296_v37  ;;  %1816 = vpow2.f32 %v1116_v43  ;;  %v2438_v31 = vadd.f32 %v2346_v28, %v209_v38 }
  0x79   :  { %v1799_v59 = vpop.eup %1798  ;;  %v526_v53 = vadd.f32 1.0, %v1797_v42  ;;  %1818 = vpow2.f32 %v1117_v35  ;;  %v1377_v4 = vunpack.c.h.bf16 %v1568_v49  ;;  %v211_v37 = vmul.f32 %v2359_v26, %v1376_v41 }
  0x7a   :  { %v1801_v54 = vpop.eup %1800  ;;  %1590 = vst [vmem:[%s2504_s3 + $0xb0] sm:$0xff] %v1491_v44   ;;  %v1496_v56 = vpack.c.bf16 %v715_v50, %v714_v48  ;;  %v527_v25 = vadd.f32 1.0, %v1799_v59  ;;  %v2446_v40 = vadd.f32 %v2346_v28, %v210_v9  ;;  %v1118_v3 = vmul.f32 -1.442695, %v2438_v31 }
  0x7b   :  { %v1803_v61 = vpop.eup %1802  ;;  %v716_v62 = vmul.f32 %v1801_v54, %v2320_v5  ;;  %1820 = vrcp.f32 %v526_v53  ;;  %v212_v57 = vmul.f32 %v2359_v26, %v1377_v4  ;;  %v2456_v36 = vadd.f32 %v2346_v28, %v211_v37 }
  0x7c   :  { %v1805_v6 = vpop.eup %1804  ;;  %1591 = vst [vmem:[%s2504_s3 + $0xb8] sm:$0xff] %v1496_v56   ;;  %1822 = vrcp.f32 %v527_v25  ;;  %v528_v46 = vadd.f32 1.0, %v1803_v61  ;;  %v1119_v5 = vmul.f32 -1.442695, %v2446_v40 }
  0x7d   :  { %v1807_v20 = vpop.eup %1806  ;;  %v717_v33 = vmul.f32 %v1805_v6, %v2323_v17  ;;  %1824 = vpow2.f32 %v1118_v3  ;;  %v2459_v26 = vadd.f32 %v2346_v28, %v212_v57  ;;  %v1120_v12 = vmul.f32 -1.442695, %v2456_v36 }
  0x7e   :  { %v1809_v29 = vpop.eup %1808  ;;  %v529_v10 = vadd.f32 1.0, %v1807_v20  ;;  %1826 = vrcp.f32 %v528_v46 }
  0x7f   :  { %v1811_v7 = vpop.eup %1810  ;;  %v1501_v58 = vpack.c.bf16 %v717_v33, %v716_v62  ;;  %v530_v27 = vadd.f32 1.0, %v1809_v29  ;;  %1828 = vpow2.f32 %v1119_v5  ;;  %v1121_v28 = vmul.f32 -1.442695, %v2459_v26 }
  0x80   :  { %v1813_v52 = vpop.eup %1812  ;;  %1830 = vrcp.f32 %v529_v10  ;;  %v531_v2 = vadd.f32 1.0, %v1811_v7 }
  0x81   :  { %v1815_v17 = vpop.eup %1814  ;;  %1592 = vst [vmem:[%s2504_s3 + $0xc0] sm:$0xff] %v1501_v58   ;;  %1832 = vrcp.f32 %v530_v27  ;;  %v532_v8 = vadd.f32 1.0, %v1813_v52 }
  0x82   :  { %v1817_v11 = vpop.eup %1816  ;;  %1834 = vrcp.f32 %v531_v2  ;;  %v533_v32 = vadd.f32 1.0, %v1815_v17 }
  0x83   :  { %v1819_v51 = vpop.eup %1818  ;;  %1836 = vrcp.f32 %v532_v8  ;;  %v534_v63 = vadd.f32 1.0, %v1817_v11 }
  0x84   :  { %1838 = vrcp.f32 %v533_v32  ;;  %v535_v13 = vadd.f32 1.0, %v1819_v51 }
  0x85   :  { %v1821_v55 = vpop.eup %1820  ;;  %1840 = vrcp.f32 %v534_v63 }
  0x86   :  { %v1823_v23 = vpop.eup %1822  ;;  %v718_v43 = vmul.f32 %v1821_v55, %v2341_v15  ;;  %1842 = vrcp.f32 %v535_v13 }
  0x87   :  { %v1825_v0 = vpop.eup %1824  ;;  %v719_v49 = vmul.f32 %v1823_v23, %v2349_v1  ;;  %1844 = vpow2.f32 %v1120_v12 }
  0x88   :  { %v1827_v24 = vpop.eup %1826  ;;  %v536_v39 = vadd.f32 1.0, %v1825_v0  ;;  %1846 = vpow2.f32 %v1121_v28 }
  0x89   :  { %v1829_v34 = vpop.eup %1828  ;;  %v1506_v35 = vpack.c.bf16 %v719_v49, %v718_v43  ;;  %v720_v60 = vmul.f32 %v1827_v24, %v2367_v19 }
  0x8a   :  { %v1831_v48 = vpop.eup %1830  ;;  %v537_v16 = vadd.f32 1.0, %v1829_v34  ;;  %1848 = vrcp.f32 %v536_v39 }
  0x8b   :  { %v1833_v38 = vpop.eup %1832  ;;  %1593 = vst [vmem:[%s2504_s3 + $0xc8] sm:$0xff] %v1506_v35   ;;  %v721_v15 = vmul.f32 %v1831_v48, %v2370_v22 }
  0x8c   :  { %v1835_v42 = vpop.eup %1834  ;;  %v722_v1 = vmul.f32 %v1833_v38, %v2383_v47  ;;  %1850 = vrcp.f32 %v537_v16 }
  0x8d   :  { %v1837_v44 = vpop.eup %1836  ;;  %v1511_v50 = vpack.c.bf16 %v721_v15, %v720_v60  ;;  %v723_v41 = vmul.f32 %v1835_v42, %v2386_v21 }
  0x8e   :  { %v1839_v59 = vpop.eup %1838  ;;  %v724_v19 = vmul.f32 %v1837_v44, %v2395_v30 }
  0x8f   :  { %v1841_v53 = vpop.eup %1840  ;;  %1594 = vst [vmem:[%s2504_s3 + $0xd0] sm:$0xff] %v1511_v50   ;;  %v1516_v9 = vpack.c.bf16 %v723_v41, %v722_v1  ;;  %v725_v54 = vmul.f32 %v1839_v59, %v2400_v45 }
  0x90   :  { %v1843_v22 = vpop.eup %1842  ;;  %v726_v56 = vmul.f32 %v1841_v53, %v2414_v14 }
  0x91   :  { %v1845_v47 = vpop.eup %1844  ;;  %1595 = vst [vmem:[%s2504_s3 + $0xd8] sm:$0xff] %v1516_v9   ;;  %v1521_v21 = vpack.c.bf16 %v725_v54, %v724_v19  ;;  %v727_v25 = vmul.f32 %v1843_v22, %v2418_v18 }
  0x92   :  { %v1847_v30 = vpop.eup %1846  ;;  %v538_v4 = vadd.f32 1.0, %v1845_v47 }
  0x93   :  { %1596 = vst [vmem:[%s2504_s3 + $0xe0] sm:$0xff] %v1521_v21   ;;  %v1526_v37 = vpack.c.bf16 %v727_v25, %v726_v56  ;;  %v539_v61 = vadd.f32 1.0, %v1847_v30 }
  0x94   :  { %v1849_v45 = vpop.eup %1848  ;;  %1852 = vrcp.f32 %v538_v4 }
  0x95   :  { %1597 = vst [vmem:[%s2504_s3 + $0xe8] sm:$0xff] %v1526_v37   ;;  %v728_v14 = vmul.f32 %v1849_v45, %v2438_v31  ;;  %1854 = vrcp.f32 %v539_v61 }
  0x96   :  { %v1851_v62 = vpop.eup %1850 }
  0x97   :  { %v729_v18 = vmul.f32 %v1851_v62, %v2446_v40 }
  0x99   :  { %v1531_v3 = vpack.c.bf16 %v729_v18, %v728_v14 }
  0x9b   :  { %1598 = vst [vmem:[%s2504_s3 + $0xf0] sm:$0xff] %v1531_v3  }
  0x9e   :  { %v1853_v6 = vpop.eup %1852 }
  0x9f   :  { %v1855_v46 = vpop.eup %1854  ;;  %v730_v57 = vmul.f32 %v1853_v6, %v2456_v36 }
  0xa0   :  { %v731_v20 = vmul.f32 %v1855_v46, %v2459_v26 }
  0xa2   :  { %v1536_v33 = vpack.c.bf16 %v731_v20, %v730_v57 }
  0xa4   :  { %1599 = vst [vmem:[%s2504_s3 + $0xf8] sm:$0xff] %v1536_v33  }

// kernel: run.44
= control target key start
LH: loop header
LB: loop body
LE: loop exit
PB: predicated region body
PF: predicated region fallthrough
CT: control target
= control target key end

     0   :  { %vm303_vm0 = vcmask 392192   ;;  %v1786_v35 = vmov 0.0   ;;  %s2247_s1 = inlined_call_operand.vmem [shape: bf16[48,128], index: 1, kind: input, shape index: {}]   ;;  %s2248_s0 = inlined_call_operand.vmem [shape: bf16[512,48], index: 0, kind: input, shape index: {}]   ;;  %s2249_s3 = inlined_call_operand.vmem [shape: f32[8,128], index: 3, kind: output, shape index: {1}]   ;;  %s2250_s2 = inlined_call_operand.vmem [shape: bf16[512,128], index: 2, kind: output, shape index: {0}]  }
   0x1   :  { %v1751_v0 = vld [vmem:[%s2247_s1] sm:$0xff]   ;;  %v1752_v1 = vld [vmem:[%s2247_s1 + $0x8] sm:$0xff]   ;;  %v1753_v3 = vld [vmem:[%s2247_s1 + $0x10] sm:$0xff]   ;;  %54 = vst [vmem:[%s2249_s3] sm:$0xff] %v1786_v35 }
   0x2   :  { %1674 = vmatprep.subr.bf16.mxu0 %v1751_v0  ;;  %1744 = vmatprep.subr.bf16.mxu1 %v1751_v0  ;;  %v1754_v2 = vld [vmem:[%s2248_s0] sm:$0xff]   ;;  %v1755_v4 = vld [vmem:[%s2248_s0 + $0x8] sm:$0xff]   ;;  %v1756_v5 = vld [vmem:[%s2248_s0 + $0x10] sm:$0xff]  }
   0x3   :  { %1675 = vmatpush3.bf16.msra.mxu0 %v1751_v0  ;;  %1747 = vmatpush3.bf16.msra.mxu1 %v1751_v0  ;;  %v1757_v6 = vld [vmem:[%s2248_s0 + $0x18] sm:$0xff]   ;;  %v1758_v7 = vld [vmem:[%s2248_s0 + $0x20] sm:$0xff]   ;;  %v1771_v9 = vld [vmem:[%s2248_s0 + $0x88] sm:$0xff]  }
   0x4   :  { %1676 = vmatprep.subr.bf16.mxu0 %v1752_v1  ;;  %1745 = vmatprep.subr.bf16.mxu1 %v1752_v1  ;;  %v1770_v8 = vld [vmem:[%s2248_s0 + $0x80] sm:$0xff]   ;;  %v1772_v10 = vld [vmem:[%s2248_s0 + $0x90] sm:$0xff]   ;;  %v1759_v11 = vld [vmem:[%s2248_s0 + $0x28] sm:$0xff]  }
   0x5   :  { %1680 = vmatprep.mubr.msk.bf16.mxu0 %vm303_vm0, %v1754_v2  ;;  %1712 = vmatprep.mubr.msk.bf16.mxu1 %vm303_vm0, %v1770_v8  ;;  %v1760_v12 = vld [vmem:[%s2248_s0 + $0x30] sm:$0xff]   ;;  %v1773_v13 = vld [vmem:[%s2248_s0 + $0x98] sm:$0xff]   ;;  %v1774_v14 = vld [vmem:[%s2248_s0 + $0xa0] sm:$0xff]  }
   0x6   :  { %v1761_v15 = vld [vmem:[%s2248_s0 + $0x38] sm:$0xff]   ;;  %v1775_v16 = vld [vmem:[%s2248_s0 + $0xa8] sm:$0xff]   ;;  %v1762_v17 = vld [vmem:[%s2248_s0 + $0x40] sm:$0xff]  }
   0x7   :  { %1677 = vmatpush3.bf16.msra.mxu0 %v1752_v1  ;;  %1748 = vmatpush3.bf16.msra.mxu1 %v1752_v1  ;;  %v1776_v18 = vld [vmem:[%s2248_s0 + $0xb0] sm:$0xff]   ;;  %v1763_v19 = vld [vmem:[%s2248_s0 + $0x48] sm:$0xff]   ;;  %v1777_v20 = vld [vmem:[%s2248_s0 + $0xb8] sm:$0xff]  }
   0x8   :  { %1678 = vmatprep.subr.bf16.mxu0 %v1753_v3  ;;  %1746 = vmatprep.subr.bf16.mxu1 %v1753_v3  ;;  %v1764_v21 = vld [vmem:[%s2248_s0 + $0x50] sm:$0xff]   ;;  %v1778_v22 = vld [vmem:[%s2248_s0 + $0xc0] sm:$0xff]   ;;  %v1765_v23 = vld [vmem:[%s2248_s0 + $0x58] sm:$0xff]  }
   0x9   :  { %v1779_v24 = vld [vmem:[%s2248_s0 + $0xc8] sm:$0xff]   ;;  %v1766_v25 = vld [vmem:[%s2248_s0 + $0x60] sm:$0xff]   ;;  %v1780_v26 = vld [vmem:[%s2248_s0 + $0xd0] sm:$0xff]  }
   0xa   :  { %v1767_v27 = vld [vmem:[%s2248_s0 + $0x68] sm:$0xff]   ;;  %v1781_v28 = vld [vmem:[%s2248_s0 + $0xd8] sm:$0xff]   ;;  %v1768_v29 = vld [vmem:[%s2248_s0 + $0x70] sm:$0xff]  }
   0xb   :  { %1679 = vmatpush3.bf16.msra.mxu0 %v1753_v3  ;;  %1749 = vmatpush3.bf16.msra.mxu1 %v1753_v3  ;;  %v1782_v30 = vld [vmem:[%s2248_s0 + $0xe0] sm:$0xff]   ;;  %v1769_v31 = vld [vmem:[%s2248_s0 + $0x78] sm:$0xff]   ;;  %v1783_v32 = vld [vmem:[%s2248_s0 + $0xe8] sm:$0xff]  }
   0xc   :  { %v1784_v33 = vld [vmem:[%s2248_s0 + $0xf0] sm:$0xff]   ;;  %v1785_v34 = vld [vmem:[%s2248_s0 + $0xf8] sm:$0xff]  }
   0xe   :  { %1681 = vmatmul.mubr.msk.bf16.vlgmr.msra.gmra.mrb[0].mxu0 %vm303_vm0, %v1755_v4  ;;  %1713 = vmatmul.mubr.msk.bf16.vlgmr.msra.gmra.mrb[0].mxu1 %vm303_vm0, %v1771_v9 }
   0xf   :  { %1684 = vmatprep.mubr.msk.bf16.mxu0 %vm303_vm0, %v1756_v5  ;;  %1716 = vmatprep.mubr.msk.bf16.mxu1 %vm303_vm0, %v1772_v10 }
  0x16   :  { %1685 = vmatmul.mubr.msk.bf16.gmra.mrb[4].mxu0 %vm303_vm0, %v1757_v6  ;;  %1717 = vmatmul.mubr.msk.bf16.gmra.mrb[4].mxu1 %vm303_vm0, %v1773_v13 }
  0x17   :  { %1688 = vmatprep.mubr.msk.bf16.mxu0 %vm303_vm0, %v1758_v7  ;;  %1720 = vmatprep.mubr.msk.bf16.mxu1 %vm303_vm0, %v1774_v14 }
  0x1e   :  { %1689 = vmatmul.mubr.msk.bf16.gmra.mrb[8].mxu0 %vm303_vm0, %v1759_v11  ;;  %1721 = vmatmul.mubr.msk.bf16.gmra.mrb[8].mxu1 %vm303_vm0, %v1775_v16 }
  0x1f   :  { %1692 = vmatprep.mubr.msk.bf16.mxu0 %vm303_vm0, %v1760_v12  ;;  %1724 = vmatprep.mubr.msk.bf16.mxu1 %vm303_vm0, %v1776_v18 }
  0x26   :  { %1693 = vmatmul.mubr.msk.bf16.gmra.mrb[12].mxu0 %vm303_vm0, %v1761_v15  ;;  %1725 = vmatmul.mubr.msk.bf16.gmra.mrb[12].mxu1 %vm303_vm0, %v1777_v20 }
  0x27   :  { %1696 = vmatprep.mubr.msk.bf16.mxu0 %vm303_vm0, %v1762_v17  ;;  %1728 = vmatprep.mubr.msk.bf16.mxu1 %vm303_vm0, %v1778_v22 }
  0x2e   :  { %1697 = vmatmul.mubr.msk.bf16.gmra.mrb[16].mxu0 %vm303_vm0, %v1763_v19  ;;  %1729 = vmatmul.mubr.msk.bf16.gmra.mrb[16].mxu1 %vm303_vm0, %v1779_v24 }
  0x2f   :  { %1700 = vmatprep.mubr.msk.bf16.mxu0 %vm303_vm0, %v1764_v21  ;;  %1732 = vmatprep.mubr.msk.bf16.mxu1 %vm303_vm0, %v1780_v26 }
  0x36   :  { %1701 = vmatmul.mubr.msk.bf16.gmra.mrb[20].mxu0 %vm303_vm0, %v1765_v23  ;;  %1733 = vmatmul.mubr.msk.bf16.gmra.mrb[20].mxu1 %vm303_vm0, %v1781_v28 }
  0x37   :  { %1704 = vmatprep.mubr.msk.bf16.mxu0 %vm303_vm0, %v1766_v25  ;;  %1736 = vmatprep.mubr.msk.bf16.mxu1 %vm303_vm0, %v1782_v30 }
  0x3e   :  { %1705 = vmatmul.mubr.msk.bf16.gmra.mrb[24].mxu0 %vm303_vm0, %v1767_v27  ;;  %1737 = vmatmul.mubr.msk.bf16.gmra.mrb[24].mxu1 %vm303_vm0, %v1783_v32 }
  0x3f   :  { %1708 = vmatprep.mubr.msk.bf16.mxu0 %vm303_vm0, %v1768_v29  ;;  %1740 = vmatprep.mubr.msk.bf16.mxu1 %vm303_vm0, %v1784_v33 }
  0x46   :  { %1709 = vmatmul.mubr.msk.bf16.gmra.mrb[28].mxu0 %vm303_vm0, %v1769_v31  ;;  %1741 = vmatmul.mubr.msk.bf16.gmra.mrb[28].mxu1 %vm303_vm0, %v1785_v34 }
  0xe1   :  { %v1682_v36 = vpop.f32.mrb[0].mxu0  ;;  %v1953_v52 = vpop.f32.mrb[0].mxu1 }
  0xe2   :  { %v434_v37 = vpop.f32.mrb[1].mxu0  ;;  %v1084_v45 = vmul.f32 %v1682_v36, %v1682_v36  ;;  %v1955_v54 = vpop.f32.mrb[1].mxu1 }
  0xe3   :  { %v1683_v38 = vpop.f32.mrb[2].mxu0  ;;  %v1082_v41 = vmul.f32 %v434_v37, %v434_v37  ;;  %v1957_v59 = vpop.f32.mrb[2].mxu1 }
  0xe4   :  { %v1456_v39 = vpack.c.bf16 %v1683_v38, %v1682_v36  ;;  %v437_v40 = vpop.f32.mrb[3].mxu0  ;;  %v1085_v48 = vmul.f32 %v1683_v38, %v1683_v38  ;;  %v1536_v62 = vpack.c.bf16 %v1957_v59, %v1953_v52  ;;  %v1961_v63 = vpop.f32.mrb[3].mxu1 }
  0xe5   :  { %v1451_v42 = vpack.c.bf16 %v437_v40, %v434_v37  ;;  %v1010_v43 = vadd.f32 %v437_v40, %v434_v37  ;;  %v1083_v44 = vmul.f32 %v437_v40, %v437_v40  ;;  %v1531_v4 = vpack.c.bf16 %v1961_v63, %v1955_v54 }
  0xe6   :  { %1608 = vst [vmem:[%s2250_s2 + $0x8] sm:$0xff] %v1456_v39   ;;  %1624 = vst [vmem:[%s2250_s2 + $0x88] sm:$0xff] %v1536_v62  }
  0xe7   :  { %1452 = vst [vmem:[%s2250_s2] sm:$0xff] %v1451_v42   ;;  %v1011_v46 = vadd.f32 %v1682_v36, %v1010_v43  ;;  %v1146_v47 = vadd.f32 %v1083_v44, %v1082_v41  ;;  %1623 = vst [vmem:[%s2250_s2 + $0x80] sm:$0xff] %v1531_v4  }
  0xe9   :  { %v1147_v49 = vadd.f32 %v1146_v47, %v1084_v45  ;;  %v1686_v50 = vpop.f32.mrb[4].mxu0  ;;  %v1012_v51 = vadd.f32 %v1683_v38, %v1011_v46  ;;  %v1977_v12 = vpop.f32.mrb[4].mxu1 }
  0xea   :  { %v450_v53 = vpop.f32.mrb[5].mxu0  ;;  %v1088_v5 = vmul.f32 %v1686_v50, %v1686_v50  ;;  %v1979_v14 = vpop.f32.mrb[5].mxu1 }
  0xeb   :  { %v1013_v55 = vadd.f32 %v1012_v51, %v450_v53  ;;  %v1086_v56 = vmul.f32 %v450_v53, %v450_v53  ;;  %v1148_v57 = vadd.f32 %v1147_v49, %v1085_v48  ;;  %v1687_v58 = vpop.f32.mrb[6].mxu0  ;;  %v1981_v19 = vpop.f32.mrb[6].mxu1 }
  0xec   :  { %v1466_v60 = vpack.c.bf16 %v1687_v58, %v1686_v50  ;;  %v453_v61 = vpop.f32.mrb[7].mxu0  ;;  %v1089_v8 = vmul.f32 %v1687_v58, %v1687_v58  ;;  %v1546_v22 = vpack.c.bf16 %v1981_v19, %v1977_v12  ;;  %v1985_v23 = vpop.f32.mrb[7].mxu1 }
  0xed   :  { %v1149_v0 = vadd.f32 %v1148_v57, %v1086_v56  ;;  %v1461_v1 = vpack.c.bf16 %v453_v61, %v450_v53  ;;  %v1014_v2 = vadd.f32 %v1013_v55, %v453_v61  ;;  %v1087_v3 = vmul.f32 %v453_v61, %v453_v61 }
  0xee   :  { %1610 = vst [vmem:[%s2250_s2 + $0x18] sm:$0xff] %v1466_v60   ;;  %1626 = vst [vmem:[%s2250_s2 + $0x98] sm:$0xff] %v1546_v22   ;;  %v1541_v28 = vpack.c.bf16 %v1985_v23, %v1979_v14 }
  0xef   :  { %1609 = vst [vmem:[%s2250_s2 + $0x10] sm:$0xff] %v1461_v1   ;;  %v1015_v6 = vadd.f32 %v1686_v50, %v1014_v2  ;;  %v1150_v7 = vadd.f32 %v1149_v0, %v1087_v3 }
  0xf0   :  { %1625 = vst [vmem:[%s2250_s2 + $0x90] sm:$0xff] %v1541_v28  }
  0xf1   :  { %v1151_v9 = vadd.f32 %v1150_v7, %v1088_v5  ;;  %v1690_v10 = vpop.f32.mrb[8].mxu0  ;;  %v1016_v11 = vadd.f32 %v1687_v58, %v1015_v6  ;;  %v2001_v36 = vpop.f32.mrb[8].mxu1 }
  0xf2   :  { %v466_v13 = vpop.f32.mrb[9].mxu0  ;;  %v1092_v29 = vmul.f32 %v1690_v10, %v1690_v10  ;;  %v2003_v38 = vpop.f32.mrb[9].mxu1 }
  0xf3   :  { %v1017_v15 = vadd.f32 %v1016_v11, %v466_v13  ;;  %v1090_v16 = vmul.f32 %v466_v13, %v466_v13  ;;  %v1152_v17 = vadd.f32 %v1151_v9, %v1089_v8  ;;  %v1691_v18 = vpop.f32.mrb[10].mxu0  ;;  %v2005_v43 = vpop.f32.mrb[10].mxu1 }
  0xf4   :  { %v1476_v20 = vpack.c.bf16 %v1691_v18, %v1690_v10  ;;  %v469_v21 = vpop.f32.mrb[11].mxu0  ;;  %v1093_v32 = vmul.f32 %v1691_v18, %v1691_v18  ;;  %v1556_v46 = vpack.c.bf16 %v2005_v43, %v2001_v36  ;;  %v2009_v47 = vpop.f32.mrb[11].mxu1 }
  0xf5   :  { %v1153_v24 = vadd.f32 %v1152_v17, %v1090_v16  ;;  %v1471_v25 = vpack.c.bf16 %v469_v21, %v466_v13  ;;  %v1018_v26 = vadd.f32 %v1017_v15, %v469_v21  ;;  %v1091_v27 = vmul.f32 %v469_v21, %v469_v21 }
  0xf6   :  { %1612 = vst [vmem:[%s2250_s2 + $0x28] sm:$0xff] %v1476_v20   ;;  %1628 = vst [vmem:[%s2250_s2 + $0xa8] sm:$0xff] %v1556_v46   ;;  %v1551_v53 = vpack.c.bf16 %v2009_v47, %v2003_v38 }
  0xf7   :  { %1611 = vst [vmem:[%s2250_s2 + $0x20] sm:$0xff] %v1471_v25   ;;  %v1019_v30 = vadd.f32 %v1690_v10, %v1018_v26  ;;  %v1154_v31 = vadd.f32 %v1153_v24, %v1091_v27 }
  0xf8   :  { %1627 = vst [vmem:[%s2250_s2 + $0xa0] sm:$0xff] %v1551_v53  }
  0xf9   :  { %v1155_v33 = vadd.f32 %v1154_v31, %v1092_v29  ;;  %v1694_v34 = vpop.f32.mrb[12].mxu0  ;;  %v1020_v35 = vadd.f32 %v1691_v18, %v1019_v30  ;;  %v2025_v0 = vpop.f32.mrb[12].mxu1 }
  0xfa   :  { %v482_v37 = vpop.f32.mrb[13].mxu0  ;;  %v1096_v55 = vmul.f32 %v1694_v34, %v1694_v34  ;;  %v2027_v2 = vpop.f32.mrb[13].mxu1 }
  0xfb   :  { %v1021_v39 = vadd.f32 %v1020_v35, %v482_v37  ;;  %v1094_v40 = vmul.f32 %v482_v37, %v482_v37  ;;  %v1156_v41 = vadd.f32 %v1155_v33, %v1093_v32  ;;  %v1695_v42 = vpop.f32.mrb[14].mxu0  ;;  %v2029_v7 = vpop.f32.mrb[14].mxu1 }
  0xfc   :  { %v1486_v44 = vpack.c.bf16 %v1695_v42, %v1694_v34  ;;  %v485_v45 = vpop.f32.mrb[15].mxu0  ;;  %v1097_v58 = vmul.f32 %v1695_v42, %v1695_v42  ;;  %v1566_v10 = vpack.c.bf16 %v2029_v7, %v2025_v0  ;;  %v2033_v11 = vpop.f32.mrb[15].mxu1 }
  0xfd   :  { %v1157_v48 = vadd.f32 %v1156_v41, %v1094_v40  ;;  %v1481_v49 = vpack.c.bf16 %v485_v45, %v482_v37  ;;  %v1022_v50 = vadd.f32 %v1021_v39, %v485_v45  ;;  %v1095_v51 = vmul.f32 %v485_v45, %v485_v45 }
  0xfe   :  { %1614 = vst [vmem:[%s2250_s2 + $0x38] sm:$0xff] %v1486_v44   ;;  %1630 = vst [vmem:[%s2250_s2 + $0xb8] sm:$0xff] %v1566_v10   ;;  %v1561_v18 = vpack.c.bf16 %v2033_v11, %v2027_v2 }
  0xff   :  { %1613 = vst [vmem:[%s2250_s2 + $0x30] sm:$0xff] %v1481_v49   ;;  %v1023_v56 = vadd.f32 %v1694_v34, %v1022_v50  ;;  %v1158_v57 = vadd.f32 %v1157_v48, %v1095_v51 }
 0x100   :  { %1629 = vst [vmem:[%s2250_s2 + $0xb0] sm:$0xff] %v1561_v18  }
 0x101   :  { %v1159_v60 = vadd.f32 %v1158_v57, %v1096_v55  ;;  %v1698_v61 = vpop.f32.mrb[16].mxu0  ;;  %v1024_v62 = vadd.f32 %v1695_v42, %v1023_v56  ;;  %v2049_v28 = vpop.f32.mrb[16].mxu1 }
 0x102   :  { %v498_v1 = vpop.f32.mrb[17].mxu0  ;;  %v1100_v20 = vmul.f32 %v1698_v61, %v1698_v61  ;;  %v2051_v30 = vpop.f32.mrb[17].mxu1 }
 0x103   :  { %v1025_v3 = vadd.f32 %v1024_v62, %v498_v1  ;;  %v1098_v4 = vmul.f32 %v498_v1, %v498_v1  ;;  %v1160_v5 = vadd.f32 %v1159_v60, %v1097_v58  ;;  %v1699_v6 = vpop.f32.mrb[18].mxu0  ;;  %v2053_v35 = vpop.f32.mrb[18].mxu1 }
 0x104   :  { %v1496_v8 = vpack.c.bf16 %v1699_v6, %v1698_v61  ;;  %v501_v9 = vpop.f32.mrb[19].mxu0  ;;  %v1101_v24 = vmul.f32 %v1699_v6, %v1699_v6  ;;  %v1576_v40 = vpack.c.bf16 %v2053_v35, %v2049_v28  ;;  %v2057_v41 = vpop.f32.mrb[19].mxu1 }
 0x105   :  { %v1161_v13 = vadd.f32 %v1160_v5, %v1098_v4  ;;  %v1491_v15 = vpack.c.bf16 %v501_v9, %v498_v1  ;;  %v1026_v16 = vadd.f32 %v1025_v3, %v501_v9  ;;  %v1099_v17 = vmul.f32 %v501_v9, %v501_v9 }
 0x106   :  { %1616 = vst [vmem:[%s2250_s2 + $0x48] sm:$0xff] %v1496_v8   ;;  %1632 = vst [vmem:[%s2250_s2 + $0xc8] sm:$0xff] %v1576_v40   ;;  %v1571_v48 = vpack.c.bf16 %v2057_v41, %v2051_v30 }
 0x107   :  { %1615 = vst [vmem:[%s2250_s2 + $0x40] sm:$0xff] %v1491_v15   ;;  %v1027_v21 = vadd.f32 %v1698_v61, %v1026_v16  ;;  %v1162_v22 = vadd.f32 %v1161_v13, %v1099_v17 }
 0x108   :  { %1631 = vst [vmem:[%s2250_s2 + $0xc0] sm:$0xff] %v1571_v48  }
 0x109   :  { %v1163_v25 = vadd.f32 %v1162_v22, %v1100_v20  ;;  %v1702_v26 = vpop.f32.mrb[20].mxu0  ;;  %v1028_v27 = vadd.f32 %v1699_v6, %v1027_v21  ;;  %v2073_v58 = vpop.f32.mrb[20].mxu1 }
 0x10a   :  { %v514_v29 = vpop.f32.mrb[21].mxu0  ;;  %v1104_v49 = vmul.f32 %v1702_v26, %v1702_v26  ;;  %v2075_v61 = vpop.f32.mrb[21].mxu1 }
 0x10b   :  { %v1029_v31 = vadd.f32 %v1028_v27, %v514_v29  ;;  %v1102_v32 = vmul.f32 %v514_v29, %v514_v29  ;;  %v1164_v33 = vadd.f32 %v1163_v25, %v1101_v24  ;;  %v1703_v34 = vpop.f32.mrb[22].mxu0  ;;  %v2077_v5 = vpop.f32.mrb[22].mxu1 }
 0x10c   :  { %v1506_v37 = vpack.c.bf16 %v1703_v34, %v1702_v26  ;;  %v517_v39 = vpop.f32.mrb[23].mxu0  ;;  %v1105_v53 = vmul.f32 %v1703_v34, %v1703_v34  ;;  %v1586_v9 = vpack.c.bf16 %v2077_v5, %v2073_v58  ;;  %v2081_v10 = vpop.f32.mrb[23].mxu1 }
 0x10d   :  { %v1165_v42 = vadd.f32 %v1164_v33, %v1102_v32  ;;  %v1501_v44 = vpack.c.bf16 %v517_v39, %v514_v29  ;;  %v1030_v45 = vadd.f32 %v1029_v31, %v517_v39  ;;  %v1103_v46 = vmul.f32 %v517_v39, %v517_v39 }
 0x10e   :  { %1618 = vst [vmem:[%s2250_s2 + $0x58] sm:$0xff] %v1506_v37   ;;  %1634 = vst [vmem:[%s2250_s2 + $0xd8] sm:$0xff] %v1586_v9   ;;  %v1581_v18 = vpack.c.bf16 %v2081_v10, %v2075_v61 }
 0x10f   :  { %1617 = vst [vmem:[%s2250_s2 + $0x50] sm:$0xff] %v1501_v44   ;;  %v1031_v50 = vadd.f32 %v1702_v26, %v1030_v45  ;;  %v1166_v51 = vadd.f32 %v1165_v42, %v1103_v46 }
 0x110   :  { %1633 = vst [vmem:[%s2250_s2 + $0xd0] sm:$0xff] %v1581_v18  }
 0x111   :  { %v1167_v55 = vadd.f32 %v1166_v51, %v1104_v49  ;;  %v1706_v56 = vpop.f32.mrb[24].mxu0  ;;  %v1032_v57 = vadd.f32 %v1703_v34, %v1031_v50  ;;  %v2097_v29 = vpop.f32.mrb[24].mxu1 }
 0x112   :  { %v530_v60 = vpop.f32.mrb[25].mxu0  ;;  %v1108_v20 = vmul.f32 %v1706_v56, %v1706_v56  ;;  %v2099_v32 = vpop.f32.mrb[25].mxu1 }
 0x113   :  { %v1033_v62 = vadd.f32 %v1032_v57, %v530_v60  ;;  %v1106_v1 = vmul.f32 %v530_v60, %v530_v60  ;;  %v1168_v3 = vadd.f32 %v1167_v55, %v1105_v53  ;;  %v1707_v4 = vpop.f32.mrb[26].mxu0  ;;  %v2101_v40 = vpop.f32.mrb[26].mxu1 }
 0x114   :  { %v1516_v6 = vpack.c.bf16 %v1707_v4, %v1706_v56  ;;  %v533_v8 = vpop.f32.mrb[27].mxu0  ;;  %v1109_v24 = vmul.f32 %v1707_v4, %v1707_v4  ;;  %v1596_v45 = vpack.c.bf16 %v2101_v40, %v2097_v29  ;;  %v2105_v46 = vpop.f32.mrb[27].mxu1 }
 0x115   :  { %v1169_v13 = vadd.f32 %v1168_v3, %v1106_v1  ;;  %v1511_v15 = vpack.c.bf16 %v533_v8, %v530_v60  ;;  %v1034_v16 = vadd.f32 %v1033_v62, %v533_v8  ;;  %v1107_v17 = vmul.f32 %v533_v8, %v533_v8 }
 0x116   :  { %1620 = vst [vmem:[%s2250_s2 + $0x68] sm:$0xff] %v1516_v6   ;;  %1636 = vst [vmem:[%s2250_s2 + $0xe8] sm:$0xff] %v1596_v45   ;;  %v1591_v53 = vpack.c.bf16 %v2105_v46, %v2099_v32  ;;  %v1114_v3 = vmul.f32 %v1955_v54, %v1955_v54 }
 0x117   :  { %1619 = vst [vmem:[%s2250_s2 + $0x60] sm:$0xff] %v1511_v15   ;;  %v1035_v21 = vadd.f32 %v1706_v56, %v1034_v16  ;;  %v1170_v22 = vadd.f32 %v1169_v13, %v1107_v17 }
 0x118   :  { %1635 = vst [vmem:[%s2250_s2 + $0xe0] sm:$0xff] %v1591_v53   ;;  %v1123_v53 = vmul.f32 %v2009_v47, %v2009_v47 }
 0x119   :  { %v1171_v25 = vadd.f32 %v1170_v22, %v1108_v20  ;;  %v1710_v26 = vpop.f32.mrb[28].mxu0  ;;  %v1036_v27 = vadd.f32 %v1707_v4, %v1035_v21  ;;  %v2123_v4 = vpop.f32.mrb[28].mxu1  ;;  %v1115_v20 = vmul.f32 %v1961_v63, %v1961_v63 }
 0x11a   :  { %v546_v31 = vpop.f32.mrb[29].mxu0  ;;  %v1112_v55 = vmul.f32 %v1710_v26, %v1710_v26  ;;  %v2125_v6 = vpop.f32.mrb[29].mxu1 }
 0x11b   :  { %v1037_v33 = vadd.f32 %v1036_v27, %v546_v31  ;;  %v1110_v34 = vmul.f32 %v546_v31, %v546_v31  ;;  %v1172_v37 = vadd.f32 %v1171_v25, %v1109_v24  ;;  %v1711_v39 = vpop.f32.mrb[30].mxu0  ;;  %v2128_v13 = vpop.f32.mrb[30].mxu1  ;;  %v1118_v27 = vmul.f32 %v1979_v14, %v1979_v14 }
 0x11c   :  { %v1526_v42 = vpack.c.bf16 %v1711_v39, %v1710_v26  ;;  %v549_v44 = vpop.f32.mrb[31].mxu0  ;;  %v1113_v60 = vmul.f32 %v1711_v39, %v1711_v39  ;;  %v1606_v15 = vpack.c.bf16 %v2128_v13, %v2123_v4  ;;  %v2132_v16 = vpop.f32.mrb[31].mxu1 }
 0x11d   :  { %v1173_v48 = vadd.f32 %v1172_v37, %v1110_v34  ;;  %v1521_v49 = vpack.c.bf16 %v549_v44, %v546_v31  ;;  %v1038_v50 = vadd.f32 %v1037_v33, %v549_v44  ;;  %v1111_v51 = vmul.f32 %v549_v44, %v549_v44 }
 0x11e   :  { %1622 = vst [vmem:[%s2250_s2 + $0x78] sm:$0xff] %v1526_v42   ;;  %v1601_v21 = vpack.c.bf16 %v2132_v16, %v2125_v6  ;;  %1638 = vst [vmem:[%s2250_s2 + $0xf8] sm:$0xff] %v1606_v15   ;;  %v1119_v37 = vmul.f32 %v1985_v23, %v1985_v23 }
 0x11f   :  { %1621 = vst [vmem:[%s2250_s2 + $0x70] sm:$0xff] %v1521_v49   ;;  %v1039_v56 = vadd.f32 %v1710_v26, %v1038_v50  ;;  %v1174_v57 = vadd.f32 %v1173_v48, %v1111_v51 }
 0x120   :  { %1637 = vst [vmem:[%s2250_s2 + $0xf0] sm:$0xff] %v1601_v21  }
 0x121   :  { %v1175_v62 = vadd.f32 %v1174_v57, %v1112_v55  ;;  %v1040_v1 = vadd.f32 %v1711_v39, %v1039_v56  ;;  %v1120_v39 = vmul.f32 %v1977_v12, %v1977_v12 }
 0x123   :  { %v1041_v8 = vadd.f32 %v1040_v1, %v1955_v54  ;;  %v1176_v9 = vadd.f32 %v1175_v62, %v1113_v60  ;;  %v1116_v54 = vmul.f32 %v1953_v52, %v1953_v52 }
 0x125   :  { %v1177_v17 = vadd.f32 %v1176_v9, %v1114_v3  ;;  %v1042_v18 = vadd.f32 %v1041_v8, %v1961_v63  ;;  %v1117_v63 = vmul.f32 %v1957_v59, %v1957_v59  ;;  %v1127_v8 = vmul.f32 %v2033_v11, %v2033_v11 }
 0x127   :  { %v1043_v22 = vadd.f32 %v1953_v52, %v1042_v18  ;;  %v1178_v24 = vadd.f32 %v1177_v17, %v1115_v20 }
 0x129   :  { %v1179_v25 = vadd.f32 %v1178_v24, %v1116_v54  ;;  %v1044_v26 = vadd.f32 %v1957_v59, %v1043_v22  ;;  %v1121_v59 = vmul.f32 %v1981_v19, %v1981_v19  ;;  %v1131_v22 = vmul.f32 %v2057_v41, %v2057_v41 }
 0x12b   :  { %v1045_v31 = vadd.f32 %v1044_v26, %v1979_v14  ;;  %v1180_v33 = vadd.f32 %v1179_v25, %v1117_v63  ;;  %v1122_v14 = vmul.f32 %v2003_v38, %v2003_v38 }
 0x12d   :  { %v1181_v34 = vadd.f32 %v1180_v33, %v1118_v27  ;;  %v1046_v52 = vadd.f32 %v1045_v31, %v1985_v23 }
 0x12f   :  { %v1047_v42 = vadd.f32 %v1977_v12, %v1046_v52  ;;  %v1182_v44 = vadd.f32 %v1181_v34, %v1119_v37  ;;  %v1124_v12 = vmul.f32 %v2001_v36, %v2001_v36  ;;  %v1135_v34 = vmul.f32 %v2081_v10, %v2081_v10 }
 0x131   :  { %v1183_v45 = vadd.f32 %v1182_v44, %v1120_v39  ;;  %v1048_v48 = vadd.f32 %v1981_v19, %v1047_v42  ;;  %v1125_v19 = vmul.f32 %v2005_v43, %v2005_v43 }
 0x133   :  { %v1049_v49 = vadd.f32 %v1048_v48, %v2003_v38  ;;  %v1184_v50 = vadd.f32 %v1183_v45, %v1121_v59  ;;  %v1126_v38 = vmul.f32 %v2027_v2, %v2027_v2  ;;  %v1139_v48 = vmul.f32 %v2105_v46, %v2105_v46 }
 0x135   :  { %v1185_v51 = vadd.f32 %v1184_v50, %v1122_v14  ;;  %v1050_v23 = vadd.f32 %v1049_v49, %v2009_v47 }
 0x137   :  { %v1051_v55 = vadd.f32 %v2001_v36, %v1050_v23  ;;  %v1186_v56 = vadd.f32 %v1185_v51, %v1123_v53  ;;  %v1128_v36 = vmul.f32 %v2025_v0, %v2025_v0 }
 0x139   :  { %v1187_v57 = vadd.f32 %v1186_v56, %v1124_v12  ;;  %v1052_v60 = vadd.f32 %v2005_v43, %v1051_v55  ;;  %v1129_v43 = vmul.f32 %v2029_v7, %v2029_v7  ;;  %v1143_v55 = vmul.f32 %v2132_v16, %v2132_v16 }
 0x13b   :  { %v1053_v62 = vadd.f32 %v1052_v60, %v2027_v2  ;;  %v1188_v1 = vadd.f32 %v1187_v57, %v1125_v19  ;;  %v1130_v2 = vmul.f32 %v2051_v30, %v2051_v30 }
 0x13d   :  { %v1189_v3 = vadd.f32 %v1188_v1, %v1126_v38  ;;  %v1054_v47 = vadd.f32 %v1053_v62, %v2033_v11 }
 0x13f   :  { %v1055_v9 = vadd.f32 %v2025_v0, %v1054_v47  ;;  %v1190_v15 = vadd.f32 %v1189_v3, %v1127_v8  ;;  %v1132_v0 = vmul.f32 %v2049_v28, %v2049_v28 }
 0x141   :  { %v1191_v17 = vadd.f32 %v1190_v15, %v1128_v36  ;;  %v1056_v18 = vadd.f32 %v2029_v7, %v1055_v9  ;;  %v1133_v7 = vmul.f32 %v2053_v35, %v2053_v35 }
 0x143   :  { %v1057_v20 = vadd.f32 %v1056_v18, %v2051_v30  ;;  %v1192_v21 = vadd.f32 %v1191_v17, %v1129_v43  ;;  %v1134_v30 = vmul.f32 %v2075_v61, %v2075_v61 }
 0x145   :  { %v1193_v54 = vadd.f32 %v1192_v21, %v1130_v2  ;;  %v1058_v11 = vadd.f32 %v1057_v20, %v2057_v41 }
 0x147   :  { %v1059_v24 = vadd.f32 %v2049_v28, %v1058_v11  ;;  %v1194_v63 = vadd.f32 %v1193_v54, %v1131_v22  ;;  %v1136_v28 = vmul.f32 %v2073_v58, %v2073_v58 }
 0x149   :  { %v1195_v25 = vadd.f32 %v1194_v63, %v1132_v0  ;;  %v1060_v26 = vadd.f32 %v2053_v35, %v1059_v24  ;;  %v1137_v35 = vmul.f32 %v2077_v5, %v2077_v5 }
 0x14b   :  { %v1061_v27 = vadd.f32 %v1060_v26, %v2075_v61  ;;  %v1196_v31 = vadd.f32 %v1195_v25, %v1133_v7  ;;  %v1138_v61 = vmul.f32 %v2099_v32, %v2099_v32 }
 0x14d   :  { %v1197_v33 = vadd.f32 %v1196_v31, %v1134_v30  ;;  %v1062_v41 = vadd.f32 %v1061_v27, %v2081_v10 }
 0x14f   :  { %v1063_v52 = vadd.f32 %v2073_v58, %v1062_v41  ;;  %v1198_v37 = vadd.f32 %v1197_v33, %v1135_v34  ;;  %v1140_v58 = vmul.f32 %v2097_v29, %v2097_v29 }
 0x151   :  { %v1199_v39 = vadd.f32 %v1198_v37, %v1136_v28  ;;  %v1064_v42 = vadd.f32 %v2077_v5, %v1063_v52  ;;  %v1141_v5 = vmul.f32 %v2101_v40, %v2101_v40 }
 0x153   :  { %v1065_v44 = vadd.f32 %v1064_v42, %v2099_v32  ;;  %v1200_v59 = vadd.f32 %v1199_v39, %v1137_v35  ;;  %v1142_v32 = vmul.f32 %v2125_v6, %v2125_v6 }
 0x155   :  { %v1201_v45 = vadd.f32 %v1200_v59, %v1138_v61  ;;  %v1066_v10 = vadd.f32 %v1065_v44, %v2105_v46 }
 0x157   :  { %v1067_v14 = vadd.f32 %v2097_v29, %v1066_v10  ;;  %v1202_v49 = vadd.f32 %v1201_v45, %v1139_v48  ;;  %v1144_v29 = vmul.f32 %v2123_v4, %v2123_v4 }
 0x159   :  { %v1203_v50 = vadd.f32 %v1202_v49, %v1140_v58  ;;  %v1068_v51 = vadd.f32 %v2101_v40, %v1067_v14  ;;  %v1145_v40 = vmul.f32 %v2128_v13, %v2128_v13 }
 0x15b   :  { %v1069_v23 = vadd.f32 %v1068_v51, %v2125_v6  ;;  %v1204_v53 = vadd.f32 %v1203_v50, %v1141_v5 }
 0x15d   :  { %v1205_v12 = vadd.f32 %v1204_v53, %v1142_v32  ;;  %v1070_v46 = vadd.f32 %v1069_v23, %v2132_v16 }
 0x15f   :  { %v1071_v56 = vadd.f32 %v2123_v4, %v1070_v46  ;;  %v1206_v19 = vadd.f32 %v1205_v12, %v1143_v55  ;;  %v1009_v4 = vld [vmem:[%s2249_s3] sm:$0x1] }
 0x161   :  { %v1072_v57 = vadd.f32 %v2128_v13, %v1071_v56  ;;  %v1207_v60 = vadd.f32 %v1206_v19, %v1144_v29  ;;  %v1081_v13 = vld [vmem:[%s2249_s3 + $0x1] sm:$0x1] }
 0x163   :  { %v1073_v6 = vrot.slane %v1072_v57, 4  ;;  %v1208_v38 = vadd.f32 %v1207_v60, %v1145_v40 }
 0x165   :  { %v1074_v62 = vadd.f32 %v1073_v6, %v1072_v57  ;;  %v1209_v1 = vrot.slane %v1208_v38, 4 }
 0x167   :  { %v1075_v3 = vrot.slane %v1074_v62, 2  ;;  %v1210_v47 = vadd.f32 %v1209_v1, %v1208_v38 }
 0x169   :  { %v1076_v8 = vadd.f32 %v1075_v3, %v1074_v62  ;;  %v1211_v16 = vrot.slane %v1210_v47, 2 }
 0x16b   :  { %v1077_v36 = vrot.slane %v1076_v8, 1  ;;  %v1212_v9 = vadd.f32 %v1211_v16, %v1210_v47 }
 0x16d   :  { %v1078_v15 = vadd.f32 %v1077_v36, %v1076_v8  ;;  %v1213_v43 = vrot.slane %v1212_v9, 1 }
 0x16f   :  { %v1079_v17 = vadd.f32 %v1078_v15, %v1009_v4  ;;  %v1214_v18 = vadd.f32 %v1213_v43, %v1212_v9 }
 0x171   :  { %1080 = vst [vmem:[%s2249_s3] sm:$0x1] %v1079_v17  ;;  %v1215_v2 = vadd.f32 %v1214_v18, %v1081_v13 }
 0x173   :  { %1216 = vst [vmem:[%s2249_s3 + $0x1] sm:$0x1] %v1215_v2 }

// kernel: run.46
= control target key start
LH: loop header
LB: loop body
LE: loop exit
PB: predicated region body
PF: predicated region fallthrough
CT: control target
= control target key end

     0   :  { %vm315_vm0 = vcmask 588800   ;;  %vm412_vm1 = vcmask 1043456   ;;  %v1818_v38 = vmov 0.0   ;;  %s2285_s1 = inlined_call_operand.vmem [shape: bf16[72,128], index: 1, kind: input, shape index: {}]   ;;  %s2286_s0 = inlined_call_operand.vmem [shape: bf16[512,72], index: 0, kind: input, shape index: {}]   ;;  %s2287_s3 = inlined_call_operand.vmem [shape: f32[8,128], index: 3, kind: output, shape index: {1}]   ;;  %s2288_s2 = inlined_call_operand.vmem [shape: bf16[512,128], index: 2, kind: output, shape index: {0}]  }
   0x1   :  { %v1781_v0 = vld [vmem:[%s2285_s1] sm:$0xff]   ;;  %v1782_v1 = vld [vmem:[%s2285_s1 + $0x8] sm:$0xff]   ;;  %v1783_v2 = vld [vmem:[%s2285_s1 + $0x10] sm:$0xff]   ;;  %54 = vst [vmem:[%s2287_s3] sm:$0xff] %v1818_v38 }
   0x2   :  { %1694 = vmatprep.subr.bf16.mxu0 %v1781_v0  ;;  %1768 = vmatprep.subr.bf16.mxu1 %v1781_v0  ;;  %v1786_v3 = vld [vmem:[%s2286_s0] sm:$0xff]   ;;  %v1784_v4 = vld [vmem:[%s2285_s1 + $0x18] sm:$0xff]   ;;  %v1787_v7 = vld [vmem:[%s2286_s0 + $0x8] sm:$0xff]  }
   0x3   :  { %1695 = vmatpush3.bf16.msra.mxu0 %v1781_v0  ;;  %1773 = vmatpush3.bf16.msra.mxu1 %v1781_v0  ;;  %v1785_v5 = vld [vmem:[%s2285_s1 + $0x20] ss:$0 sps:$4 sm:$0xff]   ;;  %v1788_v8 = vld [vmem:[%s2286_s0 + $0x10] sm:$0xff]   ;;  %v1803_v10 = vld [vmem:[%s2286_s0 + $0x88] sm:$0xff]  }
   0x4   :  { %1696 = vmatprep.subr.bf16.mxu0 %v1782_v1  ;;  %1769 = vmatprep.subr.bf16.mxu1 %v1782_v1  ;;  %v414_v6 = vsel %vm412_vm1, %v1785_v5, 0  ;;  %v1802_v9 = vld [vmem:[%s2286_s0 + $0x80] sm:$0xff]   ;;  %v1804_v11 = vld [vmem:[%s2286_s0 + $0x90] sm:$0xff]   ;;  %v1789_v12 = vld [vmem:[%s2286_s0 + $0x18] sm:$0xff]  }
   0x5   :  { %1704 = vmatprep.mubr.msk.bf16.mxu0 %vm315_vm0, %v1786_v3  ;;  %1736 = vmatprep.mubr.msk.bf16.mxu1 %vm315_vm0, %v1802_v9  ;;  %v1790_v13 = vld [vmem:[%s2286_s0 + $0x20] sm:$0xff]   ;;  %v1805_v14 = vld [vmem:[%s2286_s0 + $0x98] sm:$0xff]   ;;  %v1791_v16 = vld [vmem:[%s2286_s0 + $0x28] sm:$0xff]  }
   0x6   :  { %v1806_v15 = vld [vmem:[%s2286_s0 + $0xa0] sm:$0xff]   ;;  %v1792_v17 = vld [vmem:[%s2286_s0 + $0x30] sm:$0xff]   ;;  %v1807_v18 = vld [vmem:[%s2286_s0 + $0xa8] sm:$0xff]  }
   0x7   :  { %1697 = vmatpush3.bf16.msra.mxu0 %v1782_v1  ;;  %1774 = vmatpush3.bf16.msra.mxu1 %v1782_v1  ;;  %v1808_v19 = vld [vmem:[%s2286_s0 + $0xb0] sm:$0xff]   ;;  %v1793_v20 = vld [vmem:[%s2286_s0 + $0x38] sm:$0xff]   ;;  %v1794_v21 = vld [vmem:[%s2286_s0 + $0x40] sm:$0xff]  }
   0x8   :  { %1698 = vmatprep.subr.bf16.mxu0 %v1783_v2  ;;  %1770 = vmatprep.subr.bf16.mxu1 %v1783_v2  ;;  %v1809_v22 = vld [vmem:[%s2286_s0 + $0xb8] sm:$0xff]   ;;  %v1810_v23 = vld [vmem:[%s2286_s0 + $0xc0] sm:$0xff]   ;;  %v1795_v24 = vld [vmem:[%s2286_s0 + $0x48] sm:$0xff]  }
   0x9   :  { %v1796_v25 = vld [vmem:[%s2286_s0 + $0x50] sm:$0xff]   ;;  %v1811_v26 = vld [vmem:[%s2286_s0 + $0xc8] sm:$0xff]   ;;  %v1797_v28 = vld [vmem:[%s2286_s0 + $0x58] sm:$0xff]  }
   0xa   :  { %v1812_v27 = vld [vmem:[%s2286_s0 + $0xd0] sm:$0xff]   ;;  %v1798_v29 = vld [vmem:[%s2286_s0 + $0x60] sm:$0xff]   ;;  %v1813_v30 = vld [vmem:[%s2286_s0 + $0xd8] sm:$0xff]  }
   0xb   :  { %1699 = vmatpush3.bf16.msra.mxu0 %v1783_v2  ;;  %1775 = vmatpush3.bf16.msra.mxu1 %v1783_v2  ;;  %v1814_v31 = vld [vmem:[%s2286_s0 + $0xe0] sm:$0xff]   ;;  %v1799_v32 = vld [vmem:[%s2286_s0 + $0x68] sm:$0xff]   ;;  %v1800_v33 = vld [vmem:[%s2286_s0 + $0x70] sm:$0xff]  }
   0xc   :  { %1700 = vmatprep.subr.bf16.mxu0 %v1784_v4  ;;  %1771 = vmatprep.subr.bf16.mxu1 %v1784_v4  ;;  %v1815_v34 = vld [vmem:[%s2286_s0 + $0xe8] sm:$0xff]   ;;  %v1816_v35 = vld [vmem:[%s2286_s0 + $0xf0] sm:$0xff]   ;;  %v1801_v36 = vld [vmem:[%s2286_s0 + $0x78] sm:$0xff]  }
   0xd   :  { %v1817_v37 = vld [vmem:[%s2286_s0 + $0xf8] sm:$0xff]  }
   0xf   :  { %1701 = vmatpush3.bf16.msra.mxu0 %v1784_v4  ;;  %1776 = vmatpush3.bf16.msra.mxu1 %v1784_v4 }
  0x10   :  { %1778 = vmatprep.subr.msk.bf16.mxu0 %vm412_vm1, %v1785_v5  ;;  %1779 = vmatprep.subr.msk.bf16.mxu1 %vm412_vm1, %v1785_v5 }
  0x13   :  { %1703 = vmatpush3.bf16.msra.mxu0 %v414_v6  ;;  %1777 = vmatpush3.bf16.msra.mxu1 %v414_v6 }
  0x16   :  { %1705 = vmatmul.mubr.msk.bf16.vlgmr.msra.gmra.mrb[0].mxu0 %vm315_vm0, %v1787_v7  ;;  %1737 = vmatmul.mubr.msk.bf16.vlgmr.msra.gmra.mrb[0].mxu1 %vm315_vm0, %v1803_v10 }
  0x17   :  { %1708 = vmatprep.mubr.msk.bf16.mxu0 %vm315_vm0, %v1788_v8  ;;  %1740 = vmatprep.mubr.msk.bf16.mxu1 %vm315_vm0, %v1804_v11 }
  0x1e   :  { %1709 = vmatmul.mubr.msk.bf16.gmra.mrb[4].mxu0 %vm315_vm0, %v1789_v12  ;;  %1741 = vmatmul.mubr.msk.bf16.gmra.mrb[4].mxu1 %vm315_vm0, %v1805_v14 }
  0x1f   :  { %1712 = vmatprep.mubr.msk.bf16.mxu0 %vm315_vm0, %v1790_v13  ;;  %1744 = vmatprep.mubr.msk.bf16.mxu1 %vm315_vm0, %v1806_v15 }
  0x26   :  { %1713 = vmatmul.mubr.msk.bf16.gmra.mrb[8].mxu0 %vm315_vm0, %v1791_v16  ;;  %1745 = vmatmul.mubr.msk.bf16.gmra.mrb[8].mxu1 %vm315_vm0, %v1807_v18 }
  0x27   :  { %1716 = vmatprep.mubr.msk.bf16.mxu0 %vm315_vm0, %v1792_v17  ;;  %1748 = vmatprep.mubr.msk.bf16.mxu1 %vm315_vm0, %v1808_v19 }
  0x2e   :  { %1717 = vmatmul.mubr.msk.bf16.gmra.mrb[12].mxu0 %vm315_vm0, %v1793_v20  ;;  %1749 = vmatmul.mubr.msk.bf16.gmra.mrb[12].mxu1 %vm315_vm0, %v1809_v22 }
  0x2f   :  { %1720 = vmatprep.mubr.msk.bf16.mxu0 %vm315_vm0, %v1794_v21  ;;  %1752 = vmatprep.mubr.msk.bf16.mxu1 %vm315_vm0, %v1810_v23 }
  0x36   :  { %1721 = vmatmul.mubr.msk.bf16.gmra.mrb[16].mxu0 %vm315_vm0, %v1795_v24  ;;  %1753 = vmatmul.mubr.msk.bf16.gmra.mrb[16].mxu1 %vm315_vm0, %v1811_v26 }
  0x37   :  { %1724 = vmatprep.mubr.msk.bf16.mxu0 %vm315_vm0, %v1796_v25  ;;  %1756 = vmatprep.mubr.msk.bf16.mxu1 %vm315_vm0, %v1812_v27 }
  0x3e   :  { %1725 = vmatmul.mubr.msk.bf16.gmra.mrb[20].mxu0 %vm315_vm0, %v1797_v28  ;;  %1757 = vmatmul.mubr.msk.bf16.gmra.mrb[20].mxu1 %vm315_vm0, %v1813_v30 }
  0x3f   :  { %1728 = vmatprep.mubr.msk.bf16.mxu0 %vm315_vm0, %v1798_v29  ;;  %1760 = vmatprep.mubr.msk.bf16.mxu1 %vm315_vm0, %v1814_v31 }
  0x46   :  { %1729 = vmatmul.mubr.msk.bf16.gmra.mrb[24].mxu0 %vm315_vm0, %v1799_v32  ;;  %1761 = vmatmul.mubr.msk.bf16.gmra.mrb[24].mxu1 %vm315_vm0, %v1815_v34 }
  0x47   :  { %1732 = vmatprep.mubr.msk.bf16.mxu0 %vm315_vm0, %v1800_v33  ;;  %1764 = vmatprep.mubr.msk.bf16.mxu1 %vm315_vm0, %v1816_v35 }
  0x4e   :  { %1733 = vmatmul.mubr.msk.bf16.gmra.mrb[28].mxu0 %vm315_vm0, %v1801_v36  ;;  %1765 = vmatmul.mubr.msk.bf16.gmra.mrb[28].mxu1 %vm315_vm0, %v1817_v37 }
  0xe9   :  { %v1706_v39 = vpop.f32.mrb[0].mxu0  ;;  %v1985_v42 = vpop.f32.mrb[0].mxu1 }
  0xea   :  { %v450_v40 = vpop.f32.mrb[1].mxu0  ;;  %v1987_v45 = vpop.f32.mrb[1].mxu1  ;;  %v1100_v53 = vmul.f32 %v1706_v39, %v1706_v39 }
  0xeb   :  { %v1707_v41 = vpop.f32.mrb[2].mxu0  ;;  %v1098_v46 = vmul.f32 %v450_v40, %v450_v40  ;;  %v1989_v50 = vpop.f32.mrb[2].mxu1 }
  0xec   :  { %v1474_v43 = vpack.c.bf16 %v1707_v41, %v1706_v39  ;;  %v453_v44 = vpop.f32.mrb[3].mxu0  ;;  %v1554_v51 = vpack.c.bf16 %v1989_v50, %v1985_v42  ;;  %v1996_v52 = vpop.f32.mrb[3].mxu1  ;;  %v1101_v57 = vmul.f32 %v1707_v41, %v1707_v41 }
  0xed   :  { %v1469_v47 = vpack.c.bf16 %v453_v44, %v450_v40  ;;  %v1026_v48 = vadd.f32 %v453_v44, %v450_v40  ;;  %v1099_v49 = vmul.f32 %v453_v44, %v453_v44  ;;  %v1549_v56 = vpack.c.bf16 %v1996_v52, %v1987_v45 }
  0xee   :  { %1626 = vst [vmem:[%s2288_s2 + $0x8] sm:$0xff] %v1474_v43   ;;  %1642 = vst [vmem:[%s2288_s2 + $0x88] sm:$0xff] %v1554_v51  }
  0xef   :  { %1470 = vst [vmem:[%s2288_s2] sm:$0xff] %v1469_v47   ;;  %v1027_v54 = vadd.f32 %v1706_v39, %v1026_v48  ;;  %v1162_v55 = vadd.f32 %v1099_v49, %v1098_v46  ;;  %1641 = vst [vmem:[%s2288_s2 + $0x80] sm:$0xff] %v1549_v56  }
  0xf1   :  { %v1163_v58 = vadd.f32 %v1162_v55, %v1100_v53  ;;  %v1710_v59 = vpop.f32.mrb[4].mxu0  ;;  %v1028_v60 = vadd.f32 %v1707_v41, %v1027_v54  ;;  %v2009_v2 = vpop.f32.mrb[4].mxu1 }
  0xf2   :  { %v466_v61 = vpop.f32.mrb[5].mxu0  ;;  %v2011_v5 = vpop.f32.mrb[5].mxu1  ;;  %v1104_v13 = vmul.f32 %v1710_v59, %v1710_v59 }
  0xf3   :  { %v1029_v62 = vadd.f32 %v1028_v60, %v466_v61  ;;  %v1102_v63 = vmul.f32 %v466_v61, %v466_v61  ;;  %v1164_v0 = vadd.f32 %v1163_v58, %v1101_v57  ;;  %v1711_v1 = vpop.f32.mrb[6].mxu0  ;;  %v2013_v10 = vpop.f32.mrb[6].mxu1 }
  0xf4   :  { %v1484_v3 = vpack.c.bf16 %v1711_v1, %v1710_v59  ;;  %v469_v4 = vpop.f32.mrb[7].mxu0  ;;  %v1564_v11 = vpack.c.bf16 %v2013_v10, %v2009_v2  ;;  %v2020_v12 = vpop.f32.mrb[7].mxu1  ;;  %v1105_v17 = vmul.f32 %v1711_v1, %v1711_v1 }
  0xf5   :  { %v1165_v6 = vadd.f32 %v1164_v0, %v1102_v63  ;;  %v1479_v7 = vpack.c.bf16 %v469_v4, %v466_v61  ;;  %v1030_v8 = vadd.f32 %v1029_v62, %v469_v4  ;;  %v1103_v9 = vmul.f32 %v469_v4, %v469_v4 }
  0xf6   :  { %1628 = vst [vmem:[%s2288_s2 + $0x18] sm:$0xff] %v1484_v3   ;;  %v1559_v16 = vpack.c.bf16 %v2020_v12, %v2011_v5  ;;  %1644 = vst [vmem:[%s2288_s2 + $0x98] sm:$0xff] %v1564_v11  }
  0xf7   :  { %1627 = vst [vmem:[%s2288_s2 + $0x10] sm:$0xff] %v1479_v7   ;;  %v1031_v14 = vadd.f32 %v1710_v59, %v1030_v8  ;;  %v1166_v15 = vadd.f32 %v1165_v6, %v1103_v9 }
  0xf8   :  { %1643 = vst [vmem:[%s2288_s2 + $0x90] sm:$0xff] %v1559_v16  }
  0xf9   :  { %v1167_v18 = vadd.f32 %v1166_v15, %v1104_v13  ;;  %v1714_v19 = vpop.f32.mrb[8].mxu0  ;;  %v1032_v20 = vadd.f32 %v1711_v1, %v1031_v14  ;;  %v2033_v26 = vpop.f32.mrb[8].mxu1 }
  0xfa   :  { %v482_v21 = vpop.f32.mrb[9].mxu0  ;;  %v2035_v29 = vpop.f32.mrb[9].mxu1  ;;  %v1108_v37 = vmul.f32 %v1714_v19, %v1714_v19 }
  0xfb   :  { %v1033_v22 = vadd.f32 %v1032_v20, %v482_v21  ;;  %v1106_v23 = vmul.f32 %v482_v21, %v482_v21  ;;  %v1168_v24 = vadd.f32 %v1167_v18, %v1105_v17  ;;  %v1715_v25 = vpop.f32.mrb[10].mxu0  ;;  %v2037_v34 = vpop.f32.mrb[10].mxu1 }
  0xfc   :  { %v1494_v27 = vpack.c.bf16 %v1715_v25, %v1714_v19  ;;  %v485_v28 = vpop.f32.mrb[11].mxu0  ;;  %v1574_v35 = vpack.c.bf16 %v2037_v34, %v2033_v26  ;;  %v2044_v36 = vpop.f32.mrb[11].mxu1  ;;  %v1109_v41 = vmul.f32 %v1715_v25, %v1715_v25 }
  0xfd   :  { %v1169_v30 = vadd.f32 %v1168_v24, %v1106_v23  ;;  %v1489_v31 = vpack.c.bf16 %v485_v28, %v482_v21  ;;  %v1034_v32 = vadd.f32 %v1033_v22, %v485_v28  ;;  %v1107_v33 = vmul.f32 %v485_v28, %v485_v28 }
  0xfe   :  { %1630 = vst [vmem:[%s2288_s2 + $0x28] sm:$0xff] %v1494_v27   ;;  %v1569_v40 = vpack.c.bf16 %v2044_v36, %v2035_v29  ;;  %1646 = vst [vmem:[%s2288_s2 + $0xa8] sm:$0xff] %v1574_v35  }
  0xff   :  { %1629 = vst [vmem:[%s2288_s2 + $0x20] sm:$0xff] %v1489_v31   ;;  %v1035_v38 = vadd.f32 %v1714_v19, %v1034_v32  ;;  %v1170_v39 = vadd.f32 %v1169_v30, %v1107_v33 }
 0x100   :  { %1645 = vst [vmem:[%s2288_s2 + $0xa0] sm:$0xff] %v1569_v40  }
 0x101   :  { %v1171_v43 = vadd.f32 %v1170_v39, %v1108_v37  ;;  %v1718_v44 = vpop.f32.mrb[12].mxu0  ;;  %v1036_v46 = vadd.f32 %v1715_v25, %v1035_v38  ;;  %v2057_v54 = vpop.f32.mrb[12].mxu1 }
 0x102   :  { %v498_v47 = vpop.f32.mrb[13].mxu0  ;;  %v2059_v57 = vpop.f32.mrb[13].mxu1  ;;  %v1112_v1 = vmul.f32 %v1718_v44, %v1718_v44 }
 0x103   :  { %v1037_v48 = vadd.f32 %v1036_v46, %v498_v47  ;;  %v1110_v49 = vmul.f32 %v498_v47, %v498_v47  ;;  %v1172_v51 = vadd.f32 %v1171_v43, %v1109_v41  ;;  %v1719_v53 = vpop.f32.mrb[14].mxu0  ;;  %v2061_v62 = vpop.f32.mrb[14].mxu1 }
 0x104   :  { %v1504_v55 = vpack.c.bf16 %v1719_v53, %v1718_v44  ;;  %v501_v56 = vpop.f32.mrb[15].mxu0  ;;  %v1584_v63 = vpack.c.bf16 %v2061_v62, %v2057_v54  ;;  %v2068_v0 = vpop.f32.mrb[15].mxu1  ;;  %v1113_v7 = vmul.f32 %v1719_v53, %v1719_v53 }
 0x105   :  { %v1173_v58 = vadd.f32 %v1172_v51, %v1110_v49  ;;  %v1499_v59 = vpack.c.bf16 %v501_v56, %v498_v47  ;;  %v1038_v60 = vadd.f32 %v1037_v48, %v501_v56  ;;  %v1111_v61 = vmul.f32 %v501_v56, %v501_v56 }
 0x106   :  { %1632 = vst [vmem:[%s2288_s2 + $0x38] sm:$0xff] %v1504_v55   ;;  %v1579_v6 = vpack.c.bf16 %v2068_v0, %v2059_v57  ;;  %1648 = vst [vmem:[%s2288_s2 + $0xb8] sm:$0xff] %v1584_v63  }
 0x107   :  { %1631 = vst [vmem:[%s2288_s2 + $0x30] sm:$0xff] %v1499_v59   ;;  %v1039_v3 = vadd.f32 %v1718_v44, %v1038_v60  ;;  %v1174_v4 = vadd.f32 %v1173_v58, %v1111_v61 }
 0x108   :  { %1647 = vst [vmem:[%s2288_s2 + $0xb0] sm:$0xff] %v1579_v6  }
 0x109   :  { %v1175_v8 = vadd.f32 %v1174_v4, %v1112_v1  ;;  %v1722_v9 = vpop.f32.mrb[16].mxu0  ;;  %v1040_v11 = vadd.f32 %v1719_v53, %v1039_v3  ;;  %v2081_v18 = vpop.f32.mrb[16].mxu1 }
 0x10a   :  { %v514_v13 = vpop.f32.mrb[17].mxu0  ;;  %v2083_v21 = vpop.f32.mrb[17].mxu1  ;;  %v1116_v31 = vmul.f32 %v1722_v9, %v1722_v9 }
 0x10b   :  { %v1041_v14 = vadd.f32 %v1040_v11, %v514_v13  ;;  %v1114_v15 = vmul.f32 %v514_v13, %v514_v13  ;;  %v1176_v16 = vadd.f32 %v1175_v8, %v1113_v7  ;;  %v1723_v17 = vpop.f32.mrb[18].mxu0  ;;  %v2085_v27 = vpop.f32.mrb[18].mxu1 }
 0x10c   :  { %v1514_v19 = vpack.c.bf16 %v1723_v17, %v1722_v9  ;;  %v517_v20 = vpop.f32.mrb[19].mxu0  ;;  %v1594_v28 = vpack.c.bf16 %v2085_v27, %v2081_v18  ;;  %v2092_v30 = vpop.f32.mrb[19].mxu1  ;;  %v1117_v37 = vmul.f32 %v1723_v17, %v1723_v17 }
 0x10d   :  { %v1177_v22 = vadd.f32 %v1176_v16, %v1114_v15  ;;  %v1509_v23 = vpack.c.bf16 %v517_v20, %v514_v13  ;;  %v1042_v24 = vadd.f32 %v1041_v14, %v517_v20  ;;  %v1115_v25 = vmul.f32 %v517_v20, %v517_v20 }
 0x10e   :  { %1634 = vst [vmem:[%s2288_s2 + $0x48] sm:$0xff] %v1514_v19   ;;  %v1589_v35 = vpack.c.bf16 %v2092_v30, %v2083_v21  ;;  %1650 = vst [vmem:[%s2288_s2 + $0xc8] sm:$0xff] %v1594_v28  }
 0x10f   :  { %1633 = vst [vmem:[%s2288_s2 + $0x40] sm:$0xff] %v1509_v23   ;;  %v1043_v32 = vadd.f32 %v1722_v9, %v1042_v24  ;;  %v1178_v33 = vadd.f32 %v1177_v22, %v1115_v25 }
 0x110   :  { %1649 = vst [vmem:[%s2288_s2 + $0xc0] sm:$0xff] %v1589_v35  }
 0x111   :  { %v1179_v38 = vadd.f32 %v1178_v33, %v1116_v31  ;;  %v1726_v39 = vpop.f32.mrb[20].mxu0  ;;  %v1044_v40 = vadd.f32 %v1723_v17, %v1043_v32  ;;  %v2105_v48 = vpop.f32.mrb[20].mxu1 }
 0x112   :  { %v530_v41 = vpop.f32.mrb[21].mxu0  ;;  %v2107_v53 = vpop.f32.mrb[21].mxu1  ;;  %v1120_v1 = vmul.f32 %v1726_v39, %v1726_v39 }
 0x113   :  { %v1045_v43 = vadd.f32 %v1044_v40, %v530_v41  ;;  %v1118_v44 = vmul.f32 %v530_v41, %v530_v41  ;;  %v1180_v46 = vadd.f32 %v1179_v38, %v1117_v37  ;;  %v1727_v47 = vpop.f32.mrb[22].mxu0  ;;  %v2109_v60 = vpop.f32.mrb[22].mxu1 }
 0x114   :  { %v1524_v49 = vpack.c.bf16 %v1727_v47, %v1726_v39  ;;  %v533_v51 = vpop.f32.mrb[23].mxu0  ;;  %v1604_v61 = vpack.c.bf16 %v2109_v60, %v2105_v48  ;;  %v2116_v63 = vpop.f32.mrb[23].mxu1  ;;  %v1121_v7 = vmul.f32 %v1727_v47, %v1727_v47 }
 0x115   :  { %v1181_v55 = vadd.f32 %v1180_v46, %v1118_v44  ;;  %v1519_v56 = vpack.c.bf16 %v533_v51, %v530_v41  ;;  %v1046_v58 = vadd.f32 %v1045_v43, %v533_v51  ;;  %v1119_v59 = vmul.f32 %v533_v51, %v533_v51 }
 0x116   :  { %1636 = vst [vmem:[%s2288_s2 + $0x58] sm:$0xff] %v1524_v49   ;;  %v1599_v6 = vpack.c.bf16 %v2116_v63, %v2107_v53  ;;  %1652 = vst [vmem:[%s2288_s2 + $0xd8] sm:$0xff] %v1604_v61  }
 0x117   :  { %1635 = vst [vmem:[%s2288_s2 + $0x50] sm:$0xff] %v1519_v56   ;;  %v1047_v3 = vadd.f32 %v1726_v39, %v1046_v58  ;;  %v1182_v4 = vadd.f32 %v1181_v55, %v1119_v59 }
 0x118   :  { %1651 = vst [vmem:[%s2288_s2 + $0xd0] sm:$0xff] %v1599_v6  }
 0x119   :  { %v1183_v8 = vadd.f32 %v1182_v4, %v1120_v1  ;;  %v1730_v9 = vpop.f32.mrb[24].mxu0  ;;  %v1048_v11 = vadd.f32 %v1727_v47, %v1047_v3  ;;  %v2129_v19 = vpop.f32.mrb[24].mxu1 }
 0x11a   :  { %v546_v13 = vpop.f32.mrb[25].mxu0  ;;  %v2131_v23 = vpop.f32.mrb[25].mxu1  ;;  %v1124_v37 = vmul.f32 %v1730_v9, %v1730_v9 }
 0x11b   :  { %v1049_v14 = vadd.f32 %v1048_v11, %v546_v13  ;;  %v1122_v15 = vmul.f32 %v546_v13, %v546_v13  ;;  %v1184_v16 = vadd.f32 %v1183_v8, %v1121_v7  ;;  %v1731_v17 = vpop.f32.mrb[26].mxu0  ;;  %v2133_v32 = vpop.f32.mrb[26].mxu1 }
 0x11c   :  { %v1534_v20 = vpack.c.bf16 %v1731_v17, %v1730_v9  ;;  %v549_v22 = vpop.f32.mrb[27].mxu0  ;;  %v1614_v33 = vpack.c.bf16 %v2133_v32, %v2129_v19  ;;  %v2140_v35 = vpop.f32.mrb[27].mxu1  ;;  %v1125_v41 = vmul.f32 %v1731_v17, %v1731_v17 }
 0x11d   :  { %v1185_v24 = vadd.f32 %v1184_v16, %v1122_v15  ;;  %v1529_v25 = vpack.c.bf16 %v549_v22, %v546_v13  ;;  %v1050_v28 = vadd.f32 %v1049_v14, %v549_v22  ;;  %v1123_v31 = vmul.f32 %v549_v22, %v549_v22 }
 0x11e   :  { %1638 = vst [vmem:[%s2288_s2 + $0x68] sm:$0xff] %v1534_v20   ;;  %v1609_v40 = vpack.c.bf16 %v2140_v35, %v2131_v23  ;;  %1654 = vst [vmem:[%s2288_s2 + $0xe8] sm:$0xff] %v1614_v33  }
 0x11f   :  { %1637 = vst [vmem:[%s2288_s2 + $0x60] sm:$0xff] %v1529_v25   ;;  %v1051_v38 = vadd.f32 %v1730_v9, %v1050_v28  ;;  %v1186_v39 = vadd.f32 %v1185_v24, %v1123_v31  ;;  %v1130_v24 = vmul.f32 %v1987_v45, %v1987_v45 }
 0x120   :  { %1653 = vst [vmem:[%s2288_s2 + $0xe0] sm:$0xff] %v1609_v40  }
 0x121   :  { %v1187_v43 = vadd.f32 %v1186_v39, %v1124_v37  ;;  %v1734_v44 = vpop.f32.mrb[28].mxu0  ;;  %v1052_v46 = vadd.f32 %v1731_v17, %v1051_v38  ;;  %v2153_v58 = vpop.f32.mrb[28].mxu1  ;;  %v1131_v37 = vmul.f32 %v1996_v52, %v1996_v52  ;;  %v1132_v38 = vmul.f32 %v1985_v42, %v1985_v42 }
 0x122   :  { %v562_v47 = vpop.f32.mrb[29].mxu0  ;;  %v2155_v1 = vpop.f32.mrb[29].mxu1  ;;  %v1128_v13 = vmul.f32 %v1734_v44, %v1734_v44 }
 0x123   :  { %v1053_v49 = vadd.f32 %v1052_v46, %v562_v47  ;;  %v1126_v51 = vmul.f32 %v562_v47, %v562_v47  ;;  %v1188_v55 = vadd.f32 %v1187_v43, %v1125_v41  ;;  %v1735_v56 = vpop.f32.mrb[30].mxu0  ;;  %v2157_v8 = vpop.f32.mrb[30].mxu1  ;;  %v1133_v41 = vmul.f32 %v1989_v50, %v1989_v50 }
 0x124   :  { %v1544_v59 = vpack.c.bf16 %v1735_v56, %v1734_v44  ;;  %v565_v61 = vpop.f32.mrb[31].mxu0  ;;  %v1624_v9 = vpack.c.bf16 %v2157_v8, %v2153_v58  ;;  %v2164_v11 = vpop.f32.mrb[31].mxu1  ;;  %v1129_v17 = vmul.f32 %v1735_v56, %v1735_v56 }
 0x125   :  { %v1189_v3 = vadd.f32 %v1188_v55, %v1126_v51  ;;  %v1539_v4 = vpack.c.bf16 %v565_v61, %v562_v47  ;;  %v1054_v6 = vadd.f32 %v1053_v49, %v565_v61  ;;  %v1127_v7 = vmul.f32 %v565_v61, %v565_v61 }
 0x126   :  { %1640 = vst [vmem:[%s2288_s2 + $0x78] sm:$0xff] %v1544_v59   ;;  %v1619_v16 = vpack.c.bf16 %v2164_v11, %v2155_v1  ;;  %1656 = vst [vmem:[%s2288_s2 + $0xf8] sm:$0xff] %v1624_v9   ;;  %v1135_v51 = vmul.f32 %v2020_v12, %v2020_v12 }
 0x127   :  { %1639 = vst [vmem:[%s2288_s2 + $0x70] sm:$0xff] %v1539_v4   ;;  %v1055_v14 = vadd.f32 %v1734_v44, %v1054_v6  ;;  %v1190_v15 = vadd.f32 %v1189_v3, %v1127_v7  ;;  %v1139_v7 = vmul.f32 %v2044_v36, %v2044_v36 }
 0x128   :  { %1655 = vst [vmem:[%s2288_s2 + $0xf0] sm:$0xff] %v1619_v16  }
 0x129   :  { %v1191_v20 = vadd.f32 %v1190_v15, %v1128_v13  ;;  %v1056_v22 = vadd.f32 %v1735_v56, %v1055_v14 }
 0x12b   :  { %v1057_v25 = vadd.f32 %v1056_v22, %v1987_v45  ;;  %v1192_v28 = vadd.f32 %v1191_v20, %v1129_v17  ;;  %v1134_v45 = vmul.f32 %v2011_v5, %v2011_v5  ;;  %v1143_v22 = vmul.f32 %v2068_v0, %v2068_v0 }
 0x12d   :  { %v1193_v31 = vadd.f32 %v1192_v28, %v1130_v24  ;;  %v1058_v33 = vadd.f32 %v1057_v25, %v1996_v52 }
 0x12f   :  { %v1059_v39 = vadd.f32 %v1985_v42, %v1058_v33  ;;  %v1194_v40 = vadd.f32 %v1193_v31, %v1131_v37  ;;  %v1136_v42 = vmul.f32 %v2009_v2, %v2009_v2 }
 0x131   :  { %v1195_v43 = vadd.f32 %v1194_v40, %v1132_v38  ;;  %v1060_v44 = vadd.f32 %v1989_v50, %v1059_v39  ;;  %v1137_v50 = vmul.f32 %v2013_v10, %v2013_v10  ;;  %v1147_v39 = vmul.f32 %v2092_v30, %v2092_v30 }
 0x133   :  { %v1061_v46 = vadd.f32 %v1060_v44, %v2011_v5  ;;  %v1196_v47 = vadd.f32 %v1195_v43, %v1133_v41  ;;  %v1138_v5 = vmul.f32 %v2035_v29, %v2035_v29 }
 0x135   :  { %v1197_v49 = vadd.f32 %v1196_v47, %v1134_v45  ;;  %v1062_v52 = vadd.f32 %v1061_v46, %v2020_v12 }
 0x137   :  { %v1063_v55 = vadd.f32 %v2009_v2, %v1062_v52  ;;  %v1198_v56 = vadd.f32 %v1197_v49, %v1135_v51  ;;  %v1140_v2 = vmul.f32 %v2033_v26, %v2033_v26  ;;  %v1151_v49 = vmul.f32 %v2116_v63, %v2116_v63 }
 0x139   :  { %v1199_v59 = vadd.f32 %v1198_v56, %v1136_v42  ;;  %v1064_v61 = vadd.f32 %v2013_v10, %v1063_v55  ;;  %v1141_v10 = vmul.f32 %v2037_v34, %v2037_v34 }
 0x13b   :  { %v1065_v3 = vadd.f32 %v1064_v61, %v2035_v29  ;;  %v1200_v4 = vadd.f32 %v1199_v59, %v1137_v50  ;;  %v1142_v29 = vmul.f32 %v2059_v57, %v2059_v57  ;;  %v1155_v61 = vmul.f32 %v2140_v35, %v2140_v35 }
 0x13d   :  { %v1201_v6 = vadd.f32 %v1200_v4, %v1138_v5  ;;  %v1066_v12 = vadd.f32 %v1065_v3, %v2044_v36 }
 0x13f   :  { %v1067_v9 = vadd.f32 %v2033_v26, %v1066_v12  ;;  %v1202_v13 = vadd.f32 %v1201_v6, %v1139_v7  ;;  %v1144_v26 = vmul.f32 %v2057_v54, %v2057_v54 }
 0x141   :  { %v1203_v14 = vadd.f32 %v1202_v13, %v1140_v2  ;;  %v1068_v15 = vadd.f32 %v2037_v34, %v1067_v9  ;;  %v1145_v34 = vmul.f32 %v2061_v62, %v2061_v62  ;;  %v1159_v9 = vmul.f32 %v2164_v11, %v2164_v11 }
 0x143   :  { %v1069_v16 = vadd.f32 %v1068_v15, %v2059_v57  ;;  %v1204_v17 = vadd.f32 %v1203_v14, %v1141_v10  ;;  %v1146_v57 = vmul.f32 %v2083_v21, %v2083_v21 }
 0x145   :  { %v1205_v20 = vadd.f32 %v1204_v17, %v1142_v29  ;;  %v1070_v36 = vadd.f32 %v1069_v16, %v2068_v0 }
 0x147   :  { %v1071_v24 = vadd.f32 %v2057_v54, %v1070_v36  ;;  %v1206_v25 = vadd.f32 %v1205_v20, %v1143_v22  ;;  %v1148_v54 = vmul.f32 %v2081_v18, %v2081_v18 }
 0x149   :  { %v1207_v28 = vadd.f32 %v1206_v25, %v1144_v26  ;;  %v1072_v31 = vadd.f32 %v2061_v62, %v1071_v24  ;;  %v1149_v62 = vmul.f32 %v2085_v27, %v2085_v27 }
 0x14b   :  { %v1073_v33 = vadd.f32 %v1072_v31, %v2083_v21  ;;  %v1208_v37 = vadd.f32 %v1207_v28, %v1145_v34  ;;  %v1150_v21 = vmul.f32 %v2107_v53, %v2107_v53 }
 0x14d   :  { %v1209_v38 = vadd.f32 %v1208_v37, %v1146_v57  ;;  %v1074_v0 = vadd.f32 %v1073_v33, %v2092_v30 }
 0x14f   :  { %v1075_v40 = vadd.f32 %v2081_v18, %v1074_v0  ;;  %v1210_v41 = vadd.f32 %v1209_v38, %v1147_v39  ;;  %v1152_v18 = vmul.f32 %v2105_v48, %v2105_v48 }
 0x151   :  { %v1211_v43 = vadd.f32 %v1210_v41, %v1148_v54  ;;  %v1076_v44 = vadd.f32 %v2085_v27, %v1075_v40  ;;  %v1153_v27 = vmul.f32 %v2109_v60, %v2109_v60 }
 0x153   :  { %v1077_v45 = vadd.f32 %v1076_v44, %v2107_v53  ;;  %v1212_v46 = vadd.f32 %v1211_v43, %v1149_v62  ;;  %v1154_v53 = vmul.f32 %v2131_v23, %v2131_v23 }
 0x155   :  { %v1213_v47 = vadd.f32 %v1212_v46, %v1150_v21  ;;  %v1078_v30 = vadd.f32 %v1077_v45, %v2116_v63 }
 0x157   :  { %v1079_v52 = vadd.f32 %v2105_v48, %v1078_v30  ;;  %v1214_v51 = vadd.f32 %v1213_v47, %v1151_v49  ;;  %v1156_v48 = vmul.f32 %v2129_v19, %v2129_v19 }
 0x159   :  { %v1215_v42 = vadd.f32 %v1214_v51, %v1152_v18  ;;  %v1080_v55 = vadd.f32 %v2109_v60, %v1079_v52  ;;  %v1157_v60 = vmul.f32 %v2133_v32, %v2133_v32 }
 0x15b   :  { %v1081_v56 = vadd.f32 %v1080_v55, %v2131_v23  ;;  %v1216_v50 = vadd.f32 %v1215_v42, %v1153_v27  ;;  %v1158_v23 = vmul.f32 %v2155_v1, %v2155_v1 }
 0x15d   :  { %v1217_v59 = vadd.f32 %v1216_v50, %v1154_v53  ;;  %v1082_v63 = vadd.f32 %v1081_v56, %v2140_v35 }
 0x15f   :  { %v1083_v5 = vadd.f32 %v2129_v19, %v1082_v63  ;;  %v1218_v3 = vadd.f32 %v1217_v59, %v1155_v61  ;;  %v1160_v19 = vmul.f32 %v2153_v58, %v2153_v58 }
 0x161   :  { %v1219_v4 = vadd.f32 %v1218_v3, %v1156_v48  ;;  %v1084_v6 = vadd.f32 %v2133_v32, %v1083_v5  ;;  %v1161_v32 = vmul.f32 %v2157_v8, %v2157_v8 }
 0x163   :  { %v1085_v12 = vadd.f32 %v1084_v6, %v2155_v1  ;;  %v1220_v7 = vadd.f32 %v1219_v4, %v1157_v60 }
 0x165   :  { %v1221_v2 = vadd.f32 %v1220_v7, %v1158_v23  ;;  %v1086_v35 = vadd.f32 %v1085_v12, %v2164_v11 }
 0x167   :  { %v1087_v13 = vadd.f32 %v2153_v58, %v1086_v35  ;;  %v1222_v10 = vadd.f32 %v1221_v2, %v1159_v9  ;;  %v1025_v58 = vld [vmem:[%s2287_s3] sm:$0x1] }
 0x169   :  { %v1088_v14 = vadd.f32 %v2157_v8, %v1087_v13  ;;  %v1223_v15 = vadd.f32 %v1222_v10, %v1160_v19  ;;  %v1097_v8 = vld [vmem:[%s2287_s3 + $0x1] sm:$0x1] }
 0x16b   :  { %v1089_v1 = vrot.slane %v1088_v14, 4  ;;  %v1224_v29 = vadd.f32 %v1223_v15, %v1161_v32 }
 0x16d   :  { %v1090_v16 = vadd.f32 %v1089_v1, %v1088_v14  ;;  %v1225_v17 = vrot.slane %v1224_v29, 4 }
 0x16f   :  { %v1091_v20 = vrot.slane %v1090_v16, 2  ;;  %v1226_v36 = vadd.f32 %v1225_v17, %v1224_v29 }
 0x171   :  { %v1092_v22 = vadd.f32 %v1091_v20, %v1090_v16  ;;  %v1227_v11 = vrot.slane %v1226_v36, 2 }
 0x173   :  { %v1093_v26 = vrot.slane %v1092_v22, 1  ;;  %v1228_v24 = vadd.f32 %v1227_v11, %v1226_v36 }
 0x175   :  { %v1094_v25 = vadd.f32 %v1093_v26, %v1092_v22  ;;  %v1229_v34 = vrot.slane %v1228_v24, 1 }
 0x177   :  { %v1095_v28 = vadd.f32 %v1094_v25, %v1025_v58  ;;  %v1230_v31 = vadd.f32 %v1229_v34, %v1228_v24 }
 0x179   :  { %1096 = vst [vmem:[%s2287_s3] sm:$0x1] %v1095_v28  ;;  %v1231_v57 = vadd.f32 %v1230_v31, %v1097_v8 }
 0x17b   :  { %1232 = vst [vmem:[%s2287_s3 + $0x1] sm:$0x1] %v1231_v57 }

// kernel: run.50
= control target key start
LH: loop header
LB: loop body
LE: loop exit
PB: predicated region body
PF: predicated region fallthrough
CT: control target
= control target key end

     0   :  { %vm388_vm0 = vcmask 1043456   ;;  %vm291_vm1 = vcmask 195584   ;;  %v1773_v35 = vmov 0.0   ;;  %s2231_s1 = inlined_call_operand.vmem [shape: bf16[24,128], index: 1, kind: input, shape index: {}]   ;;  %s2232_s0 = inlined_call_operand.vmem [shape: bf16[512,24], index: 0, kind: input, shape index: {}]   ;;  %s2233_s3 = inlined_call_operand.vmem [shape: f32[8,128], index: 3, kind: output, shape index: {1}]   ;;  %s2234_s2 = inlined_call_operand.vmem [shape: bf16[512,128], index: 2, kind: output, shape index: {0}]  }
   0x1   :  { %v1739_v0 = vld [vmem:[%s2231_s1] sm:$0xff]   ;;  %v1740_v1 = vld [vmem:[%s2231_s1 + $0x8] ss:$0 sps:$4 sm:$0xff]   ;;  %v1743_v5 = vld [vmem:[%s2232_s0 + $0x10] sm:$0xff]   ;;  %54 = vst [vmem:[%s2233_s3] sm:$0xff] %v1773_v35 }
   0x2   :  { %1664 = vmatprep.subr.bf16.mxu0 %v1739_v0  ;;  %v1741_v2 = vld [vmem:[%s2232_s0] sm:$0xff]   ;;  %1732 = vmatprep.subr.bf16.mxu1 %v1739_v0  ;;  %v390_v3 = vsel %vm388_vm0, %v1740_v1, 0  ;;  %v1742_v4 = vld [vmem:[%s2232_s0 + $0x8] sm:$0xff]   ;;  %v1744_v6 = vld [vmem:[%s2232_s0 + $0x18] sm:$0xff]  }
   0x3   :  { %1665 = vmatpush3.bf16.msra.mxu0 %v1739_v0  ;;  %1734 = vmatpush3.bf16.msra.mxu1 %v1739_v0  ;;  %v1745_v7 = vld [vmem:[%s2232_s0 + $0x20] sm:$0xff]   ;;  %v1758_v9 = vld [vmem:[%s2232_s0 + $0x88] sm:$0xff]   ;;  %v1759_v10 = vld [vmem:[%s2232_s0 + $0x90] sm:$0xff]  }
   0x4   :  { %1736 = vmatprep.subr.msk.bf16.mxu0 %vm388_vm0, %v1740_v1  ;;  %1668 = vmatprep.mubr.msk.bf16.mxu0 %vm291_vm1, %v1741_v2  ;;  %v1757_v8 = vld [vmem:[%s2232_s0 + $0x80] sm:$0xff]   ;;  %v1746_v11 = vld [vmem:[%s2232_s0 + $0x28] sm:$0xff]   ;;  %v1747_v12 = vld [vmem:[%s2232_s0 + $0x30] sm:$0xff]  }
   0x5   :  { %1737 = vmatprep.subr.msk.bf16.mxu1 %vm388_vm0, %v1740_v1  ;;  %1700 = vmatprep.mubr.msk.bf16.mxu1 %vm291_vm1, %v1757_v8  ;;  %v1760_v13 = vld [vmem:[%s2232_s0 + $0x98] sm:$0xff]   ;;  %v1761_v14 = vld [vmem:[%s2232_s0 + $0xa0] sm:$0xff]   ;;  %v1762_v17 = vld [vmem:[%s2232_s0 + $0xa8] sm:$0xff]  }
   0x6   :  { %v1748_v15 = vld [vmem:[%s2232_s0 + $0x38] sm:$0xff]   ;;  %v1749_v16 = vld [vmem:[%s2232_s0 + $0x40] sm:$0xff]   ;;  %v1763_v18 = vld [vmem:[%s2232_s0 + $0xb0] sm:$0xff]  }
   0x7   :  { %1667 = vmatpush3.bf16.msra.mxu0 %v390_v3  ;;  %1735 = vmatpush3.bf16.msra.mxu1 %v390_v3  ;;  %v1750_v19 = vld [vmem:[%s2232_s0 + $0x48] sm:$0xff]   ;;  %v1751_v20 = vld [vmem:[%s2232_s0 + $0x50] sm:$0xff]   ;;  %v1764_v21 = vld [vmem:[%s2232_s0 + $0xb8] sm:$0xff]  }
   0x8   :  { %v1765_v22 = vld [vmem:[%s2232_s0 + $0xc0] sm:$0xff]   ;;  %v1752_v23 = vld [vmem:[%s2232_s0 + $0x58] sm:$0xff]   ;;  %v1766_v25 = vld [vmem:[%s2232_s0 + $0xc8] sm:$0xff]  }
   0x9   :  { %v1753_v24 = vld [vmem:[%s2232_s0 + $0x60] sm:$0xff]   ;;  %v1767_v26 = vld [vmem:[%s2232_s0 + $0xd0] sm:$0xff]   ;;  %v1754_v27 = vld [vmem:[%s2232_s0 + $0x68] sm:$0xff]  }
   0xa   :  { %1669 = vmatmul.mubr.msk.bf16.vlgmr.msra.gmra.mrb[0].mxu0 %vm291_vm1, %v1742_v4  ;;  %1701 = vmatmul.mubr.msk.bf16.vlgmr.msra.gmra.mrb[0].mxu1 %vm291_vm1, %v1758_v9  ;;  %v1755_v28 = vld [vmem:[%s2232_s0 + $0x70] sm:$0xff]   ;;  %v1768_v29 = vld [vmem:[%s2232_s0 + $0xd8] sm:$0xff]   ;;  %v1769_v30 = vld [vmem:[%s2232_s0 + $0xe0] sm:$0xff]  }
   0xb   :  { %1672 = vmatprep.mubr.msk.bf16.mxu0 %vm291_vm1, %v1743_v5  ;;  %1704 = vmatprep.mubr.msk.bf16.mxu1 %vm291_vm1, %v1759_v10  ;;  %v1756_v31 = vld [vmem:[%s2232_s0 + $0x78] sm:$0xff]   ;;  %v1770_v32 = vld [vmem:[%s2232_s0 + $0xe8] sm:$0xff]   ;;  %v1771_v33 = vld [vmem:[%s2232_s0 + $0xf0] sm:$0xff]  }
   0xc   :  { %v1772_v34 = vld [vmem:[%s2232_s0 + $0xf8] sm:$0xff]  }
  0x12   :  { %1673 = vmatmul.mubr.msk.bf16.gmra.mrb[4].mxu0 %vm291_vm1, %v1744_v6  ;;  %1705 = vmatmul.mubr.msk.bf16.gmra.mrb[4].mxu1 %vm291_vm1, %v1760_v13 }
  0x13   :  { %1676 = vmatprep.mubr.msk.bf16.mxu0 %vm291_vm1, %v1745_v7  ;;  %1708 = vmatprep.mubr.msk.bf16.mxu1 %vm291_vm1, %v1761_v14 }
  0x1a   :  { %1677 = vmatmul.mubr.msk.bf16.gmra.mrb[8].mxu0 %vm291_vm1, %v1746_v11  ;;  %1709 = vmatmul.mubr.msk.bf16.gmra.mrb[8].mxu1 %vm291_vm1, %v1762_v17 }
  0x1b   :  { %1680 = vmatprep.mubr.msk.bf16.mxu0 %vm291_vm1, %v1747_v12  ;;  %1712 = vmatprep.mubr.msk.bf16.mxu1 %vm291_vm1, %v1763_v18 }
  0x22   :  { %1681 = vmatmul.mubr.msk.bf16.gmra.mrb[12].mxu0 %vm291_vm1, %v1748_v15  ;;  %1713 = vmatmul.mubr.msk.bf16.gmra.mrb[12].mxu1 %vm291_vm1, %v1764_v21 }
  0x23   :  { %1684 = vmatprep.mubr.msk.bf16.mxu0 %vm291_vm1, %v1749_v16  ;;  %1716 = vmatprep.mubr.msk.bf16.mxu1 %vm291_vm1, %v1765_v22 }
  0x2a   :  { %1685 = vmatmul.mubr.msk.bf16.gmra.mrb[16].mxu0 %vm291_vm1, %v1750_v19  ;;  %1717 = vmatmul.mubr.msk.bf16.gmra.mrb[16].mxu1 %vm291_vm1, %v1766_v25 }
  0x2b   :  { %1688 = vmatprep.mubr.msk.bf16.mxu0 %vm291_vm1, %v1751_v20  ;;  %1720 = vmatprep.mubr.msk.bf16.mxu1 %vm291_vm1, %v1767_v26 }
  0x32   :  { %1689 = vmatmul.mubr.msk.bf16.gmra.mrb[20].mxu0 %vm291_vm1, %v1752_v23  ;;  %1721 = vmatmul.mubr.msk.bf16.gmra.mrb[20].mxu1 %vm291_vm1, %v1768_v29 }
  0x33   :  { %1692 = vmatprep.mubr.msk.bf16.mxu0 %vm291_vm1, %v1753_v24  ;;  %1724 = vmatprep.mubr.msk.bf16.mxu1 %vm291_vm1, %v1769_v30 }
  0x3a   :  { %1693 = vmatmul.mubr.msk.bf16.gmra.mrb[24].mxu0 %vm291_vm1, %v1754_v27  ;;  %1725 = vmatmul.mubr.msk.bf16.gmra.mrb[24].mxu1 %vm291_vm1, %v1770_v32 }
  0x3b   :  { %1696 = vmatprep.mubr.msk.bf16.mxu0 %vm291_vm1, %v1755_v28  ;;  %1728 = vmatprep.mubr.msk.bf16.mxu1 %vm291_vm1, %v1771_v33 }
  0x42   :  { %1697 = vmatmul.mubr.msk.bf16.gmra.mrb[28].mxu0 %vm291_vm1, %v1756_v31  ;;  %1729 = vmatmul.mubr.msk.bf16.gmra.mrb[28].mxu1 %vm291_vm1, %v1772_v34 }
  0xdd   :  { %v1670_v36 = vpop.f32.mrb[0].mxu0  ;;  %v1937_v59 = vpop.f32.mrb[0].mxu1 }
  0xde   :  { %v426_v37 = vpop.f32.mrb[1].mxu0  ;;  %v1076_v45 = vmul.f32 %v1670_v36, %v1670_v36  ;;  %v1939_v0 = vpop.f32.mrb[1].mxu1 }
  0xdf   :  { %v1671_v38 = vpop.f32.mrb[2].mxu0  ;;  %v1074_v41 = vmul.f32 %v426_v37, %v426_v37  ;;  %v1944_v1 = vpop.f32.mrb[2].mxu1 }
  0xe0   :  { %v1447_v39 = vpack.c.bf16 %v1671_v38, %v1670_v36  ;;  %v429_v40 = vpop.f32.mrb[3].mxu0  ;;  %v1077_v48 = vmul.f32 %v1671_v38, %v1671_v38  ;;  %v1527_v5 = vpack.c.bf16 %v1944_v1, %v1937_v59  ;;  %v1951_v6 = vpop.f32.mrb[3].mxu1 }
  0xe1   :  { %v1442_v42 = vpack.c.bf16 %v429_v40, %v426_v37  ;;  %v1002_v43 = vadd.f32 %v429_v40, %v426_v37  ;;  %v1075_v44 = vmul.f32 %v429_v40, %v429_v40  ;;  %v1522_v7 = vpack.c.bf16 %v1951_v6, %v1939_v0 }
  0xe2   :  { %1599 = vst [vmem:[%s2234_s2 + $0x8] sm:$0xff] %v1447_v39   ;;  %1615 = vst [vmem:[%s2234_s2 + $0x88] sm:$0xff] %v1527_v5  }
  0xe3   :  { %1443 = vst [vmem:[%s2234_s2] sm:$0xff] %v1442_v42   ;;  %v1003_v46 = vadd.f32 %v1670_v36, %v1002_v43  ;;  %v1138_v47 = vadd.f32 %v1075_v44, %v1074_v41  ;;  %1614 = vst [vmem:[%s2234_s2 + $0x80] sm:$0xff] %v1522_v7  }
  0xe5   :  { %v1139_v49 = vadd.f32 %v1138_v47, %v1076_v45  ;;  %v1674_v50 = vpop.f32.mrb[4].mxu0  ;;  %v1004_v51 = vadd.f32 %v1671_v38, %v1003_v46  ;;  %v1961_v19 = vpop.f32.mrb[4].mxu1 }
  0xe6   :  { %v442_v52 = vpop.f32.mrb[5].mxu0  ;;  %v1080_v2 = vmul.f32 %v1674_v50, %v1674_v50  ;;  %v1963_v24 = vpop.f32.mrb[5].mxu1 }
  0xe7   :  { %v1005_v53 = vadd.f32 %v1004_v51, %v442_v52  ;;  %v1078_v54 = vmul.f32 %v442_v52, %v442_v52  ;;  %v1140_v55 = vadd.f32 %v1139_v49, %v1077_v48  ;;  %v1675_v56 = vpop.f32.mrb[6].mxu0  ;;  %v1968_v25 = vpop.f32.mrb[6].mxu1 }
  0xe8   :  { %v1457_v57 = vpack.c.bf16 %v1675_v56, %v1674_v50  ;;  %v445_v58 = vpop.f32.mrb[7].mxu0  ;;  %v1081_v8 = vmul.f32 %v1675_v56, %v1675_v56  ;;  %v1537_v29 = vpack.c.bf16 %v1968_v25, %v1961_v19  ;;  %v1975_v30 = vpop.f32.mrb[7].mxu1 }
  0xe9   :  { %v1141_v60 = vadd.f32 %v1140_v55, %v1078_v54  ;;  %v1452_v61 = vpack.c.bf16 %v445_v58, %v442_v52  ;;  %v1006_v62 = vadd.f32 %v1005_v53, %v445_v58  ;;  %v1079_v63 = vmul.f32 %v445_v58, %v445_v58 }
  0xea   :  { %1601 = vst [vmem:[%s2234_s2 + $0x18] sm:$0xff] %v1457_v57   ;;  %v1532_v31 = vpack.c.bf16 %v1975_v30, %v1963_v24  ;;  %1617 = vst [vmem:[%s2234_s2 + $0x98] sm:$0xff] %v1537_v29  }
  0xeb   :  { %1600 = vst [vmem:[%s2234_s2 + $0x10] sm:$0xff] %v1452_v61   ;;  %v1007_v3 = vadd.f32 %v1674_v50, %v1006_v62  ;;  %v1142_v4 = vadd.f32 %v1141_v60, %v1079_v63 }
  0xec   :  { %1616 = vst [vmem:[%s2234_s2 + $0x90] sm:$0xff] %v1532_v31  }
  0xed   :  { %v1143_v9 = vadd.f32 %v1142_v4, %v1080_v2  ;;  %v1678_v10 = vpop.f32.mrb[8].mxu0  ;;  %v1008_v11 = vadd.f32 %v1675_v56, %v1007_v3  ;;  %v1985_v43 = vpop.f32.mrb[8].mxu1 }
  0xee   :  { %v458_v12 = vpop.f32.mrb[9].mxu0  ;;  %v1084_v26 = vmul.f32 %v1678_v10, %v1678_v10  ;;  %v1987_v48 = vpop.f32.mrb[9].mxu1 }
  0xef   :  { %v1009_v13 = vadd.f32 %v1008_v11, %v458_v12  ;;  %v1082_v14 = vmul.f32 %v458_v12, %v458_v12  ;;  %v1144_v15 = vadd.f32 %v1143_v9, %v1081_v8  ;;  %v1679_v16 = vpop.f32.mrb[10].mxu0  ;;  %v1992_v49 = vpop.f32.mrb[10].mxu1 }
  0xf0   :  { %v1467_v17 = vpack.c.bf16 %v1679_v16, %v1678_v10  ;;  %v461_v18 = vpop.f32.mrb[11].mxu0  ;;  %v1085_v32 = vmul.f32 %v1679_v16, %v1679_v16  ;;  %v1547_v53 = vpack.c.bf16 %v1992_v49, %v1985_v43  ;;  %v1999_v54 = vpop.f32.mrb[11].mxu1 }
  0xf1   :  { %v1145_v20 = vadd.f32 %v1144_v15, %v1082_v14  ;;  %v1462_v21 = vpack.c.bf16 %v461_v18, %v458_v12  ;;  %v1010_v22 = vadd.f32 %v1009_v13, %v461_v18  ;;  %v1083_v23 = vmul.f32 %v461_v18, %v461_v18 }
  0xf2   :  { %1603 = vst [vmem:[%s2234_s2 + $0x28] sm:$0xff] %v1467_v17   ;;  %v1542_v55 = vpack.c.bf16 %v1999_v54, %v1987_v48  ;;  %1619 = vst [vmem:[%s2234_s2 + $0xa8] sm:$0xff] %v1547_v53  }
  0xf3   :  { %1602 = vst [vmem:[%s2234_s2 + $0x20] sm:$0xff] %v1462_v21   ;;  %v1011_v27 = vadd.f32 %v1678_v10, %v1010_v22  ;;  %v1146_v28 = vadd.f32 %v1145_v20, %v1083_v23 }
  0xf4   :  { %1618 = vst [vmem:[%s2234_s2 + $0xa0] sm:$0xff] %v1542_v55  }
  0xf5   :  { %v1147_v33 = vadd.f32 %v1146_v28, %v1084_v26  ;;  %v1682_v34 = vpop.f32.mrb[12].mxu0  ;;  %v1012_v35 = vadd.f32 %v1679_v16, %v1011_v27  ;;  %v2009_v7 = vpop.f32.mrb[12].mxu1 }
  0xf6   :  { %v474_v36 = vpop.f32.mrb[13].mxu0  ;;  %v1088_v50 = vmul.f32 %v1682_v34, %v1682_v34  ;;  %v2011_v12 = vpop.f32.mrb[13].mxu1 }
  0xf7   :  { %v1013_v37 = vadd.f32 %v1012_v35, %v474_v36  ;;  %v1086_v38 = vmul.f32 %v474_v36, %v474_v36  ;;  %v1148_v39 = vadd.f32 %v1147_v33, %v1085_v32  ;;  %v1683_v40 = vpop.f32.mrb[14].mxu0  ;;  %v2016_v13 = vpop.f32.mrb[14].mxu1 }
  0xf8   :  { %v1477_v41 = vpack.c.bf16 %v1683_v40, %v1682_v34  ;;  %v477_v42 = vpop.f32.mrb[15].mxu0  ;;  %v1089_v56 = vmul.f32 %v1683_v40, %v1683_v40  ;;  %v1557_v17 = vpack.c.bf16 %v2016_v13, %v2009_v7  ;;  %v2023_v18 = vpop.f32.mrb[15].mxu1 }
  0xf9   :  { %v1149_v44 = vadd.f32 %v1148_v39, %v1086_v38  ;;  %v1472_v45 = vpack.c.bf16 %v477_v42, %v474_v36  ;;  %v1014_v46 = vadd.f32 %v1013_v37, %v477_v42  ;;  %v1087_v47 = vmul.f32 %v477_v42, %v477_v42 }
  0xfa   :  { %1605 = vst [vmem:[%s2234_s2 + $0x38] sm:$0xff] %v1477_v41   ;;  %v1552_v20 = vpack.c.bf16 %v2023_v18, %v2011_v12  ;;  %1621 = vst [vmem:[%s2234_s2 + $0xb8] sm:$0xff] %v1557_v17  }
  0xfb   :  { %1604 = vst [vmem:[%s2234_s2 + $0x30] sm:$0xff] %v1472_v45   ;;  %v1015_v51 = vadd.f32 %v1682_v34, %v1014_v46  ;;  %v1150_v52 = vadd.f32 %v1149_v44, %v1087_v47 }
  0xfc   :  { %1620 = vst [vmem:[%s2234_s2 + $0xb0] sm:$0xff] %v1552_v20  }
  0xfd   :  { %v1151_v57 = vadd.f32 %v1150_v52, %v1088_v50  ;;  %v1686_v58 = vpop.f32.mrb[16].mxu0  ;;  %v1016_v60 = vadd.f32 %v1683_v40, %v1015_v51  ;;  %v2033_v35 = vpop.f32.mrb[16].mxu1 }
  0xfe   :  { %v490_v61 = vpop.f32.mrb[17].mxu0  ;;  %v1092_v14 = vmul.f32 %v1686_v58, %v1686_v58  ;;  %v2035_v40 = vpop.f32.mrb[17].mxu1 }
  0xff   :  { %v1017_v62 = vadd.f32 %v1016_v60, %v490_v61  ;;  %v1090_v63 = vmul.f32 %v490_v61, %v490_v61  ;;  %v1152_v2 = vadd.f32 %v1151_v57, %v1089_v56  ;;  %v1687_v3 = vpop.f32.mrb[18].mxu0  ;;  %v2040_v41 = vpop.f32.mrb[18].mxu1 }
 0x100   :  { %v1487_v4 = vpack.c.bf16 %v1687_v3, %v1686_v58  ;;  %v493_v5 = vpop.f32.mrb[19].mxu0  ;;  %v1093_v21 = vmul.f32 %v1687_v3, %v1687_v3  ;;  %v1567_v46 = vpack.c.bf16 %v2040_v41, %v2033_v35  ;;  %v2047_v47 = vpop.f32.mrb[19].mxu1 }
 0x101   :  { %v1153_v8 = vadd.f32 %v1152_v2, %v1090_v63  ;;  %v1482_v9 = vpack.c.bf16 %v493_v5, %v490_v61  ;;  %v1018_v10 = vadd.f32 %v1017_v62, %v493_v5  ;;  %v1091_v11 = vmul.f32 %v493_v5, %v493_v5 }
 0x102   :  { %1607 = vst [vmem:[%s2234_s2 + $0x48] sm:$0xff] %v1487_v4   ;;  %v1562_v50 = vpack.c.bf16 %v2047_v47, %v2035_v40  ;;  %1623 = vst [vmem:[%s2234_s2 + $0xc8] sm:$0xff] %v1567_v46  }
 0x103   :  { %1606 = vst [vmem:[%s2234_s2 + $0x40] sm:$0xff] %v1482_v9   ;;  %v1019_v15 = vadd.f32 %v1686_v58, %v1018_v10  ;;  %v1154_v16 = vadd.f32 %v1153_v8, %v1091_v11 }
 0x104   :  { %1622 = vst [vmem:[%s2234_s2 + $0xc0] sm:$0xff] %v1562_v50  }
 0x105   :  { %v1155_v22 = vadd.f32 %v1154_v16, %v1092_v14  ;;  %v1690_v23 = vpop.f32.mrb[20].mxu0  ;;  %v1020_v26 = vadd.f32 %v1687_v3, %v1019_v15  ;;  %v2057_v2 = vpop.f32.mrb[20].mxu1 }
 0x106   :  { %v506_v27 = vpop.f32.mrb[21].mxu0  ;;  %v1096_v42 = vmul.f32 %v1690_v23, %v1690_v23  ;;  %v2059_v9 = vpop.f32.mrb[21].mxu1 }
 0x107   :  { %v1021_v28 = vadd.f32 %v1020_v26, %v506_v27  ;;  %v1094_v29 = vmul.f32 %v506_v27, %v506_v27  ;;  %v1156_v31 = vadd.f32 %v1155_v22, %v1093_v21  ;;  %v1691_v32 = vpop.f32.mrb[22].mxu0  ;;  %v2064_v10 = vpop.f32.mrb[22].mxu1 }
 0x108   :  { %v1497_v33 = vpack.c.bf16 %v1691_v32, %v1690_v23  ;;  %v509_v34 = vpop.f32.mrb[23].mxu0  ;;  %v1097_v51 = vmul.f32 %v1691_v32, %v1691_v32  ;;  %v1577_v16 = vpack.c.bf16 %v2064_v10, %v2057_v2  ;;  %v2071_v17 = vpop.f32.mrb[23].mxu1 }
 0x109   :  { %v1157_v36 = vadd.f32 %v1156_v31, %v1094_v29  ;;  %v1492_v37 = vpack.c.bf16 %v509_v34, %v506_v27  ;;  %v1022_v38 = vadd.f32 %v1021_v28, %v509_v34  ;;  %v1095_v39 = vmul.f32 %v509_v34, %v509_v34 }
 0x10a   :  { %1609 = vst [vmem:[%s2234_s2 + $0x58] sm:$0xff] %v1497_v33   ;;  %v1572_v20 = vpack.c.bf16 %v2071_v17, %v2059_v9  ;;  %1625 = vst [vmem:[%s2234_s2 + $0xd8] sm:$0xff] %v1577_v16  }
 0x10b   :  { %1608 = vst [vmem:[%s2234_s2 + $0x50] sm:$0xff] %v1492_v37   ;;  %v1023_v44 = vadd.f32 %v1690_v23, %v1022_v38  ;;  %v1158_v45 = vadd.f32 %v1157_v36, %v1095_v39 }
 0x10c   :  { %1624 = vst [vmem:[%s2234_s2 + $0xd0] sm:$0xff] %v1572_v20  }
 0x10d   :  { %v1159_v52 = vadd.f32 %v1158_v45, %v1096_v42  ;;  %v1694_v53 = vpop.f32.mrb[24].mxu0  ;;  %v1024_v55 = vadd.f32 %v1691_v32, %v1023_v44  ;;  %v2081_v36 = vpop.f32.mrb[24].mxu1 }
 0x10e   :  { %v522_v56 = vpop.f32.mrb[25].mxu0  ;;  %v1100_v11 = vmul.f32 %v1694_v53, %v1694_v53  ;;  %v2083_v44 = vpop.f32.mrb[25].mxu1 }
 0x10f   :  { %v1025_v57 = vadd.f32 %v1024_v55, %v522_v56  ;;  %v1098_v58 = vmul.f32 %v522_v56, %v522_v56  ;;  %v1160_v60 = vadd.f32 %v1159_v52, %v1097_v51  ;;  %v1695_v61 = vpop.f32.mrb[26].mxu0  ;;  %v2088_v45 = vpop.f32.mrb[26].mxu1 }
 0x110   :  { %v1507_v62 = vpack.c.bf16 %v1695_v61, %v1694_v53  ;;  %v525_v63 = vpop.f32.mrb[27].mxu0  ;;  %v1101_v21 = vmul.f32 %v1695_v61, %v1695_v61  ;;  %v1587_v52 = vpack.c.bf16 %v2088_v45, %v2081_v36 }
 0x111   :  { %v1161_v3 = vadd.f32 %v1160_v60, %v1098_v58  ;;  %v1502_v4 = vpack.c.bf16 %v525_v63, %v522_v56  ;;  %v1026_v5 = vadd.f32 %v1025_v57, %v525_v63  ;;  %v1099_v8 = vmul.f32 %v525_v63, %v525_v63 }
 0x112   :  { %1611 = vst [vmem:[%s2234_s2 + $0x68] sm:$0xff] %v1507_v62   ;;  %v1106_v60 = vmul.f32 %v1939_v0, %v1939_v0  ;;  %1627 = vst [vmem:[%s2234_s2 + $0xe8] sm:$0xff] %v1587_v52  }
 0x113   :  { %1610 = vst [vmem:[%s2234_s2 + $0x60] sm:$0xff] %v1502_v4   ;;  %v1027_v14 = vadd.f32 %v1694_v53, %v1026_v5  ;;  %v1162_v15 = vadd.f32 %v1161_v3, %v1099_v8  ;;  %v2095_v53 = vpop.f32.mrb[27].mxu1  ;;  %v1107_v5 = vmul.f32 %v1951_v6, %v1951_v6 }
 0x114   :  { %v1582_v55 = vpack.c.bf16 %v2095_v53, %v2083_v44 }
 0x115   :  { %v1163_v22 = vadd.f32 %v1162_v15, %v1100_v11  ;;  %v1698_v23 = vpop.f32.mrb[28].mxu0  ;;  %v1028_v26 = vadd.f32 %v1695_v61, %v1027_v14  ;;  %v2108_v63 = vpop.f32.mrb[28].mxu1  ;;  %v1108_v14 = vmul.f32 %v1937_v59, %v1937_v59 }
 0x116   :  { %v538_v27 = vpop.f32.mrb[29].mxu0  ;;  %v1104_v46 = vmul.f32 %v1698_v23, %v1698_v23  ;;  %1626 = vst [vmem:[%s2234_s2 + $0xe0] sm:$0xff] %v1582_v55   ;;  %v2113_v8 = vpop.f32.mrb[29].mxu1 }
 0x117   :  { %v1029_v28 = vadd.f32 %v1028_v26, %v538_v27  ;;  %v1102_v29 = vmul.f32 %v538_v27, %v538_v27  ;;  %v1164_v31 = vadd.f32 %v1163_v22, %v1101_v21  ;;  %v1699_v32 = vpop.f32.mrb[30].mxu0  ;;  %v2115_v11 = vpop.f32.mrb[30].mxu1  ;;  %v1110_v26 = vmul.f32 %v1963_v24, %v1963_v24 }
 0x118   :  { %v1517_v33 = vpack.c.bf16 %v1699_v32, %v1698_v23  ;;  %v541_v34 = vpop.f32.mrb[31].mxu0  ;;  %v1105_v56 = vmul.f32 %v1699_v32, %v1699_v32  ;;  %v2122_v20 = vpop.f32.mrb[31].mxu1 }
 0x119   :  { %v1165_v37 = vadd.f32 %v1164_v31, %v1102_v29  ;;  %v1512_v38 = vpack.c.bf16 %v541_v34, %v538_v27  ;;  %v1030_v39 = vadd.f32 %v1029_v28, %v541_v34  ;;  %v1103_v42 = vmul.f32 %v541_v34, %v541_v34 }
 0x11a   :  { %1613 = vst [vmem:[%s2234_s2 + $0x78] sm:$0xff] %v1517_v33   ;;  %v1592_v21 = vpack.c.bf16 %v2122_v20, %v2113_v8  ;;  %v1112_v31 = vmul.f32 %v1961_v19, %v1961_v19  ;;  %v1113_v34 = vmul.f32 %v1968_v25, %v1968_v25 }
 0x11b   :  { %1612 = vst [vmem:[%s2234_s2 + $0x70] sm:$0xff] %v1512_v38   ;;  %v1031_v50 = vadd.f32 %v1698_v23, %v1030_v39  ;;  %v1166_v51 = vadd.f32 %v1165_v37, %v1103_v42 }
 0x11c   :  { %1628 = vst [vmem:[%s2234_s2 + $0xf0] sm:$0xff] %v1592_v21  }
 0x11d   :  { %v1167_v57 = vadd.f32 %v1166_v51, %v1104_v46  ;;  %v1032_v58 = vadd.f32 %v1699_v32, %v1031_v50  ;;  %v1115_v50 = vmul.f32 %v1999_v54, %v1999_v54 }
 0x11f   :  { %v1033_v61 = vadd.f32 %v1032_v58, %v1939_v0  ;;  %v1168_v62 = vadd.f32 %v1167_v57, %v1105_v56  ;;  %v1597_v0 = vpack.c.bf16 %v2115_v11, %v2108_v63 }
 0x121   :  { %v1169_v3 = vadd.f32 %v1168_v62, %v1106_v60  ;;  %v1034_v4 = vadd.f32 %v1033_v61, %v1951_v6  ;;  %v1109_v6 = vmul.f32 %v1944_v1, %v1944_v1  ;;  %1629 = vst [vmem:[%s2234_s2 + $0xf8] sm:$0xff] %v1597_v0   ;;  %v1119_v61 = vmul.f32 %v2023_v18, %v2023_v18 }
 0x122   :  { %v1123_v0 = vmul.f32 %v2047_v47, %v2047_v47 }
 0x123   :  { %v1035_v15 = vadd.f32 %v1937_v59, %v1034_v4  ;;  %v1170_v16 = vadd.f32 %v1169_v3, %v1107_v5 }
 0x125   :  { %v1171_v22 = vadd.f32 %v1170_v16, %v1108_v14  ;;  %v1036_v23 = vadd.f32 %v1944_v1, %v1035_v15  ;;  %v1111_v1 = vmul.f32 %v1975_v30, %v1975_v30 }
 0x127   :  { %v1037_v59 = vadd.f32 %v1036_v23, %v1963_v24  ;;  %v1172_v27 = vadd.f32 %v1171_v22, %v1109_v6  ;;  %v1114_v24 = vmul.f32 %v1987_v48, %v1987_v48 }
 0x129   :  { %v1173_v28 = vadd.f32 %v1172_v27, %v1110_v26  ;;  %v1038_v29 = vadd.f32 %v1037_v59, %v1975_v30 }
 0x12b   :  { %v1039_v32 = vadd.f32 %v1961_v19, %v1038_v29  ;;  %v1174_v33 = vadd.f32 %v1173_v28, %v1111_v1  ;;  %v1116_v19 = vmul.f32 %v1985_v43, %v1985_v43  ;;  %v1127_v28 = vmul.f32 %v2071_v17, %v2071_v17 }
 0x12d   :  { %v1175_v37 = vadd.f32 %v1174_v33, %v1112_v31  ;;  %v1040_v38 = vadd.f32 %v1968_v25, %v1039_v32  ;;  %v1117_v25 = vmul.f32 %v1992_v49, %v1992_v49 }
 0x12f   :  { %v1041_v39 = vadd.f32 %v1040_v38, %v1987_v48  ;;  %v1176_v42 = vadd.f32 %v1175_v37, %v1113_v34  ;;  %v1118_v48 = vmul.f32 %v2011_v12, %v2011_v12  ;;  %v1131_v38 = vmul.f32 %v2095_v53, %v2095_v53 }
 0x131   :  { %v1177_v46 = vadd.f32 %v1176_v42, %v1114_v24  ;;  %v1042_v30 = vadd.f32 %v1041_v39, %v1999_v54 }
 0x133   :  { %v1043_v51 = vadd.f32 %v1985_v43, %v1042_v30  ;;  %v1178_v52 = vadd.f32 %v1177_v46, %v1115_v50  ;;  %v1120_v43 = vmul.f32 %v2009_v7, %v2009_v7 }
 0x135   :  { %v1179_v55 = vadd.f32 %v1178_v52, %v1116_v19  ;;  %v1044_v56 = vadd.f32 %v1992_v49, %v1043_v51  ;;  %v1121_v49 = vmul.f32 %v2016_v13, %v2016_v13  ;;  %v1135_v51 = vmul.f32 %v2122_v20, %v2122_v20 }
 0x137   :  { %v1045_v57 = vadd.f32 %v1044_v56, %v2011_v12  ;;  %v1180_v58 = vadd.f32 %v1179_v55, %v1117_v25  ;;  %v1122_v12 = vmul.f32 %v2035_v40, %v2035_v40 }
 0x139   :  { %v1181_v60 = vadd.f32 %v1180_v58, %v1118_v48  ;;  %v1046_v54 = vadd.f32 %v1045_v57, %v2023_v18 }
 0x13b   :  { %v1047_v62 = vadd.f32 %v2009_v7, %v1046_v54  ;;  %v1182_v3 = vadd.f32 %v1181_v60, %v1119_v61  ;;  %v1124_v7 = vmul.f32 %v2033_v35, %v2033_v35 }
 0x13d   :  { %v1183_v4 = vadd.f32 %v1182_v3, %v1120_v43  ;;  %v1048_v5 = vadd.f32 %v2016_v13, %v1047_v62  ;;  %v1125_v13 = vmul.f32 %v2040_v41, %v2040_v41 }
 0x13f   :  { %v1049_v14 = vadd.f32 %v1048_v5, %v2035_v40  ;;  %v1184_v15 = vadd.f32 %v1183_v4, %v1121_v49  ;;  %v1126_v40 = vmul.f32 %v2059_v9, %v2059_v9 }
 0x141   :  { %v1185_v16 = vadd.f32 %v1184_v15, %v1122_v12  ;;  %v1050_v18 = vadd.f32 %v1049_v14, %v2047_v47 }
 0x143   :  { %v1051_v21 = vadd.f32 %v2033_v35, %v1050_v18  ;;  %v1186_v6 = vadd.f32 %v1185_v16, %v1123_v0  ;;  %v1128_v35 = vmul.f32 %v2057_v2, %v2057_v2 }
 0x145   :  { %v1187_v22 = vadd.f32 %v1186_v6, %v1124_v7  ;;  %v1052_v23 = vadd.f32 %v2040_v41, %v1051_v21  ;;  %v1129_v41 = vmul.f32 %v2064_v10, %v2064_v10 }
 0x147   :  { %v1053_v26 = vadd.f32 %v1052_v23, %v2059_v9  ;;  %v1188_v59 = vadd.f32 %v1187_v22, %v1125_v13  ;;  %v1130_v9 = vmul.f32 %v2083_v44, %v2083_v44 }
 0x149   :  { %v1189_v27 = vadd.f32 %v1188_v59, %v1126_v40  ;;  %v1054_v47 = vadd.f32 %v1053_v26, %v2071_v17 }
 0x14b   :  { %v1055_v29 = vadd.f32 %v2057_v2, %v1054_v47  ;;  %v1190_v1 = vadd.f32 %v1189_v27, %v1127_v28  ;;  %v1132_v2 = vmul.f32 %v2081_v36, %v2081_v36 }
 0x14d   :  { %v1191_v31 = vadd.f32 %v1190_v1, %v1128_v35  ;;  %v1056_v32 = vadd.f32 %v2064_v10, %v1055_v29  ;;  %v1133_v10 = vmul.f32 %v2088_v45, %v2088_v45 }
 0x14f   :  { %v1057_v33 = vadd.f32 %v1056_v32, %v2083_v44  ;;  %v1192_v34 = vadd.f32 %v1191_v31, %v1129_v41  ;;  %v1134_v44 = vmul.f32 %v2113_v8, %v2113_v8 }
 0x151   :  { %v1193_v37 = vadd.f32 %v1192_v34, %v1130_v9  ;;  %v1058_v17 = vadd.f32 %v1057_v33, %v2095_v53 }
 0x153   :  { %v1059_v24 = vadd.f32 %v2081_v36, %v1058_v17  ;;  %v1194_v39 = vadd.f32 %v1193_v37, %v1131_v38  ;;  %v1136_v36 = vmul.f32 %v2108_v63, %v2108_v63 }
 0x155   :  { %v1195_v42 = vadd.f32 %v1194_v39, %v1132_v2  ;;  %v1060_v46 = vadd.f32 %v2088_v45, %v1059_v24  ;;  %v1137_v45 = vmul.f32 %v2115_v11, %v2115_v11 }
 0x157   :  { %v1061_v30 = vadd.f32 %v1060_v46, %v2113_v8  ;;  %v1196_v50 = vadd.f32 %v1195_v42, %v1133_v10 }
 0x159   :  { %v1197_v19 = vadd.f32 %v1196_v50, %v1134_v44  ;;  %v1062_v53 = vadd.f32 %v1061_v30, %v2122_v20 }
 0x15b   :  { %v1063_v52 = vadd.f32 %v2108_v63, %v1062_v53  ;;  %v1198_v25 = vadd.f32 %v1197_v19, %v1135_v51  ;;  %v1001_v63 = vld [vmem:[%s2233_s3] sm:$0x1] }
 0x15d   :  { %v1064_v55 = vadd.f32 %v2115_v11, %v1063_v52  ;;  %v1199_v56 = vadd.f32 %v1198_v25, %v1136_v36  ;;  %v1073_v11 = vld [vmem:[%s2233_s3 + $0x1] sm:$0x1] }
 0x15f   :  { %v1065_v8 = vrot.slane %v1064_v55, 4  ;;  %v1200_v48 = vadd.f32 %v1199_v56, %v1137_v45 }
 0x161   :  { %v1066_v57 = vadd.f32 %v1065_v8, %v1064_v55  ;;  %v1201_v58 = vrot.slane %v1200_v48, 4 }
 0x163   :  { %v1067_v60 = vrot.slane %v1066_v57, 2  ;;  %v1202_v54 = vadd.f32 %v1201_v58, %v1200_v48 }
 0x165   :  { %v1068_v61 = vadd.f32 %v1067_v60, %v1066_v57  ;;  %v1203_v20 = vrot.slane %v1202_v54, 2 }
 0x167   :  { %v1069_v43 = vrot.slane %v1068_v61, 1  ;;  %v1204_v62 = vadd.f32 %v1203_v20, %v1202_v54 }
 0x169   :  { %v1070_v3 = vadd.f32 %v1069_v43, %v1068_v61  ;;  %v1205_v49 = vrot.slane %v1204_v62, 1 }
 0x16b   :  { %v1071_v4 = vadd.f32 %v1070_v3, %v1001_v63  ;;  %v1206_v5 = vadd.f32 %v1205_v49, %v1204_v62 }
 0x16d   :  { %1072 = vst [vmem:[%s2233_s3] sm:$0x1] %v1071_v4  ;;  %v1207_v12 = vadd.f32 %v1206_v5, %v1073_v11 }
 0x16f   :  { %1208 = vst [vmem:[%s2233_s3 + $0x1] sm:$0x1] %v1207_v12 }

// kernel: run.63
= control target key start
LH: loop header
LB: loop body
LE: loop exit
PB: predicated region body
PF: predicated region fallthrough
CT: control target
= control target key end

     0   :  { %s184_s0 = inlined_call_operand.vmem [shape: bf16[32,128], index: 0, kind: input, shape index: {}]   ;;  %s185_s1 = inlined_call_operand.vmem [shape: f32[1,128], index: 1, kind: input, shape index: {}]   ;;  %s186_s2 = inlined_call_operand.vmem [shape: f32[1,128], index: 2, kind: input, shape index: {}]   ;;  %s187_s3 = inlined_call_operand.vmem [shape: bf16[32,128], index: 3, kind: output, shape index: {}]  }
   0x1   :  { %v111_v0 = vld [vmem:[%s184_s0] sm:$0xff]   ;;  %v128_v4 = vld [vmem:[%s184_s0 + $0x8] sm:$0xff]  }
   0x2   :  { %v96_v1 = vld [vmem:[%s185_s1] ss:$0 sm:$0xff]  ;;  %v112_v2 = vunpack.c.l.bf16 %v111_v0  ;;  %v113_v3 = vunpack.c.h.bf16 %v111_v0  ;;  %v116_v6 = vunpack.c.l.bf16 %v128_v4  ;;  %v117_v7 = vunpack.c.h.bf16 %v128_v4 }
   0x3   :  { %v97_v5 = vld [vmem:[%s186_s2] ss:$0 sm:$0xff] }
   0x4   :  { %v29_v8 = vmul.f32 %v112_v2, %v96_v1  ;;  %v30_v9 = vmul.f32 %v113_v3, %v96_v1  ;;  %v31_v10 = vmul.f32 %v116_v6, %v96_v1  ;;  %v32_v11 = vmul.f32 %v117_v7, %v96_v1 }
   0x6   :  { %v40_v12 = vadd.f32 %v97_v5, %v29_v8  ;;  %v41_v13 = vadd.f32 %v97_v5, %v30_v9  ;;  %v42_v14 = vadd.f32 %v97_v5, %v31_v10  ;;  %v43_v15 = vadd.f32 %v97_v5, %v32_v11 }
   0x8   :  { %v98_v16 = vmul.f32 -1.442695, %v40_v12  ;;  %v99_v17 = vmul.f32 -1.442695, %v41_v13  ;;  %v100_v18 = vmul.f32 -1.442695, %v42_v14 }
   0x9   :  { %v101_v19 = vmul.f32 -1.442695, %v43_v15 }
   0xa   :  { %130 = vpow2.f32 %v98_v16 }
   0xb   :  { %132 = vpow2.f32 %v99_v17 }
   0xc   :  { %134 = vpow2.f32 %v100_v18 }
   0xd   :  { %136 = vpow2.f32 %v101_v19 }
  0x14   :  { %v131_v20 = vpop.eup %130 }
  0x15   :  { %v133_v21 = vpop.eup %132  ;;  %v56_v22 = vadd.f32 1.0, %v131_v20 }
  0x16   :  { %v135_v23 = vpop.eup %134  ;;  %v57_v24 = vadd.f32 1.0, %v133_v21 }
  0x17   :  { %v137_v25 = vpop.eup %136  ;;  %138 = vrcp.f32 %v56_v22  ;;  %v58_v26 = vadd.f32 1.0, %v135_v23 }
  0x18   :  { %140 = vrcp.f32 %v57_v24  ;;  %v59_v27 = vadd.f32 1.0, %v137_v25 }
  0x19   :  { %142 = vrcp.f32 %v58_v26 }
  0x1a   :  { %144 = vrcp.f32 %v59_v27 }
  0x21   :  { %v139_v28 = vpop.eup %138 }
  0x22   :  { %v141_v29 = vpop.eup %140  ;;  %v68_v30 = vmul.f32 %v139_v28, %v40_v12 }
  0x23   :  { %v143_v31 = vpop.eup %142  ;;  %v69_v32 = vmul.f32 %v141_v29, %v41_v13 }
  0x24   :  { %v145_v33 = vpop.eup %144  ;;  %v70_v34 = vmul.f32 %v143_v31, %v42_v14 }
  0x25   :  { %v121_v35 = vpack.c.bf16 %v69_v32, %v68_v30  ;;  %v71_v36 = vmul.f32 %v145_v33, %v43_v15 }
  0x27   :  { %122 = vst [vmem:[%s187_s3] sm:$0xff] %v121_v35   ;;  %v126_v37 = vpack.c.bf16 %v71_v36, %v70_v34 }
  0x29   :  { %129 = vst [vmem:[%s187_s3 + $0x8] sm:$0xff] %v126_v37  }

// kernel: run.62
= control target key start
LH: loop header
LB: loop body
LE: loop exit
PB: predicated region body
PF: predicated region fallthrough
CT: control target
= control target key end

     0   :  { %vm240_vm0 = vcmask 261120   ;;  %v541_v24 = vmov 0.0   ;;  %s655_s1 = inlined_call_operand.vmem [shape: bf16[288,128], index: 1, kind: input, shape index: {}]   ;;  %s656_s0 = inlined_call_operand.vmem [shape: bf16[32,288], index: 0, kind: input, shape index: {}]   ;;  %s657_s3 = inlined_call_operand.vmem [shape: f32[8,128], index: 3, kind: output, shape index: {1}]   ;;  %s658_s2 = inlined_call_operand.vmem [shape: bf16[32,128], index: 2, kind: output, shape index: {0}]  }
   0x1   :  { %v515_v0 = vld [vmem:[%s655_s1 + $0x40] sm:$0xff]   ;;  %v517_v2 = vld [vmem:[%s655_s1 + $0x48] sm:$0xff]   ;;  %v519_v4 = vld [vmem:[%s655_s1 + $0x50] sm:$0xff]   ;;  %57 = vst [vmem:[%s657_s3] sm:$0xff] %v541_v24 }
   0x2   :  { %v516_v1 = vld [vmem:[%s655_s1] sm:$0xff]   ;;  %474 = vmatprep.subr.bf16.mxu0 %v515_v0  ;;  %v518_v3 = vld [vmem:[%s655_s1 + $0x8] sm:$0xff]   ;;  %v520_v5 = vld [vmem:[%s655_s1 + $0x10] sm:$0xff]  }
   0x3   :  { %475 = vmatpush3.bf16.msra.mxu0 %v516_v1  ;;  %v521_v6 = vld [vmem:[%s655_s1 + $0x58] sm:$0xff]   ;;  %v523_v8 = vld [vmem:[%s655_s1 + $0x60] sm:$0xff]   ;;  %v525_v11 = vld [vmem:[%s655_s1 + $0x68] sm:$0xff]  }
   0x4   :  { %476 = vmatprep.subr.bf16.mxu0 %v517_v2  ;;  %v522_v7 = vld [vmem:[%s655_s1 + $0x18] sm:$0xff]   ;;  %v529_v9 = vld [vmem:[%s655_s1 + $0x80] sm:$0xff]   ;;  %v526_v12 = vld [vmem:[%s655_s1 + $0x28] sm:$0xff]  }
   0x5   :  { %v524_v10 = vld [vmem:[%s655_s1 + $0x20] sm:$0xff]   ;;  %506 = vmatprep.subr.bf16.mxu1 %v529_v9  ;;  %v532_v13 = vld [vmem:[%s655_s1 + $0x88] sm:$0xff]   ;;  %v527_v14 = vld [vmem:[%s655_s1 + $0x70] sm:$0xff]  }
   0x6   :  { %507 = vmatpush3.bf16.msra.mxu1 %v529_v9  ;;  %v535_v15 = vld [vmem:[%s656_s0 + $0x4] ss:$12 sps:$4 sm:$0xff]   ;;  %v536_v16 = vld [vmem:[%s656_s0 + $0x8] ss:$12 sps:$4 sm:$0xff]   ;;  %v537_v17 = vld [vmem:[%s656_s0 + $0x20] ss:$12 sps:$4 sm:$0xff]  }
   0x7   :  { %477 = vmatpush3.bf16.msra.mxu0 %v518_v3  ;;  %508 = vmatprep.subr.bf16.mxu1 %v532_v13  ;;  %v528_v18 = vld [vmem:[%s655_s1 + $0x30] sm:$0xff]   ;;  %v530_v19 = vld [vmem:[%s655_s1 + $0x78] sm:$0xff]   ;;  %v533_v21 = vld [vmem:[%s656_s0] ss:$12 sps:$4 sm:$0xff]  }
   0x8   :  { %478 = vmatprep.subr.bf16.mxu0 %v519_v4  ;;  %279 = vmatprep.mubr.bf16.mxu0 %v535_v15  ;;  %v531_v20 = vld [vmem:[%s655_s1 + $0x38] sm:$0xff]   ;;  %v365_v2 = vld [vmem:[%s657_s3] sm:$0x1] }
   0x9   :  { %510 = vmatprep.mubr.msk.bf16.mxu1 %vm240_vm0, %v536_v16  ;;  %v538_v22 = vld [vmem:[%s656_s0 + $0x1c] ss:$12 sps:$4 sm:$0xff]   ;;  %v540_v23 = vld [vmem:[%s656_s0 + $0x18] ss:$12 sps:$4 sm:$0xff]  }
   0xa   :  { %509 = vmatpush3.bf16.msra.mxu1 %v532_v13 }
   0xb   :  { %479 = vmatpush3.bf16.msra.mxu0 %v520_v5  ;;  %v377_v5 = vld [vmem:[%s657_s3 + $0x1] sm:$0x1] }
   0xc   :  { %480 = vmatprep.subr.bf16.mxu0 %v521_v6 }
   0xd   :  { %511 = vmatmul.mubr.msk.bf16.vlgmr.msra.gmra.mrb[0].mxu1 %vm240_vm0, %v537_v17 }
   0xf   :  { %481 = vmatpush3.bf16.msra.mxu0 %v522_v7 }
  0x10   :  { %482 = vmatprep.subr.bf16.mxu0 %v523_v8 }
  0x13   :  { %483 = vmatpush3.bf16.msra.mxu0 %v524_v10 }
  0x14   :  { %484 = vmatprep.subr.bf16.mxu0 %v525_v11 }
  0x17   :  { %485 = vmatpush3.bf16.msra.mxu0 %v526_v12 }
  0x18   :  { %486 = vmatprep.subr.bf16.mxu0 %v527_v14 }
  0x1b   :  { %487 = vmatpush3.bf16.msra.mxu0 %v528_v18 }
  0x1c   :  { %488 = vmatprep.subr.bf16.mxu0 %v530_v19 }
  0x1f   :  { %489 = vmatpush3.bf16.msra.mxu0 %v531_v20 }
  0x22   :  { %280 = vmatmul.mubr.bf16.vlgmr.msra.gmra.mrb[0].mxu0 %v533_v21 }
  0x23   :  { %287 = vmatprep.mubr.bf16.mxu0 %v538_v22 }
  0x2a   :  { %288 = vmatmul.mubr.bf16.gmra.mrb[4].mxu0 %v540_v23 }
  0xe0   :  { %v512_v25 = vpop.f32.mrb[0].mxu1 }
  0xe1   :  { %v330_v26 = vpop.f32.mrb[1].mxu1 }
  0xe2   :  { %v513_v27 = vpop.f32.mrb[2].mxu1 }
  0xe3   :  { %v333_v28 = vpop.f32.mrb[3].mxu1 }
  0xf5   :  { %v490_v29 = vpop.f32.mrb[0].mxu0 }
  0xf6   :  { %v491_v30 = vpop.f32.mrb[1].mxu0 }
  0xf7   :  { %v492_v31 = vadd.f32 %v491_v30, %v490_v29  ;;  %v493_v32 = vpop.f32.mrb[2].mxu0 }
  0xf8   :  { %v494_v33 = vpop.f32.mrb[3].mxu0 }
  0xf9   :  { %v495_v34 = vadd.f32 %v494_v33, %v493_v32  ;;  %v331_v35 = vadd.f32 %v492_v31, %v330_v26 }
  0xfb   :  { %v334_v36 = vadd.f32 %v495_v34, %v333_v28  ;;  %v378_v37 = vmul.f32 %v331_v35, %v331_v35 }
  0xfd   :  { %v466_v38 = vpack.c.bf16 %v334_v36, %v331_v35  ;;  %v366_v39 = vadd.f32 %v334_v36, %v331_v35  ;;  %v379_v40 = vmul.f32 %v334_v36, %v334_v36  ;;  %v496_v41 = vpop.f32.mrb[4].mxu0 }
  0xfe   :  { %v497_v42 = vpop.f32.mrb[5].mxu0 }
  0xff   :  { %467 = vst [vmem:[%s658_s2] sm:$0xff] %v466_v38   ;;  %v382_v43 = vadd.f32 %v379_v40, %v378_v37  ;;  %v498_v44 = vadd.f32 %v497_v42, %v496_v41  ;;  %v499_v45 = vpop.f32.mrb[6].mxu0 }
 0x100   :  { %v500_v46 = vpop.f32.mrb[7].mxu0 }
 0x101   :  { %v339_v47 = vadd.f32 %v512_v25, %v498_v44  ;;  %v501_v48 = vadd.f32 %v500_v46, %v499_v45 }
 0x103   :  { %v367_v49 = vadd.f32 %v366_v39, %v339_v47  ;;  %v380_v50 = vmul.f32 %v339_v47, %v339_v47  ;;  %v342_v51 = vadd.f32 %v513_v27, %v501_v48 }
 0x105   :  { %v383_v52 = vadd.f32 %v382_v43, %v380_v50  ;;  %v471_v53 = vpack.c.bf16 %v342_v51, %v339_v47  ;;  %v368_v54 = vadd.f32 %v367_v49, %v342_v51  ;;  %v381_v55 = vmul.f32 %v342_v51, %v342_v51 }
 0x107   :  { %473 = vst [vmem:[%s658_s2 + $0x8] sm:$0xff] %v471_v53   ;;  %v369_v56 = vrot.slane %v368_v54, 4  ;;  %v384_v57 = vadd.f32 %v383_v52, %v381_v55 }
 0x109   :  { %v370_v58 = vadd.f32 %v369_v56, %v368_v54  ;;  %v385_v59 = vrot.slane %v384_v57, 4 }
 0x10b   :  { %v371_v60 = vrot.slane %v370_v58, 2  ;;  %v386_v61 = vadd.f32 %v385_v59, %v384_v57 }
 0x10d   :  { %v372_v62 = vadd.f32 %v371_v60, %v370_v58  ;;  %v387_v63 = vrot.slane %v386_v61, 2 }
 0x10f   :  { %v373_v0 = vrot.slane %v372_v62, 1  ;;  %v388_v1 = vadd.f32 %v387_v63, %v386_v61 }
 0x111   :  { %v374_v3 = vadd.f32 %v373_v0, %v372_v62  ;;  %v389_v4 = vrot.slane %v388_v1, 1 }
 0x113   :  { %v375_v6 = vadd.f32 %v374_v3, %v365_v2  ;;  %v390_v7 = vadd.f32 %v389_v4, %v388_v1 }
 0x115   :  { %376 = vst [vmem:[%s657_s3] sm:$0x1] %v375_v6  ;;  %v391_v8 = vadd.f32 %v390_v7, %v377_v5 }
 0x117   :  { %392 = vst [vmem:[%s657_s3 + $0x1] sm:$0x1] %v391_v8 }

// kernel: run.64
= control target key start
LH: loop header
LB: loop body
LE: loop exit
PB: predicated region body
PF: predicated region fallthrough
CT: control target
= control target key end

     0   :  { %vm117_vm0 = vcmask 785408   ;;  %v319_v8 = vmov 0.0   ;;  %s387_s1 = inlined_call_operand.vmem [shape: bf16[96,128], index: 1, kind: input, shape index: {}]   ;;  %s388_s0 = inlined_call_operand.vmem [shape: bf16[32,96], index: 0, kind: input, shape index: {}]   ;;  %s389_s3 = inlined_call_operand.vmem [shape: f32[8,128], index: 3, kind: output, shape index: {1}]   ;;  %s390_s2 = inlined_call_operand.vmem [shape: bf16[32,128], index: 2, kind: output, shape index: {0}]  }
   0x1   :  { %v311_v0 = vld [vmem:[%s387_s1] sm:$0xff]   ;;  %v312_v1 = vld [vmem:[%s387_s1 + $0x8] sm:$0xff]   ;;  %v313_v2 = vld [vmem:[%s387_s1 + $0x10] sm:$0xff]   ;;  %54 = vst [vmem:[%s389_s3] sm:$0xff] %v319_v8 }
   0x2   :  { %294 = vmatprep.subr.bf16.mxu0 %v311_v0  ;;  %v317_v3 = vld [vmem:[%s388_s0] sm:$0xff]   ;;  %v314_v4 = vld [vmem:[%s387_s1 + $0x18] sm:$0xff]   ;;  %v316_v6 = vld [vmem:[%s387_s1 + $0x28] sm:$0xff]  }
   0x3   :  { %295 = vmatpush3.bf16.msra.mxu0 %v311_v0  ;;  %306 = vmatprep.mubr.msk.bf16.mxu0 %vm117_vm0, %v317_v3  ;;  %v315_v5 = vld [vmem:[%s387_s1 + $0x20] sm:$0xff]   ;;  %v318_v7 = vld [vmem:[%s388_s0 + $0x8] sm:$0xff]  }
   0x4   :  { %296 = vmatprep.subr.bf16.mxu0 %v312_v1 }
   0x7   :  { %297 = vmatpush3.bf16.msra.mxu0 %v312_v1 }
   0x8   :  { %298 = vmatprep.subr.bf16.mxu0 %v313_v2  ;;  %v193_v34 = vld [vmem:[%s389_s3] sm:$0x1]  ;;  %v205_v37 = vld [vmem:[%s389_s3 + $0x1] sm:$0x1] }
   0xb   :  { %299 = vmatpush3.bf16.msra.mxu0 %v313_v2 }
   0xc   :  { %300 = vmatprep.subr.bf16.mxu0 %v314_v4 }
   0xf   :  { %301 = vmatpush3.bf16.msra.mxu0 %v314_v4 }
  0x10   :  { %302 = vmatprep.subr.bf16.mxu0 %v315_v5 }
  0x13   :  { %303 = vmatpush3.bf16.msra.mxu0 %v315_v5 }
  0x14   :  { %304 = vmatprep.subr.bf16.mxu0 %v316_v6 }
  0x17   :  { %305 = vmatpush3.bf16.msra.mxu0 %v316_v6 }
  0x1a   :  { %307 = vmatmul.mubr.msk.bf16.vlgmr.msra.gmra.mrb[0].mxu0 %vm117_vm0, %v318_v7 }
  0xed   :  { %v308_v9 = vpop.f32.mrb[0].mxu0 }
  0xee   :  { %v158_v10 = vpop.f32.mrb[1].mxu0  ;;  %v208_v18 = vmul.f32 %v308_v9, %v308_v9 }
  0xef   :  { %v309_v11 = vpop.f32.mrb[2].mxu0  ;;  %v206_v14 = vmul.f32 %v158_v10, %v158_v10 }
  0xf0   :  { %v283_v12 = vpack.c.bf16 %v309_v11, %v308_v9  ;;  %v161_v13 = vpop.f32.mrb[3].mxu0  ;;  %v209_v21 = vmul.f32 %v309_v11, %v309_v11 }
  0xf1   :  { %v278_v15 = vpack.c.bf16 %v161_v13, %v158_v10  ;;  %v194_v16 = vadd.f32 %v161_v13, %v158_v10  ;;  %v207_v17 = vmul.f32 %v161_v13, %v161_v13 }
  0xf2   :  { %285 = vst [vmem:[%s390_s2 + $0x8] sm:$0xff] %v283_v12  }
  0xf3   :  { %279 = vst [vmem:[%s390_s2] sm:$0xff] %v278_v15   ;;  %v195_v19 = vadd.f32 %v308_v9, %v194_v16  ;;  %v210_v20 = vadd.f32 %v207_v17, %v206_v14 }
  0xf5   :  { %v196_v22 = vadd.f32 %v309_v11, %v195_v19  ;;  %v211_v23 = vadd.f32 %v210_v20, %v208_v18 }
  0xf7   :  { %v197_v24 = vrot.slane %v196_v22, 4  ;;  %v212_v25 = vadd.f32 %v211_v23, %v209_v21 }
  0xf9   :  { %v198_v26 = vadd.f32 %v197_v24, %v196_v22  ;;  %v213_v27 = vrot.slane %v212_v25, 4 }
  0xfb   :  { %v199_v28 = vrot.slane %v198_v26, 2  ;;  %v214_v29 = vadd.f32 %v213_v27, %v212_v25 }
  0xfd   :  { %v200_v30 = vadd.f32 %v199_v28, %v198_v26  ;;  %v215_v31 = vrot.slane %v214_v29, 2 }
  0xff   :  { %v201_v32 = vrot.slane %v200_v30, 1  ;;  %v216_v33 = vadd.f32 %v215_v31, %v214_v29 }
 0x101   :  { %v202_v35 = vadd.f32 %v201_v32, %v200_v30  ;;  %v217_v36 = vrot.slane %v216_v33, 1 }
 0x103   :  { %v203_v38 = vadd.f32 %v202_v35, %v193_v34  ;;  %v218_v39 = vadd.f32 %v217_v36, %v216_v33 }
 0x105   :  { %204 = vst [vmem:[%s389_s3] sm:$0x1] %v203_v38  ;;  %v219_v40 = vadd.f32 %v218_v39, %v205_v37 }
 0x107   :  { %220 = vst [vmem:[%s389_s3 + $0x1] sm:$0x1] %v219_v40 }

</bundles_post_ra>
